<compile_context>
chip_gen: v7x
topology: tpu7x:2x2x1
jax: 0.10.0
libtpu: 0.0.40
codegen_flags: <defaults>
</compile_context>

<pallas_src>
import jax
import jax.numpy as jnp
from jax.experimental import pallas as pl

# ----------------------------- config (small) --------------------------------
VOCAB = 128          # must exceed mask_token_id=103
HIDDEN = 32
N_HEADS = 2
HEAD_DIM = HIDDEN // N_HEADS
INTER = 64
N_LAYERS = 2
SEQ = 16
BATCH = 2
MASK_TOKEN_ID = 103
ANSWER_IDS = (5, 17, 42, 99)
NUM_ANS = len(ANSWER_IDS)
LN_EPS = 1e-12

HP = 128                      # lane-padded hidden / intermediate width
T_TOK = BATCH * SEQ           # 32 token rows (both sequences flattened)
ATT_SCALE = 1.0 / (HEAD_DIM ** 0.5)


# ----------------------------- fused pallas kernel ----------------------------
def _fused_bert_kernel(x_ref, bias_ref, sel_ref,
                       emb_g_ref, emb_b_ref,
                       wqkv_ref, bqkv_ref, wo_ref, bo_ref, ln1g_ref, ln1b_ref,
                       wi_ref, bi_ref, wo2_ref, bo2_ref, ln2g_ref, ln2b_ref,
                       mlmw_ref, mlmb_ref, mlng_ref, mlnb_ref,
                       decw_ref, decb_ref,
                       out_ref):
    f32 = jnp.float32
    bf16 = jnp.bfloat16

    lane = jax.lax.broadcasted_iota(jnp.int32, (1, HP), 1)
    lmask = (lane < HIDDEN).astype(f32)          # valid hidden lanes
    inv_h = 1.0 / HIDDEN

    def layernorm(v, g, b):
        # LN over the real HIDDEN lanes only; padded lanes stay exactly zero
        vm = v * lmask
        mu = jnp.sum(vm, axis=-1, keepdims=True) * inv_h
        c = (vm - mu) * lmask
        var = jnp.sum(c * c, axis=-1, keepdims=True) * inv_h
        return c * jax.lax.rsqrt(var + LN_EPS) * g + b

    def dense(v, w_bf16, b_f32):
        # bf16 MXU inputs, f32 accumulation; bias add in f32 on the VPU
        return jnp.dot(v.astype(bf16), w_bf16, preferred_element_type=f32) + b_f32

    # embedding layernorm (residual-free)
    x = layernorm(x_ref[...], emb_g_ref[...], emb_b_ref[...])      # [T, HP]
    bias = bias_ref[...]                                           # [T, T]

    for l in range(N_LAYERS):
        # ---- self-attention: packed QKV, heads via lane masks -----------------
        qkv = dense(x, wqkv_ref[l], bqkv_ref[l])                   # [T, 3*HP]
        q = qkv[:, 0:HP]
        k = qkv[:, HP:2 * HP]
        v = qkv[:, 2 * HP:3 * HP]

        ctx = jnp.zeros((T_TOK, HP), f32)
        for h in range(N_HEADS):
            lo = h * HEAD_DIM
            hm = ((lane >= lo) & (lane < lo + HEAD_DIM)).astype(f32)
            # contract over the hidden lanes; q is head-masked so only this
            # head's dH columns contribute (no in-kernel transpose of k).
            s = jax.lax.dot_general(
                (q * hm).astype(bf16), k.astype(bf16),
                (((1,), (1,)), ((), ())), preferred_element_type=f32)
            s = s * ATT_SCALE + bias                               # [T, T]
            m = jnp.max(s, axis=-1, keepdims=True)
            e = jnp.exp(s - m)
            p = e * pl.reciprocal(jnp.sum(e, axis=-1, keepdims=True), approx=True)
            # head-masked V drops its contribution into the right lanes
            ctx = ctx + jnp.dot(p.astype(bf16), (v * hm).astype(bf16),
                                preferred_element_type=f32)

        attn_out = dense(ctx, wo_ref[l], bo_ref[l])
        x = layernorm(x + attn_out, ln1g_ref[l], ln1b_ref[l])      # fused residual

        # ---- feed-forward ------------------------------------------------------
        # TODO(synk): HF BERT uses the exact erf GELU; tanh approximation here.
        ffh = jax.nn.gelu(dense(x, wi_ref[l], bi_ref[l]), approximate=True)
        ff = dense(ffh, wo2_ref[l], bo2_ref[l])
        x = layernorm(x + ff, ln2g_ref[l], ln2b_ref[l])            # fused residual

    # ---- MLM head only on the gathered [MASK] rows (one-hot selection matmul) --
    g = jnp.dot(sel_ref[...], x, preferred_element_type=f32)       # [B, HP]
    hmlm = jax.nn.gelu(dense(g, mlmw_ref[...], mlmb_ref[...]), approximate=True)
    hmlm = layernorm(hmlm, mlng_ref[...], mlnb_ref[...])
    out_ref[...] = dense(hmlm, decw_ref[...], decb_ref[...]).astype(out_ref.dtype)


def fused_bert_call(x_pad, bias, sel, p):
    """Whole BERT encoder + MLM head at the mask rows, one pallas_call."""
    return pl.pallas_call(
        _fused_bert_kernel,
        out_shape=jax.ShapeDtypeStruct((BATCH, VOCAB), jnp.float32),
    )(x_pad, bias, sel,
      p["emb_ln_g"], p["emb_ln_b"],
      p["wqkv"], p["bqkv"], p["wo"], p["bo"], p["ln1_g"], p["ln1_b"],
      p["wi"], p["bi"], p["wo2"], p["bo2"], p["ln2_g"], p["ln2_b"],
      p["mlm_w"], p["mlm_b"], p["mlm_ln_g"], p["mlm_ln_b"],
      p["dec_w"], p["dec_b"])


# ----------------------------- model (glue) -----------------------------------
def model_forward(packed, batch_enc, batch_attn, batch_labs):
    """BERTPrompt4NR.forward: returns (loss, softmax(answer_logits))."""
    B, S = batch_enc.shape
    T = B * S

    # embeddings (gathers stay in plain JAX)
    x = jnp.take(packed["word_emb"], batch_enc, axis=0)            # [B, S, H]
    x = x + packed["pos_emb"][None, :, :] + packed["type_emb"][None, None, :]
    x = x.reshape(T, HIDDEN)
    x = jnp.pad(x, ((0, 0), (0, HP - HIDDEN)))                     # [T, HP]

    # additive attention bias: block-diagonal per example + key padding mask
    row_batch = jnp.arange(T) // S
    same_batch = row_batch[:, None] == row_batch[None, :]
    key_valid = (batch_attn.reshape(T) > 0)[None, :]
    bias = jnp.where(same_batch & key_valid, 0.0, -1e9).astype(jnp.float32)

    # last [MASK] position per example -> one-hot row-selection matrix [B, T]
    # TODO(synk): rows with no [MASK] select nothing (all-zero one-hot row).
    positions = jnp.arange(S)[None, :]
    last_mask = jnp.max(jnp.where(batch_enc == MASK_TOKEN_ID, positions, -1), axis=1)
    sel = jax.nn.one_hot(jnp.arange(B) * S + last_mask, T, dtype=jnp.float32)

    mask_logits = fused_bert_call(x, bias, sel, packed)            # [B, VOCAB]

    # tiny answer-id gather + CE + softmax in plain JAX (sub-tile shapes)
    answer_logits = mask_logits[:, jnp.array(ANSWER_IDS)]          # [B, A]
    logp = jax.nn.log_softmax(answer_logits, axis=-1)
    onehot = jax.nn.one_hot(batch_labs, NUM_ANS, dtype=jnp.float32)
    loss = -jnp.mean(jnp.sum(onehot * logp, axis=-1))
    probs = jax.nn.softmax(answer_logits, axis=-1)
    return loss, probs


# ----------------------------- parameter init / packing -----------------------
def init_params(key):
    # TODO(synk): reference loads pretrained HF weights + resize_token_embeddings;
    # here weights are deterministic synthetic N(0, 0.02).
    keys = iter(jax.random.split(key, 16 + 16 * N_LAYERS))

    def nrm(shape):
        return jax.random.normal(next(keys), shape, jnp.float32) * 0.02

    params = {
        "word_emb": nrm((VOCAB, HIDDEN)),
        "pos_emb": nrm((SEQ, HIDDEN)),
        "type_emb": nrm((HIDDEN,)),
        "emb_ln_g": jnp.ones((HIDDEN,), jnp.float32),
        "emb_ln_b": jnp.zeros((HIDDEN,), jnp.float32),
        "mlm_dense_w": nrm((HIDDEN, HIDDEN)),
        "mlm_dense_b": jnp.zeros((HIDDEN,), jnp.float32),
        "mlm_ln_g": jnp.ones((HIDDEN,), jnp.float32),
        "mlm_ln_b": jnp.zeros((HIDDEN,), jnp.float32),
        "decoder_w": nrm((HIDDEN, VOCAB)),
        "decoder_b": jnp.zeros((VOCAB,), jnp.float32),
        "layers": [],
    }
    for _ in range(N_LAYERS):
        params["layers"].append({
            "wq": nrm((HIDDEN, HIDDEN)), "bq": jnp.zeros((HIDDEN,), jnp.float32),
            "wk": nrm((HIDDEN, HIDDEN)), "bk": jnp.zeros((HIDDEN,), jnp.float32),
            "wv": nrm((HIDDEN, HIDDEN)), "bv": jnp.zeros((HIDDEN,), jnp.float32),
            "wo": nrm((HIDDEN, HIDDEN)), "bo": jnp.zeros((HIDDEN,), jnp.float32),
            "ln1_g": jnp.ones((HIDDEN,), jnp.float32),
            "ln1_b": jnp.zeros((HIDDEN,), jnp.float32),
            "wi": nrm((HIDDEN, INTER)), "bi": jnp.zeros((INTER,), jnp.float32),
            "wo2": nrm((INTER, HIDDEN)), "bo2": jnp.zeros((HIDDEN,), jnp.float32),
            "ln2_g": jnp.ones((HIDDEN,), jnp.float32),
            "ln2_b": jnp.zeros((HIDDEN,), jnp.float32),
        })
    return params


def _padw(w, rows, cols, dtype=jnp.bfloat16):
    """Zero-pad a matmul weight to [rows, cols] and store it in bf16 (MXU input)."""
    out = jnp.zeros((rows, cols), jnp.float32).at[:w.shape[0], :w.shape[1]].set(w)
    return out.astype(dtype)


def _padv(v, cols):
    """Zero-pad a bias / LN vector to a lane-dense [1, cols] f32 row."""
    return jnp.zeros((1, cols), jnp.float32).at[0, :v.shape[0]].set(v)


def pack_params(raw):
    packed = {
        "word_emb": raw["word_emb"],
        "pos_emb": raw["pos_emb"],
        "type_emb": raw["type_emb"],
        "emb_ln_g": _padv(raw["emb_ln_g"], HP),
        "emb_ln_b": _padv(raw["emb_ln_b"], HP),
        "mlm_w": _padw(raw["mlm_dense_w"], HP, HP),
        "mlm_b": _padv(raw["mlm_dense_b"], HP),
        "mlm_ln_g": _padv(raw["mlm_ln_g"], HP),
        "mlm_ln_b": _padv(raw["mlm_ln_b"], HP),
        "dec_w": _padw(raw["decoder_w"], HP, VOCAB),
        "dec_b": _padv(raw["decoder_b"], VOCAB),
    }
    wqkv, bqkv, wo, bo, ln1g, ln1b = [], [], [], [], [], []
    wi, bi, wo2, bo2, ln2g, ln2b = [], [], [], [], [], []
    for lp in raw["layers"]:
        wqkv.append(jnp.concatenate([_padw(lp["wq"], HP, HP),
                                     _padw(lp["wk"], HP, HP),
                                     _padw(lp["wv"], HP, HP)], axis=1))
        bqkv.append(jnp.concatenate([_padv(lp["bq"], HP),
                                     _padv(lp["bk"], HP),
                                     _padv(lp["bv"], HP)], axis=1))
        wo.append(_padw(lp["wo"], HP, HP));   bo.append(_padv(lp["bo"], HP))
        ln1g.append(_padv(lp["ln1_g"], HP));  ln1b.append(_padv(lp["ln1_b"], HP))
        wi.append(_padw(lp["wi"], HP, HP));   bi.append(_padv(lp["bi"], HP))
        wo2.append(_padw(lp["wo2"], HP, HP)); bo2.append(_padv(lp["bo2"], HP))
        ln2g.append(_padv(lp["ln2_g"], HP));  ln2b.append(_padv(lp["ln2_b"], HP))
    packed.update({
        "wqkv": jnp.stack(wqkv), "bqkv": jnp.stack(bqkv),
        "wo": jnp.stack(wo), "bo": jnp.stack(bo),
        "ln1_g": jnp.stack(ln1g), "ln1_b": jnp.stack(ln1b),
        "wi": jnp.stack(wi), "bi": jnp.stack(bi),
        "wo2": jnp.stack(wo2), "bo2": jnp.stack(bo2),
        "ln2_g": jnp.stack(ln2g), "ln2_b": jnp.stack(ln2b),
    })
    return packed


# ----------------------------- main -------------------------------------------
if __name__ == "__main__":
    key = jax.random.PRNGKey(0)
    k_param, k_ids, k_lab = jax.random.split(key, 3)

    raw_params = init_params(k_param)
    packed_params = pack_params(raw_params)

    # inputs: random tokens in [0, 100), one [MASK] (id 103) per row at SEQ-2
    batch_enc = jax.random.randint(k_ids, (BATCH, SEQ), 0, 100, dtype=jnp.int32)
    batch_enc = batch_enc.at[:, SEQ - 2].set(MASK_TOKEN_ID)
    batch_attn = jnp.ones((BATCH, SEQ), jnp.int32)
    batch_labs = jax.random.randint(k_lab, (BATCH,), 0, NUM_ANS, dtype=jnp.int32)

    fwd = jax.jit(model_forward)
    loss, probs = fwd(packed_params, batch_enc, batch_attn, batch_labs)
    jax.block_until_ready((loss, probs))

    assert probs.shape == (BATCH, NUM_ANS)
    assert loss.shape == ()
    assert bool(jnp.isfinite(loss))
    assert bool(jnp.all(jnp.abs(jnp.sum(probs, axis=-1) - 1.0) < 1e-3))
    print("KERNEL_OK")
</pallas_src>

<mosaic_0001>
module attributes {stable_mosaic.version = 11 : i64} {
  func.func @_fused_bert_kernel(%arg0: memref<32x128xf32, #tpu.memory_space<vmem>>, %arg1: memref<32x32xf32, #tpu.memory_space<vmem>>, %arg2: memref<2x32xf32, #tpu.memory_space<vmem>>, %arg3: memref<1x128xf32, #tpu.memory_space<vmem>>, %arg4: memref<1x128xf32, #tpu.memory_space<vmem>>, %arg5: memref<2x128x384xbf16, #tpu.memory_space<vmem>>, %arg6: memref<2x1x384xf32, #tpu.memory_space<vmem>>, %arg7: memref<2x128x128xbf16, #tpu.memory_space<vmem>>, %arg8: memref<2x1x128xf32, #tpu.memory_space<vmem>>, %arg9: memref<2x1x128xf32, #tpu.memory_space<vmem>>, %arg10: memref<2x1x128xf32, #tpu.memory_space<vmem>>, %arg11: memref<2x128x128xbf16, #tpu.memory_space<vmem>>, %arg12: memref<2x1x128xf32, #tpu.memory_space<vmem>>, %arg13: memref<2x128x128xbf16, #tpu.memory_space<vmem>>, %arg14: memref<2x1x128xf32, #tpu.memory_space<vmem>>, %arg15: memref<2x1x128xf32, #tpu.memory_space<vmem>>, %arg16: memref<2x1x128xf32, #tpu.memory_space<vmem>>, %arg17: memref<128x128xbf16, #tpu.memory_space<vmem>>, %arg18: memref<1x128xf32, #tpu.memory_space<vmem>>, %arg19: memref<1x128xf32, #tpu.memory_space<vmem>>, %arg20: memref<1x128xf32, #tpu.memory_space<vmem>>, %arg21: memref<128x128xbf16, #tpu.memory_space<vmem>>, %arg22: memref<1x128xf32, #tpu.memory_space<vmem>>, %arg23: memref<2x128xf32, #tpu.memory_space<vmem>>) attributes {dimension_semantics = [], scalar_prefetch = 0 : i64, scratch_operands = 0 : i64, tpu.core_type = #tpu.core_type<tc>} {
    %0 = tpu.iota {dimensions = array<i32: 1>} : vector<1x128xi32>
    %c32_i32 = arith.constant 32 : i32
    %1 = vector.broadcast %c32_i32 : i32 to vector<1x128xi32>
    %2 = arith.cmpi slt, %0, %1 : vector<1x128xi32>
    %3 = arith.extui %2 : vector<1x128xi1> to vector<1x128xi32>
    %4 = arith.sitofp %3 : vector<1x128xi32> to vector<1x128xf32>
    %c0 = arith.constant 0 : index
    %c0_0 = arith.constant 0 : index
    %5 = vector.load %arg0[%c0, %c0_0] : memref<32x128xf32, #tpu.memory_space<vmem>>, vector<32x128xf32>
    %c0_1 = arith.constant 0 : index
    %c0_2 = arith.constant 0 : index
    %6 = vector.load %arg3[%c0_1, %c0_2] : memref<1x128xf32, #tpu.memory_space<vmem>>, vector<1x128xf32>
    %c0_3 = arith.constant 0 : index
    %c0_4 = arith.constant 0 : index
    %7 = vector.load %arg4[%c0_3, %c0_4] : memref<1x128xf32, #tpu.memory_space<vmem>>, vector<1x128xf32>
    %8 = vector.broadcast %4 : vector<1x128xf32> to vector<32x128xf32>
    %9 = arith.mulf %5, %8 : vector<32x128xf32>
    %cst = arith.constant dense<0.000000e+00> : vector<32xf32>
    %10 = vector.multi_reduction <add>, %9, %cst [1] : vector<32x128xf32> to vector<32xf32>
    %11 = vector.shape_cast %10 : vector<32xf32> to vector<32x1xf32>
    %cst_5 = arith.constant 3.125000e-02 : f32
    %12 = vector.broadcast %cst_5 : f32 to vector<32x1xf32>
    %13 = arith.mulf %11, %12 : vector<32x1xf32>
    %14 = vector.broadcast %13 : vector<32x1xf32> to vector<32x128xf32>
    %15 = arith.subf %9, %14 : vector<32x128xf32>
    %16 = vector.broadcast %4 : vector<1x128xf32> to vector<32x128xf32>
    %17 = arith.mulf %15, %16 : vector<32x128xf32>
    %18 = arith.mulf %17, %17 : vector<32x128xf32>
    %cst_6 = arith.constant dense<0.000000e+00> : vector<32xf32>
    %19 = vector.multi_reduction <add>, %18, %cst_6 [1] : vector<32x128xf32> to vector<32xf32>
    %20 = vector.shape_cast %19 : vector<32xf32> to vector<32x1xf32>
    %cst_7 = arith.constant 3.125000e-02 : f32
    %21 = vector.broadcast %cst_7 : f32 to vector<32x1xf32>
    %22 = arith.mulf %20, %21 : vector<32x1xf32>
    %cst_8 = arith.constant 9.99999996E-13 : f32
    %23 = vector.broadcast %cst_8 : f32 to vector<32x1xf32>
    %24 = arith.addf %22, %23 : vector<32x1xf32>
    %25 = math.rsqrt %24 : vector<32x1xf32>
    %26 = vector.broadcast %25 : vector<32x1xf32> to vector<32x128xf32>
    %27 = arith.mulf %17, %26 : vector<32x128xf32>
    %28 = vector.broadcast %6 : vector<1x128xf32> to vector<32x128xf32>
    %29 = arith.mulf %27, %28 : vector<32x128xf32>
    %30 = vector.broadcast %7 : vector<1x128xf32> to vector<32x128xf32>
    %31 = arith.addf %29, %30 : vector<32x128xf32>
    %c0_9 = arith.constant 0 : index
    %c0_10 = arith.constant 0 : index
    %32 = vector.load %arg1[%c0_9, %c0_10] : memref<32x32xf32, #tpu.memory_space<vmem>>, vector<32x32xf32>
    %c0_11 = arith.constant 0 : index
    %c0_12 = arith.constant 0 : index
    %c0_13 = arith.constant 0 : index
    %33 = vector.load %arg5[%c0_11, %c0_12, %c0_13] : memref<2x128x384xbf16, #tpu.memory_space<vmem>>, vector<1x128x384xbf16>
    %34 = vector.shape_cast %33 : vector<1x128x384xbf16> to vector<128x384xbf16>
    %c0_14 = arith.constant 0 : index
    %c0_15 = arith.constant 0 : index
    %c0_16 = arith.constant 0 : index
    %35 = vector.load %arg6[%c0_14, %c0_15, %c0_16] : memref<2x1x384xf32, #tpu.memory_space<vmem>>, vector<1x1x384xf32>
    %36 = vector.shape_cast %35 : vector<1x1x384xf32> to vector<1x384xf32>
    %37 = arith.truncf %31 : vector<32x128xf32> to vector<32x128xbf16>
    %cst_17 = arith.constant dense<0.000000e+00> : vector<32x384xf32>
    %38 = tpu.matmul %37, %34, %cst_17 {dimension_numbers = #tpu.dot_dimension_numbers<[1], [0], [0], [1], [0, 0, 1, 1], [], []>} : vector<32x128xbf16>, vector<128x384xbf16>, vector<32x384xf32> -> vector<32x384xf32>
    %39 = vector.broadcast %36 : vector<1x384xf32> to vector<32x384xf32>
    %40 = arith.addf %38, %39 : vector<32x384xf32>
    %41 = vector.extract_strided_slice %40 {offsets = [0, 0], sizes = [32, 128], strides = [1, 1]} : vector<32x384xf32> to vector<32x128xf32>
    %42 = vector.extract_strided_slice %40 {offsets = [0, 128], sizes = [32, 128], strides = [1, 1]} : vector<32x384xf32> to vector<32x128xf32>
    %43 = vector.extract_strided_slice %40 {offsets = [0, 256], sizes = [32, 128], strides = [1, 1]} : vector<32x384xf32> to vector<32x128xf32>
    %cst_18 = arith.constant 0.000000e+00 : f32
    %44 = vector.broadcast %cst_18 : f32 to vector<32x128xf32>
    %c0_i32 = arith.constant 0 : i32
    %45 = vector.broadcast %c0_i32 : i32 to vector<1x128xi32>
    %46 = arith.cmpi sge, %0, %45 : vector<1x128xi32>
    %c16_i32 = arith.constant 16 : i32
    %47 = vector.broadcast %c16_i32 : i32 to vector<1x128xi32>
    %48 = arith.cmpi slt, %0, %47 : vector<1x128xi32>
    %49 = arith.andi %46, %48 : vector<1x128xi1>
    %50 = arith.extui %49 : vector<1x128xi1> to vector<1x128xi32>
    %51 = arith.sitofp %50 : vector<1x128xi32> to vector<1x128xf32>
    %52 = vector.broadcast %51 : vector<1x128xf32> to vector<32x128xf32>
    %53 = arith.mulf %41, %52 : vector<32x128xf32>
    %54 = arith.truncf %53 : vector<32x128xf32> to vector<32x128xbf16>
    %55 = arith.truncf %42 : vector<32x128xf32> to vector<32x128xbf16>
    %cst_19 = arith.constant dense<0.000000e+00> : vector<32x32xf32>
    %56 = tpu.matmul %54, %55, %cst_19 {dimension_numbers = #tpu.dot_dimension_numbers<[1], [1], [0], [0], [0, 0, 1, 0], [], []>} : vector<32x128xbf16>, vector<32x128xbf16>, vector<32x32xf32> -> vector<32x32xf32>
    %cst_20 = arith.constant 2.500000e-01 : f32
    %57 = vector.broadcast %cst_20 : f32 to vector<32x32xf32>
    %58 = arith.mulf %56, %57 : vector<32x32xf32>
    %59 = arith.addf %58, %32 : vector<32x32xf32>
    %cst_21 = arith.constant dense<0xFF800000> : vector<32xf32>
    %60 = vector.multi_reduction <maximumf>, %59, %cst_21 [1] : vector<32x32xf32> to vector<32xf32>
    %61 = vector.shape_cast %60 : vector<32xf32> to vector<32x1xf32>
    %62 = vector.broadcast %61 : vector<32x1xf32> to vector<32x32xf32>
    %63 = arith.subf %59, %62 : vector<32x32xf32>
    %64 = math.exp %63 : vector<32x32xf32>
    %cst_22 = arith.constant dense<0.000000e+00> : vector<32xf32>
    %65 = vector.multi_reduction <add>, %64, %cst_22 [1] : vector<32x32xf32> to vector<32xf32>
    %66 = vector.shape_cast %65 : vector<32xf32> to vector<32x1xf32>
    %67 = tpu.reciprocal %66 {approx = true} : vector<32x1xf32> -> vector<32x1xf32>
    %68 = vector.broadcast %67 : vector<32x1xf32> to vector<32x32xf32>
    %69 = arith.mulf %64, %68 : vector<32x32xf32>
    %70 = arith.truncf %69 : vector<32x32xf32> to vector<32x32xbf16>
    %71 = vector.broadcast %51 : vector<1x128xf32> to vector<32x128xf32>
    %72 = arith.mulf %43, %71 : vector<32x128xf32>
    %73 = arith.truncf %72 : vector<32x128xf32> to vector<32x128xbf16>
    %cst_23 = arith.constant dense<0.000000e+00> : vector<32x128xf32>
    %74 = tpu.matmul %70, %73, %cst_23 {dimension_numbers = #tpu.dot_dimension_numbers<[1], [0], [0], [1], [0, 0, 1, 1], [], []>} : vector<32x32xbf16>, vector<32x128xbf16>, vector<32x128xf32> -> vector<32x128xf32>
    %75 = arith.addf %44, %74 : vector<32x128xf32>
    %c16_i32_24 = arith.constant 16 : i32
    %76 = vector.broadcast %c16_i32_24 : i32 to vector<1x128xi32>
    %77 = arith.cmpi sge, %0, %76 : vector<1x128xi32>
    %c32_i32_25 = arith.constant 32 : i32
    %78 = vector.broadcast %c32_i32_25 : i32 to vector<1x128xi32>
    %79 = arith.cmpi slt, %0, %78 : vector<1x128xi32>
    %80 = arith.andi %77, %79 : vector<1x128xi1>
    %81 = arith.extui %80 : vector<1x128xi1> to vector<1x128xi32>
    %82 = arith.sitofp %81 : vector<1x128xi32> to vector<1x128xf32>
    %83 = vector.broadcast %82 : vector<1x128xf32> to vector<32x128xf32>
    %84 = arith.mulf %41, %83 : vector<32x128xf32>
    %85 = arith.truncf %84 : vector<32x128xf32> to vector<32x128xbf16>
    %86 = arith.truncf %42 : vector<32x128xf32> to vector<32x128xbf16>
    %cst_26 = arith.constant dense<0.000000e+00> : vector<32x32xf32>
    %87 = tpu.matmul %85, %86, %cst_26 {dimension_numbers = #tpu.dot_dimension_numbers<[1], [1], [0], [0], [0, 0, 1, 0], [], []>} : vector<32x128xbf16>, vector<32x128xbf16>, vector<32x32xf32> -> vector<32x32xf32>
    %cst_27 = arith.constant 2.500000e-01 : f32
    %88 = vector.broadcast %cst_27 : f32 to vector<32x32xf32>
    %89 = arith.mulf %87, %88 : vector<32x32xf32>
    %90 = arith.addf %89, %32 : vector<32x32xf32>
    %cst_28 = arith.constant dense<0xFF800000> : vector<32xf32>
    %91 = vector.multi_reduction <maximumf>, %90, %cst_28 [1] : vector<32x32xf32> to vector<32xf32>
    %92 = vector.shape_cast %91 : vector<32xf32> to vector<32x1xf32>
    %93 = vector.broadcast %92 : vector<32x1xf32> to vector<32x32xf32>
    %94 = arith.subf %90, %93 : vector<32x32xf32>
    %95 = math.exp %94 : vector<32x32xf32>
    %cst_29 = arith.constant dense<0.000000e+00> : vector<32xf32>
    %96 = vector.multi_reduction <add>, %95, %cst_29 [1] : vector<32x32xf32> to vector<32xf32>
    %97 = vector.shape_cast %96 : vector<32xf32> to vector<32x1xf32>
    %98 = tpu.reciprocal %97 {approx = true} : vector<32x1xf32> -> vector<32x1xf32>
    %99 = vector.broadcast %98 : vector<32x1xf32> to vector<32x32xf32>
    %100 = arith.mulf %95, %99 : vector<32x32xf32>
    %101 = arith.truncf %100 : vector<32x32xf32> to vector<32x32xbf16>
    %102 = vector.broadcast %82 : vector<1x128xf32> to vector<32x128xf32>
    %103 = arith.mulf %43, %102 : vector<32x128xf32>
    %104 = arith.truncf %103 : vector<32x128xf32> to vector<32x128xbf16>
    %cst_30 = arith.constant dense<0.000000e+00> : vector<32x128xf32>
    %105 = tpu.matmul %101, %104, %cst_30 {dimension_numbers = #tpu.dot_dimension_numbers<[1], [0], [0], [1], [0, 0, 1, 1], [], []>} : vector<32x32xbf16>, vector<32x128xbf16>, vector<32x128xf32> -> vector<32x128xf32>
    %106 = arith.addf %75, %105 : vector<32x128xf32>
    %c0_31 = arith.constant 0 : index
    %c0_32 = arith.constant 0 : index
    %c0_33 = arith.constant 0 : index
    %107 = vector.load %arg7[%c0_31, %c0_32, %c0_33] : memref<2x128x128xbf16, #tpu.memory_space<vmem>>, vector<1x128x128xbf16>
    %108 = vector.shape_cast %107 : vector<1x128x128xbf16> to vector<128x128xbf16>
    %c0_34 = arith.constant 0 : index
    %c0_35 = arith.constant 0 : index
    %c0_36 = arith.constant 0 : index
    %109 = vector.load %arg8[%c0_34, %c0_35, %c0_36] : memref<2x1x128xf32, #tpu.memory_space<vmem>>, vector<1x1x128xf32>
    %110 = vector.shape_cast %109 : vector<1x1x128xf32> to vector<1x128xf32>
    %111 = arith.truncf %106 : vector<32x128xf32> to vector<32x128xbf16>
    %cst_37 = arith.constant dense<0.000000e+00> : vector<32x128xf32>
    %112 = tpu.matmul %111, %108, %cst_37 {dimension_numbers = #tpu.dot_dimension_numbers<[1], [0], [0], [1], [0, 0, 1, 1], [], []>} : vector<32x128xbf16>, vector<128x128xbf16>, vector<32x128xf32> -> vector<32x128xf32>
    %113 = vector.broadcast %110 : vector<1x128xf32> to vector<32x128xf32>
    %114 = arith.addf %112, %113 : vector<32x128xf32>
    %115 = arith.addf %31, %114 : vector<32x128xf32>
    %c0_38 = arith.constant 0 : index
    %c0_39 = arith.constant 0 : index
    %c0_40 = arith.constant 0 : index
    %116 = vector.load %arg9[%c0_38, %c0_39, %c0_40] : memref<2x1x128xf32, #tpu.memory_space<vmem>>, vector<1x1x128xf32>
    %117 = vector.shape_cast %116 : vector<1x1x128xf32> to vector<1x128xf32>
    %c0_41 = arith.constant 0 : index
    %c0_42 = arith.constant 0 : index
    %c0_43 = arith.constant 0 : index
    %118 = vector.load %arg10[%c0_41, %c0_42, %c0_43] : memref<2x1x128xf32, #tpu.memory_space<vmem>>, vector<1x1x128xf32>
    %119 = vector.shape_cast %118 : vector<1x1x128xf32> to vector<1x128xf32>
    %120 = vector.broadcast %4 : vector<1x128xf32> to vector<32x128xf32>
    %121 = arith.mulf %115, %120 : vector<32x128xf32>
    %cst_44 = arith.constant dense<0.000000e+00> : vector<32xf32>
    %122 = vector.multi_reduction <add>, %121, %cst_44 [1] : vector<32x128xf32> to vector<32xf32>
    %123 = vector.shape_cast %122 : vector<32xf32> to vector<32x1xf32>
    %cst_45 = arith.constant 3.125000e-02 : f32
    %124 = vector.broadcast %cst_45 : f32 to vector<32x1xf32>
    %125 = arith.mulf %123, %124 : vector<32x1xf32>
    %126 = vector.broadcast %125 : vector<32x1xf32> to vector<32x128xf32>
    %127 = arith.subf %121, %126 : vector<32x128xf32>
    %128 = vector.broadcast %4 : vector<1x128xf32> to vector<32x128xf32>
    %129 = arith.mulf %127, %128 : vector<32x128xf32>
    %130 = arith.mulf %129, %129 : vector<32x128xf32>
    %cst_46 = arith.constant dense<0.000000e+00> : vector<32xf32>
    %131 = vector.multi_reduction <add>, %130, %cst_46 [1] : vector<32x128xf32> to vector<32xf32>
    %132 = vector.shape_cast %131 : vector<32xf32> to vector<32x1xf32>
    %cst_47 = arith.constant 3.125000e-02 : f32
    %133 = vector.broadcast %cst_47 : f32 to vector<32x1xf32>
    %134 = arith.mulf %132, %133 : vector<32x1xf32>
    %cst_48 = arith.constant 9.99999996E-13 : f32
    %135 = vector.broadcast %cst_48 : f32 to vector<32x1xf32>
    %136 = arith.addf %134, %135 : vector<32x1xf32>
    %137 = math.rsqrt %136 : vector<32x1xf32>
    %138 = vector.broadcast %137 : vector<32x1xf32> to vector<32x128xf32>
    %139 = arith.mulf %129, %138 : vector<32x128xf32>
    %140 = vector.broadcast %117 : vector<1x128xf32> to vector<32x128xf32>
    %141 = arith.mulf %139, %140 : vector<32x128xf32>
    %142 = vector.broadcast %119 : vector<1x128xf32> to vector<32x128xf32>
    %143 = arith.addf %141, %142 : vector<32x128xf32>
    %c0_49 = arith.constant 0 : index
    %c0_50 = arith.constant 0 : index
    %c0_51 = arith.constant 0 : index
    %144 = vector.load %arg11[%c0_49, %c0_50, %c0_51] : memref<2x128x128xbf16, #tpu.memory_space<vmem>>, vector<1x128x128xbf16>
    %145 = vector.shape_cast %144 : vector<1x128x128xbf16> to vector<128x128xbf16>
    %c0_52 = arith.constant 0 : index
    %c0_53 = arith.constant 0 : index
    %c0_54 = arith.constant 0 : index
    %146 = vector.load %arg12[%c0_52, %c0_53, %c0_54] : memref<2x1x128xf32, #tpu.memory_space<vmem>>, vector<1x1x128xf32>
    %147 = vector.shape_cast %146 : vector<1x1x128xf32> to vector<1x128xf32>
    %148 = arith.truncf %143 : vector<32x128xf32> to vector<32x128xbf16>
    %cst_55 = arith.constant dense<0.000000e+00> : vector<32x128xf32>
    %149 = tpu.matmul %148, %145, %cst_55 {dimension_numbers = #tpu.dot_dimension_numbers<[1], [0], [0], [1], [0, 0, 1, 1], [], []>} : vector<32x128xbf16>, vector<128x128xbf16>, vector<32x128xf32> -> vector<32x128xf32>
    %150 = vector.broadcast %147 : vector<1x128xf32> to vector<32x128xf32>
    %151 = arith.addf %149, %150 : vector<32x128xf32>
    %152 = arith.mulf %151, %151 : vector<32x128xf32>
    %153 = arith.mulf %151, %152 : vector<32x128xf32>
    %cst_56 = arith.constant 4.471500e-02 : f32
    %154 = vector.broadcast %cst_56 : f32 to vector<32x128xf32>
    %155 = arith.mulf %154, %153 : vector<32x128xf32>
    %156 = arith.addf %151, %155 : vector<32x128xf32>
    %cst_57 = arith.constant 0.797884583 : f32
    %157 = vector.broadcast %cst_57 : f32 to vector<32x128xf32>
    %158 = arith.mulf %157, %156 : vector<32x128xf32>
    %159 = math.tanh %158 : vector<32x128xf32>
    %cst_58 = arith.constant 1.000000e+00 : f32
    %160 = vector.broadcast %cst_58 : f32 to vector<32x128xf32>
    %161 = arith.addf %160, %159 : vector<32x128xf32>
    %cst_59 = arith.constant 5.000000e-01 : f32
    %162 = vector.broadcast %cst_59 : f32 to vector<32x128xf32>
    %163 = arith.mulf %162, %161 : vector<32x128xf32>
    %164 = arith.mulf %151, %163 : vector<32x128xf32>
    %c0_60 = arith.constant 0 : index
    %c0_61 = arith.constant 0 : index
    %c0_62 = arith.constant 0 : index
    %165 = vector.load %arg13[%c0_60, %c0_61, %c0_62] : memref<2x128x128xbf16, #tpu.memory_space<vmem>>, vector<1x128x128xbf16>
    %166 = vector.shape_cast %165 : vector<1x128x128xbf16> to vector<128x128xbf16>
    %c0_63 = arith.constant 0 : index
    %c0_64 = arith.constant 0 : index
    %c0_65 = arith.constant 0 : index
    %167 = vector.load %arg14[%c0_63, %c0_64, %c0_65] : memref<2x1x128xf32, #tpu.memory_space<vmem>>, vector<1x1x128xf32>
    %168 = vector.shape_cast %167 : vector<1x1x128xf32> to vector<1x128xf32>
    %169 = arith.truncf %164 : vector<32x128xf32> to vector<32x128xbf16>
    %cst_66 = arith.constant dense<0.000000e+00> : vector<32x128xf32>
    %170 = tpu.matmul %169, %166, %cst_66 {dimension_numbers = #tpu.dot_dimension_numbers<[1], [0], [0], [1], [0, 0, 1, 1], [], []>} : vector<32x128xbf16>, vector<128x128xbf16>, vector<32x128xf32> -> vector<32x128xf32>
    %171 = vector.broadcast %168 : vector<1x128xf32> to vector<32x128xf32>
    %172 = arith.addf %170, %171 : vector<32x128xf32>
    %173 = arith.addf %143, %172 : vector<32x128xf32>
    %c0_67 = arith.constant 0 : index
    %c0_68 = arith.constant 0 : index
    %c0_69 = arith.constant 0 : index
    %174 = vector.load %arg15[%c0_67, %c0_68, %c0_69] : memref<2x1x128xf32, #tpu.memory_space<vmem>>, vector<1x1x128xf32>
    %175 = vector.shape_cast %174 : vector<1x1x128xf32> to vector<1x128xf32>
    %c0_70 = arith.constant 0 : index
    %c0_71 = arith.constant 0 : index
    %c0_72 = arith.constant 0 : index
    %176 = vector.load %arg16[%c0_70, %c0_71, %c0_72] : memref<2x1x128xf32, #tpu.memory_space<vmem>>, vector<1x1x128xf32>
    %177 = vector.shape_cast %176 : vector<1x1x128xf32> to vector<1x128xf32>
    %178 = vector.broadcast %4 : vector<1x128xf32> to vector<32x128xf32>
    %179 = arith.mulf %173, %178 : vector<32x128xf32>
    %cst_73 = arith.constant dense<0.000000e+00> : vector<32xf32>
    %180 = vector.multi_reduction <add>, %179, %cst_73 [1] : vector<32x128xf32> to vector<32xf32>
    %181 = vector.shape_cast %180 : vector<32xf32> to vector<32x1xf32>
    %cst_74 = arith.constant 3.125000e-02 : f32
    %182 = vector.broadcast %cst_74 : f32 to vector<32x1xf32>
    %183 = arith.mulf %181, %182 : vector<32x1xf32>
    %184 = vector.broadcast %183 : vector<32x1xf32> to vector<32x128xf32>
    %185 = arith.subf %179, %184 : vector<32x128xf32>
    %186 = vector.broadcast %4 : vector<1x128xf32> to vector<32x128xf32>
    %187 = arith.mulf %185, %186 : vector<32x128xf32>
    %188 = arith.mulf %187, %187 : vector<32x128xf32>
    %cst_75 = arith.constant dense<0.000000e+00> : vector<32xf32>
    %189 = vector.multi_reduction <add>, %188, %cst_75 [1] : vector<32x128xf32> to vector<32xf32>
    %190 = vector.shape_cast %189 : vector<32xf32> to vector<32x1xf32>
    %cst_76 = arith.constant 3.125000e-02 : f32
    %191 = vector.broadcast %cst_76 : f32 to vector<32x1xf32>
    %192 = arith.mulf %190, %191 : vector<32x1xf32>
    %cst_77 = arith.constant 9.99999996E-13 : f32
    %193 = vector.broadcast %cst_77 : f32 to vector<32x1xf32>
    %194 = arith.addf %192, %193 : vector<32x1xf32>
    %195 = math.rsqrt %194 : vector<32x1xf32>
    %196 = vector.broadcast %195 : vector<32x1xf32> to vector<32x128xf32>
    %197 = arith.mulf %187, %196 : vector<32x128xf32>
    %198 = vector.broadcast %175 : vector<1x128xf32> to vector<32x128xf32>
    %199 = arith.mulf %197, %198 : vector<32x128xf32>
    %200 = vector.broadcast %177 : vector<1x128xf32> to vector<32x128xf32>
    %201 = arith.addf %199, %200 : vector<32x128xf32>
    %c1 = arith.constant 1 : index
    %c0_78 = arith.constant 0 : index
    %c0_79 = arith.constant 0 : index
    %202 = vector.load %arg5[%c1, %c0_78, %c0_79] : memref<2x128x384xbf16, #tpu.memory_space<vmem>>, vector<1x128x384xbf16>
    %203 = vector.shape_cast %202 : vector<1x128x384xbf16> to vector<128x384xbf16>
    %c1_80 = arith.constant 1 : index
    %c0_81 = arith.constant 0 : index
    %c0_82 = arith.constant 0 : index
    %204 = vector.load %arg6[%c1_80, %c0_81, %c0_82] : memref<2x1x384xf32, #tpu.memory_space<vmem>>, vector<1x1x384xf32>
    %205 = vector.shape_cast %204 : vector<1x1x384xf32> to vector<1x384xf32>
    %206 = arith.truncf %201 : vector<32x128xf32> to vector<32x128xbf16>
    %cst_83 = arith.constant dense<0.000000e+00> : vector<32x384xf32>
    %207 = tpu.matmul %206, %203, %cst_83 {dimension_numbers = #tpu.dot_dimension_numbers<[1], [0], [0], [1], [0, 0, 1, 1], [], []>} : vector<32x128xbf16>, vector<128x384xbf16>, vector<32x384xf32> -> vector<32x384xf32>
    %208 = vector.broadcast %205 : vector<1x384xf32> to vector<32x384xf32>
    %209 = arith.addf %207, %208 : vector<32x384xf32>
    %210 = vector.extract_strided_slice %209 {offsets = [0, 0], sizes = [32, 128], strides = [1, 1]} : vector<32x384xf32> to vector<32x128xf32>
    %211 = vector.extract_strided_slice %209 {offsets = [0, 128], sizes = [32, 128], strides = [1, 1]} : vector<32x384xf32> to vector<32x128xf32>
    %212 = vector.extract_strided_slice %209 {offsets = [0, 256], sizes = [32, 128], strides = [1, 1]} : vector<32x384xf32> to vector<32x128xf32>
    %cst_84 = arith.constant 0.000000e+00 : f32
    %213 = vector.broadcast %cst_84 : f32 to vector<32x128xf32>
    %c0_i32_85 = arith.constant 0 : i32
    %214 = vector.broadcast %c0_i32_85 : i32 to vector<1x128xi32>
    %215 = arith.cmpi sge, %0, %214 : vector<1x128xi32>
    %c16_i32_86 = arith.constant 16 : i32
    %216 = vector.broadcast %c16_i32_86 : i32 to vector<1x128xi32>
    %217 = arith.cmpi slt, %0, %216 : vector<1x128xi32>
    %218 = arith.andi %215, %217 : vector<1x128xi1>
    %219 = arith.extui %218 : vector<1x128xi1> to vector<1x128xi32>
    %220 = arith.sitofp %219 : vector<1x128xi32> to vector<1x128xf32>
    %221 = vector.broadcast %220 : vector<1x128xf32> to vector<32x128xf32>
    %222 = arith.mulf %210, %221 : vector<32x128xf32>
    %223 = arith.truncf %222 : vector<32x128xf32> to vector<32x128xbf16>
    %224 = arith.truncf %211 : vector<32x128xf32> to vector<32x128xbf16>
    %cst_87 = arith.constant dense<0.000000e+00> : vector<32x32xf32>
    %225 = tpu.matmul %223, %224, %cst_87 {dimension_numbers = #tpu.dot_dimension_numbers<[1], [1], [0], [0], [0, 0, 1, 0], [], []>} : vector<32x128xbf16>, vector<32x128xbf16>, vector<32x32xf32> -> vector<32x32xf32>
    %cst_88 = arith.constant 2.500000e-01 : f32
    %226 = vector.broadcast %cst_88 : f32 to vector<32x32xf32>
    %227 = arith.mulf %225, %226 : vector<32x32xf32>
    %228 = arith.addf %227, %32 : vector<32x32xf32>
    %cst_89 = arith.constant dense<0xFF800000> : vector<32xf32>
    %229 = vector.multi_reduction <maximumf>, %228, %cst_89 [1] : vector<32x32xf32> to vector<32xf32>
    %230 = vector.shape_cast %229 : vector<32xf32> to vector<32x1xf32>
    %231 = vector.broadcast %230 : vector<32x1xf32> to vector<32x32xf32>
    %232 = arith.subf %228, %231 : vector<32x32xf32>
    %233 = math.exp %232 : vector<32x32xf32>
    %cst_90 = arith.constant dense<0.000000e+00> : vector<32xf32>
    %234 = vector.multi_reduction <add>, %233, %cst_90 [1] : vector<32x32xf32> to vector<32xf32>
    %235 = vector.shape_cast %234 : vector<32xf32> to vector<32x1xf32>
    %236 = tpu.reciprocal %235 {approx = true} : vector<32x1xf32> -> vector<32x1xf32>
    %237 = vector.broadcast %236 : vector<32x1xf32> to vector<32x32xf32>
    %238 = arith.mulf %233, %237 : vector<32x32xf32>
    %239 = arith.truncf %238 : vector<32x32xf32> to vector<32x32xbf16>
    %240 = vector.broadcast %220 : vector<1x128xf32> to vector<32x128xf32>
    %241 = arith.mulf %212, %240 : vector<32x128xf32>
    %242 = arith.truncf %241 : vector<32x128xf32> to vector<32x128xbf16>
    %cst_91 = arith.constant dense<0.000000e+00> : vector<32x128xf32>
    %243 = tpu.matmul %239, %242, %cst_91 {dimension_numbers = #tpu.dot_dimension_numbers<[1], [0], [0], [1], [0, 0, 1, 1], [], []>} : vector<32x32xbf16>, vector<32x128xbf16>, vector<32x128xf32> -> vector<32x128xf32>
    %244 = arith.addf %213, %243 : vector<32x128xf32>
    %c16_i32_92 = arith.constant 16 : i32
    %245 = vector.broadcast %c16_i32_92 : i32 to vector<1x128xi32>
    %246 = arith.cmpi sge, %0, %245 : vector<1x128xi32>
    %c32_i32_93 = arith.constant 32 : i32
    %247 = vector.broadcast %c32_i32_93 : i32 to vector<1x128xi32>
    %248 = arith.cmpi slt, %0, %247 : vector<1x128xi32>
    %249 = arith.andi %246, %248 : vector<1x128xi1>
    %250 = arith.extui %249 : vector<1x128xi1> to vector<1x128xi32>
    %251 = arith.sitofp %250 : vector<1x128xi32> to vector<1x128xf32>
    %252 = vector.broadcast %251 : vector<1x128xf32> to vector<32x128xf32>
    %253 = arith.mulf %210, %252 : vector<32x128xf32>
    %254 = arith.truncf %253 : vector<32x128xf32> to vector<32x128xbf16>
    %255 = arith.truncf %211 : vector<32x128xf32> to vector<32x128xbf16>
    %cst_94 = arith.constant dense<0.000000e+00> : vector<32x32xf32>
    %256 = tpu.matmul %254, %255, %cst_94 {dimension_numbers = #tpu.dot_dimension_numbers<[1], [1], [0], [0], [0, 0, 1, 0], [], []>} : vector<32x128xbf16>, vector<32x128xbf16>, vector<32x32xf32> -> vector<32x32xf32>
    %cst_95 = arith.constant 2.500000e-01 : f32
    %257 = vector.broadcast %cst_95 : f32 to vector<32x32xf32>
    %258 = arith.mulf %256, %257 : vector<32x32xf32>
    %259 = arith.addf %258, %32 : vector<32x32xf32>
    %cst_96 = arith.constant dense<0xFF800000> : vector<32xf32>
    %260 = vector.multi_reduction <maximumf>, %259, %cst_96 [1] : vector<32x32xf32> to vector<32xf32>
    %261 = vector.shape_cast %260 : vector<32xf32> to vector<32x1xf32>
    %262 = vector.broadcast %261 : vector<32x1xf32> to vector<32x32xf32>
    %263 = arith.subf %259, %262 : vector<32x32xf32>
    %264 = math.exp %263 : vector<32x32xf32>
    %cst_97 = arith.constant dense<0.000000e+00> : vector<32xf32>
    %265 = vector.multi_reduction <add>, %264, %cst_97 [1] : vector<32x32xf32> to vector<32xf32>
    %266 = vector.shape_cast %265 : vector<32xf32> to vector<32x1xf32>
    %267 = tpu.reciprocal %266 {approx = true} : vector<32x1xf32> -> vector<32x1xf32>
    %268 = vector.broadcast %267 : vector<32x1xf32> to vector<32x32xf32>
    %269 = arith.mulf %264, %268 : vector<32x32xf32>
    %270 = arith.truncf %269 : vector<32x32xf32> to vector<32x32xbf16>
    %271 = vector.broadcast %251 : vector<1x128xf32> to vector<32x128xf32>
    %272 = arith.mulf %212, %271 : vector<32x128xf32>
    %273 = arith.truncf %272 : vector<32x128xf32> to vector<32x128xbf16>
    %cst_98 = arith.constant dense<0.000000e+00> : vector<32x128xf32>
    %274 = tpu.matmul %270, %273, %cst_98 {dimension_numbers = #tpu.dot_dimension_numbers<[1], [0], [0], [1], [0, 0, 1, 1], [], []>} : vector<32x32xbf16>, vector<32x128xbf16>, vector<32x128xf32> -> vector<32x128xf32>
    %275 = arith.addf %244, %274 : vector<32x128xf32>
    %c1_99 = arith.constant 1 : index
    %c0_100 = arith.constant 0 : index
    %c0_101 = arith.constant 0 : index
    %276 = vector.load %arg7[%c1_99, %c0_100, %c0_101] : memref<2x128x128xbf16, #tpu.memory_space<vmem>>, vector<1x128x128xbf16>
    %277 = vector.shape_cast %276 : vector<1x128x128xbf16> to vector<128x128xbf16>
    %c1_102 = arith.constant 1 : index
    %c0_103 = arith.constant 0 : index
    %c0_104 = arith.constant 0 : index
    %278 = vector.load %arg8[%c1_102, %c0_103, %c0_104] : memref<2x1x128xf32, #tpu.memory_space<vmem>>, vector<1x1x128xf32>
    %279 = vector.shape_cast %278 : vector<1x1x128xf32> to vector<1x128xf32>
    %280 = arith.truncf %275 : vector<32x128xf32> to vector<32x128xbf16>
    %cst_105 = arith.constant dense<0.000000e+00> : vector<32x128xf32>
    %281 = tpu.matmul %280, %277, %cst_105 {dimension_numbers = #tpu.dot_dimension_numbers<[1], [0], [0], [1], [0, 0, 1, 1], [], []>} : vector<32x128xbf16>, vector<128x128xbf16>, vector<32x128xf32> -> vector<32x128xf32>
    %282 = vector.broadcast %279 : vector<1x128xf32> to vector<32x128xf32>
    %283 = arith.addf %281, %282 : vector<32x128xf32>
    %284 = arith.addf %201, %283 : vector<32x128xf32>
    %c1_106 = arith.constant 1 : index
    %c0_107 = arith.constant 0 : index
    %c0_108 = arith.constant 0 : index
    %285 = vector.load %arg9[%c1_106, %c0_107, %c0_108] : memref<2x1x128xf32, #tpu.memory_space<vmem>>, vector<1x1x128xf32>
    %286 = vector.shape_cast %285 : vector<1x1x128xf32> to vector<1x128xf32>
    %c1_109 = arith.constant 1 : index
    %c0_110 = arith.constant 0 : index
    %c0_111 = arith.constant 0 : index
    %287 = vector.load %arg10[%c1_109, %c0_110, %c0_111] : memref<2x1x128xf32, #tpu.memory_space<vmem>>, vector<1x1x128xf32>
    %288 = vector.shape_cast %287 : vector<1x1x128xf32> to vector<1x128xf32>
    %289 = vector.broadcast %4 : vector<1x128xf32> to vector<32x128xf32>
    %290 = arith.mulf %284, %289 : vector<32x128xf32>
    %cst_112 = arith.constant dense<0.000000e+00> : vector<32xf32>
    %291 = vector.multi_reduction <add>, %290, %cst_112 [1] : vector<32x128xf32> to vector<32xf32>
    %292 = vector.shape_cast %291 : vector<32xf32> to vector<32x1xf32>
    %cst_113 = arith.constant 3.125000e-02 : f32
    %293 = vector.broadcast %cst_113 : f32 to vector<32x1xf32>
    %294 = arith.mulf %292, %293 : vector<32x1xf32>
    %295 = vector.broadcast %294 : vector<32x1xf32> to vector<32x128xf32>
    %296 = arith.subf %290, %295 : vector<32x128xf32>
    %297 = vector.broadcast %4 : vector<1x128xf32> to vector<32x128xf32>
    %298 = arith.mulf %296, %297 : vector<32x128xf32>
    %299 = arith.mulf %298, %298 : vector<32x128xf32>
    %cst_114 = arith.constant dense<0.000000e+00> : vector<32xf32>
    %300 = vector.multi_reduction <add>, %299, %cst_114 [1] : vector<32x128xf32> to vector<32xf32>
    %301 = vector.shape_cast %300 : vector<32xf32> to vector<32x1xf32>
    %cst_115 = arith.constant 3.125000e-02 : f32
    %302 = vector.broadcast %cst_115 : f32 to vector<32x1xf32>
    %303 = arith.mulf %301, %302 : vector<32x1xf32>
    %cst_116 = arith.constant 9.99999996E-13 : f32
    %304 = vector.broadcast %cst_116 : f32 to vector<32x1xf32>
    %305 = arith.addf %303, %304 : vector<32x1xf32>
    %306 = math.rsqrt %305 : vector<32x1xf32>
    %307 = vector.broadcast %306 : vector<32x1xf32> to vector<32x128xf32>
    %308 = arith.mulf %298, %307 : vector<32x128xf32>
    %309 = vector.broadcast %286 : vector<1x128xf32> to vector<32x128xf32>
    %310 = arith.mulf %308, %309 : vector<32x128xf32>
    %311 = vector.broadcast %288 : vector<1x128xf32> to vector<32x128xf32>
    %312 = arith.addf %310, %311 : vector<32x128xf32>
    %c1_117 = arith.constant 1 : index
    %c0_118 = arith.constant 0 : index
    %c0_119 = arith.constant 0 : index
    %313 = vector.load %arg11[%c1_117, %c0_118, %c0_119] : memref<2x128x128xbf16, #tpu.memory_space<vmem>>, vector<1x128x128xbf16>
    %314 = vector.shape_cast %313 : vector<1x128x128xbf16> to vector<128x128xbf16>
    %c1_120 = arith.constant 1 : index
    %c0_121 = arith.constant 0 : index
    %c0_122 = arith.constant 0 : index
    %315 = vector.load %arg12[%c1_120, %c0_121, %c0_122] : memref<2x1x128xf32, #tpu.memory_space<vmem>>, vector<1x1x128xf32>
    %316 = vector.shape_cast %315 : vector<1x1x128xf32> to vector<1x128xf32>
    %317 = arith.truncf %312 : vector<32x128xf32> to vector<32x128xbf16>
    %cst_123 = arith.constant dense<0.000000e+00> : vector<32x128xf32>
    %318 = tpu.matmul %317, %314, %cst_123 {dimension_numbers = #tpu.dot_dimension_numbers<[1], [0], [0], [1], [0, 0, 1, 1], [], []>} : vector<32x128xbf16>, vector<128x128xbf16>, vector<32x128xf32> -> vector<32x128xf32>
    %319 = vector.broadcast %316 : vector<1x128xf32> to vector<32x128xf32>
    %320 = arith.addf %318, %319 : vector<32x128xf32>
    %321 = arith.mulf %320, %320 : vector<32x128xf32>
    %322 = arith.mulf %320, %321 : vector<32x128xf32>
    %cst_124 = arith.constant 4.471500e-02 : f32
    %323 = vector.broadcast %cst_124 : f32 to vector<32x128xf32>
    %324 = arith.mulf %323, %322 : vector<32x128xf32>
    %325 = arith.addf %320, %324 : vector<32x128xf32>
    %cst_125 = arith.constant 0.797884583 : f32
    %326 = vector.broadcast %cst_125 : f32 to vector<32x128xf32>
    %327 = arith.mulf %326, %325 : vector<32x128xf32>
    %328 = math.tanh %327 : vector<32x128xf32>
    %cst_126 = arith.constant 1.000000e+00 : f32
    %329 = vector.broadcast %cst_126 : f32 to vector<32x128xf32>
    %330 = arith.addf %329, %328 : vector<32x128xf32>
    %cst_127 = arith.constant 5.000000e-01 : f32
    %331 = vector.broadcast %cst_127 : f32 to vector<32x128xf32>
    %332 = arith.mulf %331, %330 : vector<32x128xf32>
    %333 = arith.mulf %320, %332 : vector<32x128xf32>
    %c1_128 = arith.constant 1 : index
    %c0_129 = arith.constant 0 : index
    %c0_130 = arith.constant 0 : index
    %334 = vector.load %arg13[%c1_128, %c0_129, %c0_130] : memref<2x128x128xbf16, #tpu.memory_space<vmem>>, vector<1x128x128xbf16>
    %335 = vector.shape_cast %334 : vector<1x128x128xbf16> to vector<128x128xbf16>
    %c1_131 = arith.constant 1 : index
    %c0_132 = arith.constant 0 : index
    %c0_133 = arith.constant 0 : index
    %336 = vector.load %arg14[%c1_131, %c0_132, %c0_133] : memref<2x1x128xf32, #tpu.memory_space<vmem>>, vector<1x1x128xf32>
    %337 = vector.shape_cast %336 : vector<1x1x128xf32> to vector<1x128xf32>
    %338 = arith.truncf %333 : vector<32x128xf32> to vector<32x128xbf16>
    %cst_134 = arith.constant dense<0.000000e+00> : vector<32x128xf32>
    %339 = tpu.matmul %338, %335, %cst_134 {dimension_numbers = #tpu.dot_dimension_numbers<[1], [0], [0], [1], [0, 0, 1, 1], [], []>} : vector<32x128xbf16>, vector<128x128xbf16>, vector<32x128xf32> -> vector<32x128xf32>
    %340 = vector.broadcast %337 : vector<1x128xf32> to vector<32x128xf32>
    %341 = arith.addf %339, %340 : vector<32x128xf32>
    %342 = arith.addf %312, %341 : vector<32x128xf32>
    %c1_135 = arith.constant 1 : index
    %c0_136 = arith.constant 0 : index
    %c0_137 = arith.constant 0 : index
    %343 = vector.load %arg15[%c1_135, %c0_136, %c0_137] : memref<2x1x128xf32, #tpu.memory_space<vmem>>, vector<1x1x128xf32>
    %344 = vector.shape_cast %343 : vector<1x1x128xf32> to vector<1x128xf32>
    %c1_138 = arith.constant 1 : index
    %c0_139 = arith.constant 0 : index
    %c0_140 = arith.constant 0 : index
    %345 = vector.load %arg16[%c1_138, %c0_139, %c0_140] : memref<2x1x128xf32, #tpu.memory_space<vmem>>, vector<1x1x128xf32>
    %346 = vector.shape_cast %345 : vector<1x1x128xf32> to vector<1x128xf32>
    %347 = vector.broadcast %4 : vector<1x128xf32> to vector<32x128xf32>
    %348 = arith.mulf %342, %347 : vector<32x128xf32>
    %cst_141 = arith.constant dense<0.000000e+00> : vector<32xf32>
    %349 = vector.multi_reduction <add>, %348, %cst_141 [1] : vector<32x128xf32> to vector<32xf32>
    %350 = vector.shape_cast %349 : vector<32xf32> to vector<32x1xf32>
    %cst_142 = arith.constant 3.125000e-02 : f32
    %351 = vector.broadcast %cst_142 : f32 to vector<32x1xf32>
    %352 = arith.mulf %350, %351 : vector<32x1xf32>
    %353 = vector.broadcast %352 : vector<32x1xf32> to vector<32x128xf32>
    %354 = arith.subf %348, %353 : vector<32x128xf32>
    %355 = vector.broadcast %4 : vector<1x128xf32> to vector<32x128xf32>
    %356 = arith.mulf %354, %355 : vector<32x128xf32>
    %357 = arith.mulf %356, %356 : vector<32x128xf32>
    %cst_143 = arith.constant dense<0.000000e+00> : vector<32xf32>
    %358 = vector.multi_reduction <add>, %357, %cst_143 [1] : vector<32x128xf32> to vector<32xf32>
    %359 = vector.shape_cast %358 : vector<32xf32> to vector<32x1xf32>
    %cst_144 = arith.constant 3.125000e-02 : f32
    %360 = vector.broadcast %cst_144 : f32 to vector<32x1xf32>
    %361 = arith.mulf %359, %360 : vector<32x1xf32>
    %cst_145 = arith.constant 9.99999996E-13 : f32
    %362 = vector.broadcast %cst_145 : f32 to vector<32x1xf32>
    %363 = arith.addf %361, %362 : vector<32x1xf32>
    %364 = math.rsqrt %363 : vector<32x1xf32>
    %365 = vector.broadcast %364 : vector<32x1xf32> to vector<32x128xf32>
    %366 = arith.mulf %356, %365 : vector<32x128xf32>
    %367 = vector.broadcast %344 : vector<1x128xf32> to vector<32x128xf32>
    %368 = arith.mulf %366, %367 : vector<32x128xf32>
    %369 = vector.broadcast %346 : vector<1x128xf32> to vector<32x128xf32>
    %370 = arith.addf %368, %369 : vector<32x128xf32>
    %c0_146 = arith.constant 0 : index
    %c0_147 = arith.constant 0 : index
    %371 = vector.load %arg2[%c0_146, %c0_147] : memref<2x32xf32, #tpu.memory_space<vmem>>, vector<2x32xf32>
    %cst_148 = arith.constant dense<0.000000e+00> : vector<2x128xf32>
    %372 = tpu.matmul %371, %370, %cst_148 {dimension_numbers = #tpu.dot_dimension_numbers<[1], [0], [0], [1], [0, 0, 1, 1], [], []>} : vector<2x32xf32>, vector<32x128xf32>, vector<2x128xf32> -> vector<2x128xf32>
    %c0_149 = arith.constant 0 : index
    %c0_150 = arith.constant 0 : index
    %373 = vector.load %arg17[%c0_149, %c0_150] : memref<128x128xbf16, #tpu.memory_space<vmem>>, vector<128x128xbf16>
    %c0_151 = arith.constant 0 : index
    %c0_152 = arith.constant 0 : index
    %374 = vector.load %arg18[%c0_151, %c0_152] : memref<1x128xf32, #tpu.memory_space<vmem>>, vector<1x128xf32>
    %375 = arith.truncf %372 : vector<2x128xf32> to vector<2x128xbf16>
    %cst_153 = arith.constant dense<0.000000e+00> : vector<2x128xf32>
    %376 = tpu.matmul %375, %373, %cst_153 {dimension_numbers = #tpu.dot_dimension_numbers<[1], [0], [0], [1], [0, 0, 1, 1], [], []>} : vector<2x128xbf16>, vector<128x128xbf16>, vector<2x128xf32> -> vector<2x128xf32>
    %377 = vector.broadcast %374 : vector<1x128xf32> to vector<2x128xf32>
    %378 = arith.addf %376, %377 : vector<2x128xf32>
    %379 = arith.mulf %378, %378 : vector<2x128xf32>
    %380 = arith.mulf %378, %379 : vector<2x128xf32>
    %cst_154 = arith.constant 4.471500e-02 : f32
    %381 = vector.broadcast %cst_154 : f32 to vector<2x128xf32>
    %382 = arith.mulf %381, %380 : vector<2x128xf32>
    %383 = arith.addf %378, %382 : vector<2x128xf32>
    %cst_155 = arith.constant 0.797884583 : f32
    %384 = vector.broadcast %cst_155 : f32 to vector<2x128xf32>
    %385 = arith.mulf %384, %383 : vector<2x128xf32>
    %386 = math.tanh %385 : vector<2x128xf32>
    %cst_156 = arith.constant 1.000000e+00 : f32
    %387 = vector.broadcast %cst_156 : f32 to vector<2x128xf32>
    %388 = arith.addf %387, %386 : vector<2x128xf32>
    %cst_157 = arith.constant 5.000000e-01 : f32
    %389 = vector.broadcast %cst_157 : f32 to vector<2x128xf32>
    %390 = arith.mulf %389, %388 : vector<2x128xf32>
    %391 = arith.mulf %378, %390 : vector<2x128xf32>
    %c0_158 = arith.constant 0 : index
    %c0_159 = arith.constant 0 : index
    %392 = vector.load %arg19[%c0_158, %c0_159] : memref<1x128xf32, #tpu.memory_space<vmem>>, vector<1x128xf32>
    %c0_160 = arith.constant 0 : index
    %c0_161 = arith.constant 0 : index
    %393 = vector.load %arg20[%c0_160, %c0_161] : memref<1x128xf32, #tpu.memory_space<vmem>>, vector<1x128xf32>
    %394 = vector.broadcast %4 : vector<1x128xf32> to vector<2x128xf32>
    %395 = arith.mulf %391, %394 : vector<2x128xf32>
    %cst_162 = arith.constant dense<0.000000e+00> : vector<2xf32>
    %396 = vector.multi_reduction <add>, %395, %cst_162 [1] : vector<2x128xf32> to vector<2xf32>
    %397 = vector.shape_cast %396 : vector<2xf32> to vector<2x1xf32>
    %cst_163 = arith.constant 3.125000e-02 : f32
    %398 = vector.broadcast %cst_163 : f32 to vector<2x1xf32>
    %399 = arith.mulf %397, %398 : vector<2x1xf32>
    %400 = vector.broadcast %399 : vector<2x1xf32> to vector<2x128xf32>
    %401 = arith.subf %395, %400 : vector<2x128xf32>
    %402 = vector.broadcast %4 : vector<1x128xf32> to vector<2x128xf32>
    %403 = arith.mulf %401, %402 : vector<2x128xf32>
    %404 = arith.mulf %403, %403 : vector<2x128xf32>
    %cst_164 = arith.constant dense<0.000000e+00> : vector<2xf32>
    %405 = vector.multi_reduction <add>, %404, %cst_164 [1] : vector<2x128xf32> to vector<2xf32>
    %406 = vector.shape_cast %405 : vector<2xf32> to vector<2x1xf32>
    %cst_165 = arith.constant 3.125000e-02 : f32
    %407 = vector.broadcast %cst_165 : f32 to vector<2x1xf32>
    %408 = arith.mulf %406, %407 : vector<2x1xf32>
    %cst_166 = arith.constant 9.99999996E-13 : f32
    %409 = vector.broadcast %cst_166 : f32 to vector<2x1xf32>
    %410 = arith.addf %408, %409 : vector<2x1xf32>
    %411 = math.rsqrt %410 : vector<2x1xf32>
    %412 = vector.broadcast %411 : vector<2x1xf32> to vector<2x128xf32>
    %413 = arith.mulf %403, %412 : vector<2x128xf32>
    %414 = vector.broadcast %392 : vector<1x128xf32> to vector<2x128xf32>
    %415 = arith.mulf %413, %414 : vector<2x128xf32>
    %416 = vector.broadcast %393 : vector<1x128xf32> to vector<2x128xf32>
    %417 = arith.addf %415, %416 : vector<2x128xf32>
    %c0_167 = arith.constant 0 : index
    %c0_168 = arith.constant 0 : index
    %418 = vector.load %arg21[%c0_167, %c0_168] : memref<128x128xbf16, #tpu.memory_space<vmem>>, vector<128x128xbf16>
    %c0_169 = arith.constant 0 : index
    %c0_170 = arith.constant 0 : index
    %419 = vector.load %arg22[%c0_169, %c0_170] : memref<1x128xf32, #tpu.memory_space<vmem>>, vector<1x128xf32>
    %420 = arith.truncf %417 : vector<2x128xf32> to vector<2x128xbf16>
    %cst_171 = arith.constant dense<0.000000e+00> : vector<2x128xf32>
    %421 = tpu.matmul %420, %418, %cst_171 {dimension_numbers = #tpu.dot_dimension_numbers<[1], [0], [0], [1], [0, 0, 1, 1], [], []>} : vector<2x128xbf16>, vector<128x128xbf16>, vector<2x128xf32> -> vector<2x128xf32>
    %422 = vector.broadcast %419 : vector<1x128xf32> to vector<2x128xf32>
    %423 = arith.addf %421, %422 : vector<2x128xf32>
    %c0_172 = arith.constant 0 : index
    %c0_173 = arith.constant 0 : index
    %424 = vector.load %arg23[%c0_172, %c0_173] : memref<2x128xf32, #tpu.memory_space<vmem>>, vector<2x128xf32>
    tpu.vector_store %arg23[%c0_172, %c0_173], %423 {strides = array<i32>} : memref<2x128xf32, #tpu.memory_space<vmem>>, vector<2x128xf32>,
    return
  }
}

</mosaic_0001>

<bundles_post_ra>
// kernel: model_forward.1
= control target key start
LH: loop header
LB: loop body
LE: loop exit
PB: predicated region body
PF: predicated region fallthrough
CT: control target
= control target key end

     0   :  { %s5324_s0 = inlined_call_operand.vmem [shape: f32[32,128], index: 0, kind: input, shape index: {}]   ;;  %s5325_s1 = inlined_call_operand.vmem [shape: f32[32,32], index: 1, kind: input, shape index: {}]   ;;  %s5326_s2 = inlined_call_operand.vmem [shape: f32[2,32], index: 2, kind: input, shape index: {}]   ;;  %s5327_s3 = inlined_call_operand.hbm [shape: f32[1,128], index: 3, kind: input, shape index: {}]   ;;  %s5328_s4 = inlined_call_operand.hbm [shape: f32[1,128], index: 4, kind: input, shape index: {}]   ;;  %s5329_s5 = inlined_call_operand.vmem [shape: bf16[2,128,384], index: 5, kind: input, shape index: {}]   ;;  %s5330_s6 = inlined_call_operand.vmem [shape: f32[2,1,384], index: 6, kind: input, shape index: {}]   ;;  %s5331_s7 = inlined_call_operand.vmem [shape: bf16[2,128,128], index: 7, kind: input, shape index: {}]   ;;  %s5332_s8 = inlined_call_operand.hbm [shape: f32[2,1,128], index: 8, kind: input, shape index: {}]   ;;  %s5333_s9 = inlined_call_operand.hbm [shape: f32[2,1,128], index: 9, kind: input, shape index: {}]   ;;  %s5334_s10 = inlined_call_operand.hbm [shape: f32[2,1,128], index: 10, kind: input, shape index: {}]   ;;  %s5335_s11 = inlined_call_operand.vmem [shape: bf16[2,128,128], index: 11, kind: input, shape index: {}]   ;;  %s5336_s12 = inlined_call_operand.hbm [shape: f32[2,1,128], index: 12, kind: input, shape index: {}]   ;;  %s5337_s13 = inlined_call_operand.hbm [shape: bf16[2,128,128], index: 13, kind: input, shape index: {}]   ;;  %s5338_s14 = inlined_call_operand.hbm [shape: f32[2,1,128], index: 14, kind: input, shape index: {}]   ;;  %s5339_s15 = inlined_call_operand.hbm [shape: f32[2,1,128], index: 15, kind: input, shape index: {}]   ;;  %s5340_s16 = inlined_call_operand.hbm [shape: f32[2,1,128], index: 16, kind: input, shape index: {}]   ;;  %s5341_s17 = inlined_call_operand.vmem [shape: bf16[128,128], index: 17, kind: input, shape index: {}]   ;;  %s5342_s18 = inlined_call_operand.hbm [shape: f32[1,128], index: 18, kind: input, shape index: {}]   ;;  %s5343_s19 = inlined_call_operand.hbm [shape: f32[1,128], index: 19, kind: input, shape index: {}]   ;;  %s5344_s20 = inlined_call_operand.hbm [shape: f32[1,128], index: 20, kind: input, shape index: {}]   ;;  %s5345_s21 = inlined_call_operand.vmem [shape: bf16[128,128], index: 21, kind: input, shape index: {}]   ;;  %s5346_s22 = inlined_call_operand.hbm [shape: f32[1,128], index: 22, kind: input, shape index: {}]   ;;  %s5347_s23 = inlined_call_operand.vmem [shape: f32[2,128], index: 23, kind: output, shape index: {}]  }
   0x1   :  { %5355 = sst [smem:[#allocation32_spill]] %s5324_s0 }
   0x2   :  { %5356 = sst [smem:[#allocation33_spill]] %s5325_s1 }
   0x3   :  { %5357 = sst [smem:[#allocation34_spill]] %s5326_s2 }
   0x4   :  { %5358 = sst [smem:[#allocation35_spill]] %s5327_s3 }
   0x5   :  { %5359 = sst [smem:[#allocation36_spill]] %s5328_s4 }
   0x6   :  { %5360 = sst [smem:[#allocation37_spill]] %s5329_s5 }
   0x7   :  { %5361 = sst [smem:[#allocation38_spill]] %s5330_s6 }
   0x8   :  { %5362 = sst [smem:[#allocation39_spill]] %s5331_s7 }
   0x9   :  { %28 = vsyncpa [#allocation3], 0 }
   0xa   :  { %29 = vsyncpa [#allocation5], 0 }
   0xb   :  { %30 = vsyncpa [#allocation8], 0 }
   0xc   :  { %31 = vsyncpa [#allocation11], 0 }
   0xd   :  { %32 = vsyncpa [#allocation14], 0 }
   0xe   :  { %33 = vsyncpa [#allocation17], 0 }
   0xf   :  { %34 = vsyncpa [#allocation20], 0 }
  0x10   :  { %35 = vsyncpa [#allocation23], 0  ;;  %s4311_s4 = smov [#allocation4]   ;;  %s5363_s5 = sld [smem:[#allocation36_spill]] }
  0x11   :  { %s58_s30 = sshll.u32 %s4311_s4, 4  ;;  %s59_s30 = int_to_ptr.vmem [resolvable:$true] %s58_s30 }
  0x16   :  { %s3987_s1 = scalar_lea.hbm %s5363_s5, 16 }
  0x17   :  { %p3988_p0 = scmp.ne.s32.totalorder %s5363_s5, %s3987_s1  ;;  %p3991_p1 = scmp.lt.u32.totalorder %s3987_s1, %s5363_s5 }
  0x19   :  { %p3993_p2 = pnand %p3991_p1, %p3988_p0 }
  0x1b   :  { %3996 = shalt.err (!%p3993_p2)
}
  0x1c   :  { %s3997_s7 = scalar_lea.vmem %s59_s30, 16  ;;  %s4001_s28 = scalar_lea.vmem %s59_s30, 32 }
  0x1d   :  { %p3998_p3 = scmp.ne.s32.totalorder %s59_s30, %s3997_s7  ;;  %p4002_p4 = scmp.lt.s32.totalorder %s59_s30, %s59_s30 }
  0x1e   :  { %p4003_p5 = scmp.lt.s32.totalorder %s4001_s28, %s3997_s7 }
  0x20   :  { %p4004_p6 = por %p4003_p5, %p4002_p4 }
  0x22   :  { %p4005_p7 = pnand %p4004_p6, %p3998_p3 }
  0x24   :  { %4008 = shalt.err (!%p4005_p7)
}
  0x25   :  { %61 = dma.hbm_to_vmem [thread:$0]  %s5363_s5, 16, %s59_s30, [#allocation5]  }
  0x26   :  { %s4312_s0 = smov [#allocation7]   ;;  %s4313_s24 = smov [#allocation10]  }
  0x27   :  { %s85_s4 = sshll.u32 %s4312_s0, 4  ;;  %s111_s25 = sshll.u32 %s4313_s24, 4  ;;  %s86_s4 = int_to_ptr.vmem [resolvable:$true] %s85_s4  ;;  %s112_s25 = int_to_ptr.vmem [resolvable:$true] %s111_s25 }
  0x28   :  { %s4009_s2 = scalar_lea.hbm %s5333_s9, 32 }
  0x29   :  { %p4010_p8 = scmp.ne.s32.totalorder %s5333_s9, %s4009_s2  ;;  %p4013_p9 = scmp.lt.u32.totalorder %s4009_s2, %s5333_s9 }
  0x2b   :  { %p4015_p10 = pnand %p4013_p9, %p4010_p8 }
  0x2d   :  { %4018 = shalt.err (!%p4015_p10)
}
  0x2e   :  { %s4019_s30 = scalar_lea.vmem %s86_s4, 32  ;;  %p4024_p12 = scmp.lt.s32.totalorder %s86_s4, %s86_s4 }
  0x2f   :  { %p4020_p11 = scmp.ne.s32.totalorder %s86_s4, %s4019_s30  ;;  %p4025_p13 = scmp.lt.s32.totalorder %s4019_s30, %s4019_s30 }
  0x31   :  { %p4026_p0 = por %p4025_p13, %p4024_p12 }
  0x33   :  { %p4027_p1 = pnand %p4026_p0, %p4020_p11 }
  0x35   :  { %4030 = shalt.err (!%p4027_p1)
}
  0x36   :  { %s4314_s5 = smov 16   ;;  %s4315_s29 = smov 1  }
  0x37   :  { %91 = dma.hbm_to_vmem [thread:$0]  %s5333_s9, 32, %s86_s4, [#allocation8], %s4314_s5, %s4314_s5, %s4315_s29  }
  0x38   :  { %s4031_s26 = scalar_lea.hbm %s5336_s12, 32 }
  0x39   :  { %p4032_p2 = scmp.ne.s32.totalorder %s5336_s12, %s4031_s26  ;;  %p4035_p3 = scmp.lt.u32.totalorder %s4031_s26, %s5336_s12 }
  0x3b   :  { %p4037_p4 = pnand %p4035_p3, %p4032_p2 }
  0x3d   :  { %4040 = shalt.err (!%p4037_p4)
}
  0x3e   :  { %s4041_s28 = scalar_lea.vmem %s112_s25, 32  ;;  %p4046_p6 = scmp.lt.s32.totalorder %s112_s25, %s112_s25 }
  0x3f   :  { %p4042_p5 = scmp.ne.s32.totalorder %s112_s25, %s4041_s28  ;;  %p4047_p7 = scmp.lt.s32.totalorder %s4041_s28, %s4041_s28 }
  0x41   :  { %p4048_p8 = por %p4047_p7, %p4046_p6 }
  0x43   :  { %p4049_p9 = pnand %p4048_p8, %p4042_p5 }
  0x45   :  { %4052 = shalt.err (!%p4049_p9)
}
  0x46   :  { %117 = dma.hbm_to_vmem [thread:$0]  %s5336_s12, 32, %s112_s25, [#allocation11], %s4314_s5, %s4314_s5, %s4315_s29  }
  0x47   :  { %s4316_s30 = smov [#allocation13]   ;;  %s4317_s0 = smov [#allocation16]  }
  0x48   :  { %s135_s3 = sshll.u32 %s4316_s30, 4  ;;  %s159_s24 = sshll.u32 %s4317_s0, 4  ;;  %s136_s3 = int_to_ptr.vmem [resolvable:$true] %s135_s3  ;;  %s160_s24 = int_to_ptr.vmem [resolvable:$true] %s159_s24 }
  0x49   :  { %s4053_s2 = scalar_lea.hbm %s5338_s14, 32 }
  0x4a   :  { %p4054_p10 = scmp.ne.s32.totalorder %s5338_s14, %s4053_s2  ;;  %p4057_p11 = scmp.lt.u32.totalorder %s4053_s2, %s5338_s14 }
  0x4c   :  { %p4059_p12 = pnand %p4057_p11, %p4054_p10 }
  0x4e   :  { %4062 = shalt.err (!%p4059_p12)
}
  0x4f   :  { %s4063_s12 = scalar_lea.vmem %s136_s3, 32  ;;  %p4068_p0 = scmp.lt.s32.totalorder %s136_s3, %s136_s3 }
  0x50   :  { %p4064_p13 = scmp.ne.s32.totalorder %s136_s3, %s4063_s12  ;;  %p4069_p1 = scmp.lt.s32.totalorder %s4063_s12, %s4063_s12 }
  0x52   :  { %p4070_p2 = por %p4069_p1, %p4068_p0 }
  0x54   :  { %p4071_p3 = pnand %p4070_p2, %p4064_p13 }
  0x56   :  { %4074 = shalt.err (!%p4071_p3)
}
  0x57   :  { %141 = dma.hbm_to_vmem [thread:$0]  %s5338_s14, 32, %s136_s3, [#allocation14], %s4314_s5, %s4314_s5, %s4315_s29  }
  0x58   :  { %s4075_s0 = scalar_lea.hbm %s5340_s16, 32 }
  0x59   :  { %p4076_p4 = scmp.ne.s32.totalorder %s5340_s16, %s4075_s0  ;;  %p4079_p5 = scmp.lt.u32.totalorder %s4075_s0, %s5340_s16 }
  0x5b   :  { %p4081_p6 = pnand %p4079_p5, %p4076_p4 }
  0x5d   :  { %4084 = shalt.err (!%p4081_p6)
}
  0x5e   :  { %s4085_s27 = scalar_lea.vmem %s160_s24, 32  ;;  %p4090_p8 = scmp.lt.s32.totalorder %s160_s24, %s160_s24 }
  0x5f   :  { %p4086_p7 = scmp.ne.s32.totalorder %s160_s24, %s4085_s27  ;;  %p4091_p9 = scmp.lt.s32.totalorder %s4085_s27, %s4085_s27 }
  0x61   :  { %p4092_p10 = por %p4091_p9, %p4090_p8 }
  0x63   :  { %p4093_p11 = pnand %p4092_p10, %p4086_p7 }
  0x65   :  { %4096 = shalt.err (!%p4093_p11)
}
  0x66   :  { %165 = dma.hbm_to_vmem [thread:$0]  %s5340_s16, 32, %s160_s24, [#allocation17], %s4314_s5, %s4314_s5, %s4315_s29  }
  0x67   :  { %s4318_s7 = smov [#allocation19]   ;;  %s4319_s12 = smov [#allocation2]  }
  0x68   :  { %s184_s28 = sshll.u32 %s4318_s7, 4  ;;  %s48_s25 = sshll.u32 %s4319_s12, 4  ;;  %s185_s28 = int_to_ptr.vmem [resolvable:$true] %s184_s28  ;;  %s49_s25 = int_to_ptr.vmem [resolvable:$true] %s48_s25 }
  0x69   :  { %s4097_s30 = scalar_lea.hbm %s5343_s19, 16 }
  0x6a   :  { %p4098_p12 = scmp.ne.s32.totalorder %s5343_s19, %s4097_s30  ;;  %p4101_p13 = scmp.lt.u32.totalorder %s4097_s30, %s5343_s19 }
  0x6c   :  { %p4103_p0 = pnand %p4101_p13, %p4098_p12 }
  0x6e   :  { %4106 = shalt.err (!%p4103_p0)
}
  0x6f   :  { %s4107_s16 = scalar_lea.vmem %s185_s28, 16  ;;  %s4111_s24 = scalar_lea.vmem %s185_s28, 32 }
  0x70   :  { %p4108_p1 = scmp.ne.s32.totalorder %s185_s28, %s4107_s16  ;;  %p4112_p2 = scmp.lt.s32.totalorder %s185_s28, %s185_s28 }
  0x71   :  { %p4113_p3 = scmp.lt.s32.totalorder %s4111_s24, %s4107_s16 }
  0x73   :  { %p4114_p4 = por %p4113_p3, %p4112_p2 }
  0x75   :  { %p4115_p5 = pnand %p4114_p4, %p4108_p1 }
  0x77   :  { %4118 = shalt.err (!%p4115_p5)
}
  0x78   :  { %187 = dma.hbm_to_vmem [thread:$0]  %s5343_s19, 16, %s185_s28, [#allocation20]  }
  0x79   :  { %s5364_s7 = sld [smem:[#allocation35_spill]] }
  0x7f   :  { %s4119_s12 = scalar_lea.hbm %s5364_s7, 16 }
  0x80   :  { %p4120_p6 = scmp.ne.s32.totalorder %s5364_s7, %s4119_s12  ;;  %p4123_p7 = scmp.lt.u32.totalorder %s4119_s12, %s5364_s7 }
  0x82   :  { %p4125_p8 = pnand %p4123_p7, %p4120_p6 }
  0x84   :  { %4128 = shalt.err (!%p4125_p8)
}
  0x85   :  { %s4129_s1 = scalar_lea.vmem %s49_s25, 16  ;;  %s4133_s26 = scalar_lea.vmem %s49_s25, 32 }
  0x86   :  { %p4130_p9 = scmp.ne.s32.totalorder %s49_s25, %s4129_s1  ;;  %p4134_p10 = scmp.lt.s32.totalorder %s49_s25, %s49_s25 }
  0x87   :  { %p4135_p11 = scmp.lt.s32.totalorder %s4133_s26, %s4129_s1 }
  0x89   :  { %p4136_p12 = por %p4135_p11, %p4134_p10 }
  0x8b   :  { %p4137_p13 = pnand %p4136_p12, %p4130_p9 }
  0x8d   :  { %4140 = shalt.err (!%p4137_p13)
}
  0x8e   :  { %51 = dma.hbm_to_vmem [thread:$0]  %s5364_s7, 16, %s49_s25, [#allocation3]  }
  0x8f   :  { %s4320_s2 = smov [#allocation6]   ;;  %s4321_s24 = smov [#allocation9]  }
  0x90   :  { %s73_s16 = sshll.u32 %s4320_s2, 4  ;;  %s97_s6 = sshll.u32 %s4321_s24, 4  ;;  %s74_s16 = int_to_ptr.vmem [resolvable:$true] %s73_s16  ;;  %s98_s6 = int_to_ptr.vmem [resolvable:$true] %s97_s6 }
  0x91   :  { %s4141_s3 = scalar_lea.hbm %s5332_s8, 32 }
  0x92   :  { %p4142_p0 = scmp.ne.s32.totalorder %s5332_s8, %s4141_s3  ;;  %p4145_p1 = scmp.lt.u32.totalorder %s4141_s3, %s5332_s8 }
  0x94   :  { %p4147_p2 = pnand %p4145_p1, %p4142_p0 }
  0x96   :  { %4150 = shalt.err (!%p4147_p2)
}
  0x97   :  { %s4151_s25 = scalar_lea.vmem %s74_s16, 32  ;;  %p4156_p4 = scmp.lt.s32.totalorder %s74_s16, %s74_s16 }
  0x98   :  { %p4152_p3 = scmp.ne.s32.totalorder %s74_s16, %s4151_s25  ;;  %p4157_p5 = scmp.lt.s32.totalorder %s4151_s25, %s4151_s25 }
  0x9a   :  { %p4158_p6 = por %p4157_p5, %p4156_p4 }
  0x9c   :  { %p4159_p7 = pnand %p4158_p6, %p4152_p3 }
  0x9e   :  { %4162 = shalt.err (!%p4159_p7)
}
  0x9f   :  { %79 = dma.hbm_to_vmem [thread:$0]  %s5332_s8, 32, %s74_s16, [#allocation5], %s4314_s5, %s4314_s5, %s4315_s29  }
  0xa0   :  { %s4163_s19 = scalar_lea.hbm %s5334_s10, 32 }
  0xa1   :  { %p4164_p8 = scmp.ne.s32.totalorder %s5334_s10, %s4163_s19  ;;  %p4167_p9 = scmp.lt.u32.totalorder %s4163_s19, %s5334_s10 }
  0xa3   :  { %p4169_p10 = pnand %p4167_p9, %p4164_p8 }
  0xa5   :  { %4172 = shalt.err (!%p4169_p10)
}
  0xa6   :  { %s4173_s14 = scalar_lea.vmem %s98_s6, 32  ;;  %p4178_p12 = scmp.lt.s32.totalorder %s98_s6, %s98_s6 }
  0xa7   :  { %p4174_p11 = scmp.ne.s32.totalorder %s98_s6, %s4173_s14  ;;  %p4179_p13 = scmp.lt.s32.totalorder %s4173_s14, %s4173_s14 }
  0xa9   :  { %p4180_p0 = por %p4179_p13, %p4178_p12 }
  0xab   :  { %p4181_p1 = pnand %p4180_p0, %p4174_p11 }
  0xad   :  { %4184 = shalt.err (!%p4181_p1)
}
  0xae   :  { %103 = dma.hbm_to_vmem [thread:$0]  %s5334_s10, 32, %s98_s6, [#allocation8], %s4314_s5, %s4314_s5, %s4315_s29  }
  0xaf   :  { %s4322_s3 = smov [#allocation12]   ;;  %s4185_s30 = scalar_lea.hbm %s5337_s13, 2048 }
  0xb0   :  { %s123_s12 = sshll.u32 %s4322_s3, 4  ;;  %p4186_p2 = scmp.ne.s32.totalorder %s5337_s13, %s4185_s30  ;;  %s124_s12 = int_to_ptr.vmem [resolvable:$true] %s123_s12 }
  0xb1   :  { %p4189_p3 = scmp.lt.u32.totalorder %s4185_s30, %s5337_s13 }
  0xb3   :  { %p4191_p4 = pnand %p4189_p3, %p4186_p2 }
  0xb5   :  { %4194 = shalt.err (!%p4191_p4)
}
  0xb6   :  { %s4195_s26 = scalar_lea.vmem %s124_s12, 2048  ;;  %p4200_p6 = scmp.lt.s32.totalorder %s124_s12, %s124_s12 }
  0xb7   :  { %p4196_p5 = scmp.ne.s32.totalorder %s124_s12, %s4195_s26  ;;  %p4201_p7 = scmp.lt.s32.totalorder %s4195_s26, %s4195_s26 }
  0xb9   :  { %p4202_p8 = por %p4201_p7, %p4200_p6 }
  0xbb   :  { %p4203_p9 = pnand %p4202_p8, %p4196_p5 }
  0xbd   :  { %4206 = shalt.err (!%p4203_p9)
}
  0xbe   :  { %s4323_s10 = smov 64   ;;  %s4324_s6 = smov 4  }
  0xbf   :  { %129 = dma.hbm_to_vmem [thread:$0]  %s5337_s13, 2048, %s124_s12, [#allocation11], %s4323_s10, %s4323_s10, %s4324_s6  }
  0xc0   :  { %s4325_s2 = smov [#allocation15]   ;;  %s4326_s27 = smov [#allocation18]  }
  0xc1   :  { %s147_s24 = sshll.u32 %s4325_s2, 4  ;;  %s174_s14 = sshll.u32 %s4326_s27, 4  ;;  %s148_s24 = int_to_ptr.vmem [resolvable:$true] %s147_s24  ;;  %s175_s14 = int_to_ptr.vmem [resolvable:$true] %s174_s14 }
  0xc2   :  { %s4207_s3 = scalar_lea.hbm %s5339_s15, 32 }
  0xc3   :  { %p4208_p10 = scmp.ne.s32.totalorder %s5339_s15, %s4207_s3  ;;  %p4211_p11 = scmp.lt.u32.totalorder %s4207_s3, %s5339_s15 }
  0xc5   :  { %p4213_p12 = pnand %p4211_p11, %p4208_p10 }
  0xc7   :  { %4216 = shalt.err (!%p4213_p12)
}
  0xc8   :  { %s4217_s13 = scalar_lea.vmem %s148_s24, 32  ;;  %p4222_p0 = scmp.lt.s32.totalorder %s148_s24, %s148_s24 }
  0xc9   :  { %p4218_p13 = scmp.ne.s32.totalorder %s148_s24, %s4217_s13  ;;  %p4223_p1 = scmp.lt.s32.totalorder %s4217_s13, %s4217_s13 }
  0xcb   :  { %p4224_p2 = por %p4223_p1, %p4222_p0 }
  0xcd   :  { %p4225_p3 = pnand %p4224_p2, %p4218_p13 }
  0xcf   :  { %4228 = shalt.err (!%p4225_p3)
}
  0xd0   :  { %153 = dma.hbm_to_vmem [thread:$0]  %s5339_s15, 32, %s148_s24, [#allocation14], %s4314_s5, %s4314_s5, %s4315_s29  }
  0xd1   :  { %s4229_s26 = scalar_lea.hbm %s5342_s18, 16 }
  0xd2   :  { %p4230_p4 = scmp.ne.s32.totalorder %s5342_s18, %s4229_s26  ;;  %p4233_p5 = scmp.lt.u32.totalorder %s4229_s26, %s5342_s18 }
  0xd4   :  { %p4235_p6 = pnand %p4233_p5, %p4230_p4 }
  0xd6   :  { %4238 = shalt.err (!%p4235_p6)
}
  0xd7   :  { %s4239_s2 = scalar_lea.vmem %s175_s14, 16  ;;  %s4243_s27 = scalar_lea.vmem %s175_s14, 32 }
  0xd8   :  { %p4240_p7 = scmp.ne.s32.totalorder %s175_s14, %s4239_s2  ;;  %p4244_p8 = scmp.lt.s32.totalorder %s175_s14, %s175_s14 }
  0xd9   :  { %p4245_p9 = scmp.lt.s32.totalorder %s4243_s27, %s4239_s2 }
  0xdb   :  { %p4246_p10 = por %p4245_p9, %p4244_p8 }
  0xdd   :  { %p4247_p11 = pnand %p4246_p10, %p4240_p7 }
  0xdf   :  { %4250 = shalt.err (!%p4247_p11)
}
  0xe0   :  { %177 = dma.hbm_to_vmem [thread:$0]  %s5342_s18, 16, %s175_s14, [#allocation17]  }
  0xe1   :  { %s4327_s29 = smov [#allocation21]   ;;  %s4328_s8 = smov [#allocation22]  }
  0xe2   :  { %s194_s24 = sshll.u32 %s4327_s29, 4  ;;  %s206_s16 = sshll.u32 %s4328_s8, 4  ;;  %s195_s24 = int_to_ptr.vmem [resolvable:$true] %s194_s24  ;;  %s207_s16 = int_to_ptr.vmem [resolvable:$true] %s206_s16 }
  0xe3   :  { %s4251_s4 = scalar_lea.hbm %s5344_s20, 16 }
  0xe4   :  { %p4252_p12 = scmp.ne.s32.totalorder %s5344_s20, %s4251_s4  ;;  %p4255_p13 = scmp.lt.u32.totalorder %s4251_s4, %s5344_s20 }
  0xe6   :  { %p4257_p0 = pnand %p4255_p13, %p4252_p12 }
  0xe8   :  { %4260 = shalt.err (!%p4257_p0)
}
  0xe9   :  { %s4261_s18 = scalar_lea.vmem %s195_s24, 16  ;;  %s4265_s14 = scalar_lea.vmem %s195_s24, 32 }
  0xea   :  { %p4262_p1 = scmp.ne.s32.totalorder %s195_s24, %s4261_s18  ;;  %p4266_p2 = scmp.lt.s32.totalorder %s195_s24, %s195_s24 }
  0xeb   :  { %p4267_p3 = scmp.lt.s32.totalorder %s4265_s14, %s4261_s18 }
  0xed   :  { %p4268_p4 = por %p4267_p3, %p4266_p2 }
  0xef   :  { %p4269_p5 = pnand %p4268_p4, %p4262_p1 }
  0xf1   :  { %4272 = shalt.err (!%p4269_p5)
}
  0xf2   :  { %197 = dma.hbm_to_vmem [thread:$0]  %s5344_s20, 16, %s195_s24, [#allocation20]  }
  0xf3   :  { %s4273_s10 = scalar_lea.hbm %s5346_s22, 16 }
  0xf4   :  { %p4274_p6 = scmp.ne.s32.totalorder %s5346_s22, %s4273_s10  ;;  %p4277_p7 = scmp.lt.u32.totalorder %s4273_s10, %s5346_s22 }
  0xf6   :  { %p4279_p8 = pnand %p4277_p7, %p4274_p6 }
  0xf8   :  { %4282 = shalt.err (!%p4279_p8)
}
  0xf9   :  { %s4283_s27 = scalar_lea.vmem %s207_s16, 16  ;;  %s4287_s15 = scalar_lea.vmem %s207_s16, 32 }
  0xfa   :  { %p4284_p9 = scmp.ne.s32.totalorder %s207_s16, %s4283_s27  ;;  %p4288_p10 = scmp.lt.s32.totalorder %s207_s16, %s207_s16 }
  0xfb   :  { %p4289_p11 = scmp.lt.s32.totalorder %s4287_s15, %s4283_s27 }
  0xfd   :  { %p4290_p12 = por %p4289_p11, %p4288_p10 }
  0xff   :  { %p4291_p13 = pnand %p4290_p12, %p4284_p9 }
 0x101   :  { %4294 = shalt.err (!%p4291_p13)
}
 0x102   :  { %209 = dma.hbm_to_vmem [thread:$0]  %s5346_s22, 16, %s207_s16, [#allocation23]  }
 0x103   :  { %4295 = dma.done.wait [#allocation3], 16  }
 0x104   :  { %4296 = vsyncadd [#allocation3], 4294967280 }
 0x105   :  { %4297 = dma.done.wait [#allocation5], 48  }
 0x106   :  { %4298 = vsyncadd [#allocation5], 4294967248 }
 0x107   :  { %4299 = dma.done.wait [#allocation8], 64  }
 0x108   :  { %4300 = vsyncadd [#allocation8], 4294967232 }
 0x109   :  { %4301 = dma.done.wait [#allocation11], 2080  }
 0x10a   :  { %4302 = vsyncadd [#allocation11], 4294965216 }
 0x10b   :  { %4303 = dma.done.wait [#allocation14], 64  }
 0x10c   :  { %4304 = vsyncadd [#allocation14], 4294967232 }
 0x10d   :  { %4305 = dma.done.wait [#allocation17], 48  }
 0x10e   :  { %4306 = vsyncadd [#allocation17], 4294967248 }
 0x10f   :  { %4307 = dma.done.wait [#allocation20], 32  }
 0x110   :  { %4308 = vsyncadd [#allocation20], 4294967264 }
 0x111   :  { %4309 = dma.done.wait [#allocation23], 16  }
 0x112   :  { %4310 = vsyncadd [#allocation23], 4294967280  ;;  %v253_v0 = vlaneseq  ;;  %v4329_v2 = vmov 0.0   ;;  %s5365_s24 = sld [smem:[#allocation32_spill]]  ;;  %s5366_s12 = sld [smem:[#allocation37_spill]]  ;;  %v4330_v51 = vmov 0  }
 0x113   :  { %551 = vmatprep.mubr.bf16.mxu0 %v4330_v51  ;;  %s5367_s4 = sld [smem:[#allocation38_spill]]  ;;  %s5368_s13 = sld [smem:[#allocation33_spill]]  ;;  %vm691_vm4 = vcmask 261120   ;;  %vm4332_vm5 = vmmov 0   ;;  %vm2922_vm6 = vcmask 1041408  }
 0x114   :  { %v4643_v1 = vand.u32 127, %v253_v0  ;;  %s5369_s19 = sld [smem:[#allocation39_spill]]  ;;  %s5370_s6 = sld [smem:[#allocation34_spill]] }
 0x116   :  { %vm255_vm0 = vcmp.lt.s32.totalorder %v4643_v1, 32  ;;  %vm744_vm1 = vcmp.ge.s32.totalorder %v4643_v1, 16  ;;  %vm622_vm2 = vcmp.lt.s32.totalorder %v4643_v1, 16 }
 0x117   :  { %v4649_v3 = vsel %vm255_vm0, 1.0, %v4329_v2  ;;  %vm745_vm3 = vmand %vm744_vm1, %vm255_vm0 }
 0x118   :  { %v258_v4 = vld [vmem:[%s5365_s24] sm:$0xff]  ;;  %v260_v5 = vld [vmem:[%s5365_s24 + $0x10] sm:$0xff]  ;;  %v259_v6 = vld [vmem:[%s5365_s24 + $0x8] sm:$0xff] }
 0x119   :  { %v264_v7 = vmul.f32 %v4649_v3, %v258_v4  ;;  %v266_v8 = vmul.f32 %v4649_v3, %v260_v5  ;;  %v261_v9 = vld [vmem:[%s5365_s24 + $0x18] sm:$0xff]  ;;  %v265_v10 = vmul.f32 %v4649_v3, %v259_v6  ;;  %v3731_v12 = vld [vmem:[%s5366_s12 + $0x4] ss:$12 sps:$4 sm:$0xff]   ;;  %v3733_v13 = vld [vmem:[%s5366_s12] ss:$12 sps:$4 sm:$0xff]  }
 0x11a   :  { %v267_v11 = vmul.f32 %v4649_v3, %v261_v9  ;;  %v3734_v14 = vld [vmem:[%s5366_s12 + $0x1c] ss:$12 sps:$4 sm:$0xff]   ;;  %519 = vmatprep.subr.bf16.mxu0 %v3731_v12  ;;  %v3737_v36 = vld [vmem:[%s5366_s12 + $0x18] ss:$12 sps:$4 sm:$0xff]   ;;  %v3738_v37 = vld [vmem:[%s5366_s12 + $0x34] ss:$12 sps:$4 sm:$0xff]  }
 0x11b   :  { %268 = vadd.xlane.f32.xlu0 %v264_v7  ;;  %272 = vadd.xlane.f32.xlu1 %v266_v8  ;;  %v3736_v15 = vld [vmem:[%s5366_s12 + $0x8] ss:$12 sps:$4 sm:$0xff]   ;;  %v3740_v38 = vld [vmem:[%s5366_s12 + $0x20] ss:$12 sps:$4 sm:$0xff]   ;;  %v3741_v39 = vld [vmem:[%s5366_s12 + $0x30] ss:$12 sps:$4 sm:$0xff]  }
 0x11c   :  { %520 = vmatpush1.bf16.msra.mxu0 %v3733_v13  ;;  %3420 = vmatprep.subr.bf16.mxu1 %v3736_v15  ;;  %v3742_v40 = vld [vmem:[%s5366_s12 + $0x4c] ss:$12 sps:$4 sm:$0xff]   ;;  %v3745_v42 = vld [vmem:[%s5366_s12 + $0x48] ss:$12 sps:$4 sm:$0xff]   ;;  %v3746_v43 = vld [vmem:[%s5366_s12 + $0x64] ss:$12 sps:$4 sm:$0xff]  }
 0x11d   :  { %521 = vmatprep.subr.bf16.mxu0 %v3734_v14  ;;  %3421 = vmatpush3.bf16.msra.mxu1 %v3736_v15  ;;  %v3744_v41 = vld [vmem:[%s5366_s12 + $0x38] ss:$12 sps:$4 sm:$0xff]   ;;  %v3748_v44 = vld [vmem:[%s5366_s12 + $0x50] ss:$12 sps:$4 sm:$0xff]   ;;  %v3749_v45 = vld [vmem:[%s5366_s12 + $0x60] ss:$12 sps:$4 sm:$0xff]  }
 0x11e   :  { %3422 = vmatprep.subr.bf16.mxu1 %v3740_v38  ;;  %v3750_v46 = vld [vmem:[%s5366_s12 + $0x7c] ss:$12 sps:$4 sm:$0xff]   ;;  %v3753_v48 = vld [vmem:[%s5366_s12 + $0x78] ss:$12 sps:$4 sm:$0xff]   ;;  %v3754_v49 = vld [vmem:[%s5366_s12 + $0x94] ss:$12 sps:$4 sm:$0xff]  }
 0x11f   :  { %270 = vadd.xlane.f32.xlu0 %v265_v10  ;;  %274 = vadd.xlane.f32.xlu1 %v267_v11  ;;  %v3752_v47 = vld [vmem:[%s5366_s12 + $0x68] ss:$12 sps:$4 sm:$0xff]   ;;  %v3756_v50 = vld [vmem:[%s5366_s12 + $0x80] ss:$12 sps:$4 sm:$0xff]   ;;  %v3757_v52 = vld [vmem:[%s5366_s12 + $0x90] ss:$12 sps:$4 sm:$0xff]  }
 0x120   :  { %522 = vmatpush1.bf16.msra.mxu0 %v3737_v36  ;;  %v3758_v53 = vld [vmem:[%s5366_s12 + $0xac] ss:$12 sps:$4 sm:$0xff]   ;;  %v3761_v55 = vld [vmem:[%s5366_s12 + $0xa8] ss:$12 sps:$4 sm:$0xff]   ;;  %v3762_v56 = vld [vmem:[%s5366_s12 + $0xb0] ss:$12 sps:$4 sm:$0xff]  }
 0x121   :  { %523 = vmatprep.subr.bf16.mxu0 %v3738_v37  ;;  %3423 = vmatpush3.bf16.msra.mxu1 %v3740_v38  ;;  %v3760_v54 = vld [vmem:[%s5366_s12 + $0x98] ss:$12 sps:$4 sm:$0xff]  }
 0x122   :  { %3424 = vmatprep.subr.bf16.mxu1 %v3744_v41 }
 0x124   :  { %524 = vmatpush1.bf16.msra.mxu0 %v3741_v39  ;;  %v4797_v39 = vsel %vm622_vm2, 1.0, %v4329_v2 }
 0x125   :  { %525 = vmatprep.subr.bf16.mxu0 %v3742_v40  ;;  %3425 = vmatpush3.bf16.msra.mxu1 %v3744_v41  ;;  %v4800_v41 = vsel %vm745_vm3, 1.0, %v4329_v2 }
 0x126   :  { %3426 = vmatprep.subr.bf16.mxu1 %v3748_v44 }
 0x128   :  { %526 = vmatpush1.bf16.msra.mxu0 %v3745_v42 }
 0x129   :  { %527 = vmatprep.subr.bf16.mxu0 %v3746_v43  ;;  %3427 = vmatpush3.bf16.msra.mxu1 %v3748_v44 }
 0x12a   :  { %3428 = vmatprep.subr.bf16.mxu1 %v3752_v47 }
 0x12c   :  { %528 = vmatpush1.bf16.msra.mxu0 %v3749_v45 }
 0x12d   :  { %529 = vmatprep.subr.bf16.mxu0 %v3750_v46  ;;  %3429 = vmatpush3.bf16.msra.mxu1 %v3752_v47 }
 0x12e   :  { %3430 = vmatprep.subr.bf16.mxu1 %v3756_v50 }
 0x130   :  { %530 = vmatpush1.bf16.msra.mxu0 %v3753_v48 }
 0x131   :  { %531 = vmatprep.subr.bf16.mxu0 %v3754_v49  ;;  %3431 = vmatpush3.bf16.msra.mxu1 %v3756_v50 }
 0x132   :  { %3432 = vmatprep.subr.bf16.mxu1 %v3760_v54 }
 0x134   :  { %532 = vmatpush1.bf16.msra.mxu0 %v3757_v52 }
 0x135   :  { %533 = vmatprep.subr.bf16.mxu0 %v3758_v53  ;;  %3433 = vmatpush3.bf16.msra.mxu1 %v3760_v54 }
 0x136   :  { %3434 = vmatprep.subr.bf16.mxu1 %v3762_v56 }
 0x138   :  { %534 = vmatpush1.bf16.msra.mxu0 %v3761_v55 }
 0x139   :  { %3435 = vmatpush3.bf16.msra.mxu1 %v3762_v56 }
 0x1a8   :  { %v269_v16 = vpop.xlane.xlu0 %268  ;;  %v273_v17 = vpop.xlane.xlu1 %272 }
 0x1a9   :  { %v276_v18 = vmul.f32 0.03125, %v269_v16  ;;  %v278_v19 = vmul.f32 0.03125, %v273_v17  ;;  %v3078_v16 = vld [vmem:[#allocation4] ss:$0 sm:$0xff] }
 0x1ab   :  { %v280_v20 = vsub.f32 %v264_v7, %v276_v18  ;;  %v282_v21 = vsub.f32 %v266_v8, %v278_v19 }
 0x1ac   :  { %v271_v22 = vpop.xlane.xlu0 %270  ;;  %v275_v23 = vpop.xlane.xlu1 %274 }
 0x1ad   :  { %v277_v24 = vmul.f32 0.03125, %v271_v22  ;;  %v279_v25 = vmul.f32 0.03125, %v275_v23  ;;  %v4680_v26 = vmul.f32 %v4649_v3, %v280_v20  ;;  %v4683_v27 = vmul.f32 %v4649_v3, %v282_v21 }
 0x1af   :  { %v281_v28 = vsub.f32 %v265_v10, %v277_v24  ;;  %v283_v29 = vsub.f32 %v267_v11, %v279_v25  ;;  %v288_v30 = vmul.f32 %v4680_v26, %v4680_v26  ;;  %v290_v31 = vmul.f32 %v4683_v27, %v4683_v27  ;;  %v3077_v11 = vld [vmem:[#allocation2] ss:$0 sm:$0xff] }
 0x1b1   :  { %292 = vadd.xlane.f32.xlu0 %v288_v30  ;;  %v4690_v32 = vmul.f32 %v4649_v3, %v281_v28  ;;  %v4693_v33 = vmul.f32 %v4649_v3, %v283_v29  ;;  %v4778_v29 = vshrl.u32 %v253_v0, 7 }
 0x1b3   :  { %v289_v34 = vmul.f32 %v4690_v32, %v4690_v32  ;;  %v291_v35 = vmul.f32 %v4693_v33, %v4693_v33  ;;  %v378_v30 = vsub.s32 0, %v4778_v29 }
 0x1b5   :  { %296 = vadd.xlane.f32.xlu0 %v290_v31  ;;  %294 = vadd.xlane.f32.xlu1 %v289_v34  ;;  %v372_v31 = vld [vmem:[%s5367_s4] sm:$0x7]  ;;  %v386_v34 = vsub.s32 2, %v4778_v29 }
 0x1b7   :  { %v387_v38 = vrot.slane %v372_v31, %v386_v34 }
 0x1b9   :  { %298 = vadd.xlane.f32.xlu1 %v291_v35 }
 0x23e   :  { %v293_v57 = vpop.xlane.xlu0 %292 }
 0x23f   :  { %v300_v58 = vmul.f32 0.03125, %v293_v57 }
 0x241   :  { %v304_v59 = vadd.f32 1e-12, %v300_v58 }
 0x242   :  { %v295_v60 = vpop.xlane.xlu1 %294  ;;  %v297_v61 = vpop.xlane.xlu0 %296 }
 0x243   :  { %3859 = vrsqrt.f32 %v304_v59  ;;  %v301_v62 = vmul.f32 0.03125, %v295_v60  ;;  %v302_v63 = vmul.f32 0.03125, %v297_v61 }
 0x245   :  { %v305_v4 = vadd.f32 1e-12, %v301_v62  ;;  %v306_v5 = vadd.f32 1e-12, %v302_v63 }
 0x246   :  { %v299_v6 = vpop.xlane.xlu1 %298 }
 0x247   :  { %3861 = vrsqrt.f32 %v305_v4  ;;  %v303_v7 = vmul.f32 0.03125, %v299_v6 }
 0x248   :  { %3863 = vrsqrt.f32 %v306_v5 }
 0x249   :  { %v307_v8 = vadd.f32 1e-12, %v303_v7 }
 0x24b   :  { %3865 = vrsqrt.f32 %v307_v8 }
 0x24d   :  { %v3860_v9 = vpop.eup %3859 }
 0x24e   :  { %v312_v10 = vmul.f32 %v3860_v9, %v4680_v26 }
 0x250   :  { %v322_v15 = vmul.f32 %v3077_v11, %v312_v10 }
 0x251   :  { %v3862_v12 = vpop.eup %3861 }
 0x252   :  { %v3864_v13 = vpop.eup %3863  ;;  %v313_v14 = vmul.f32 %v3862_v12, %v4690_v32  ;;  %v4763_v20 = vadd.f32 %v3078_v16, %v322_v15  ;;  %v382_v32 = vsub.s32 1, %v4778_v29 }
 0x253   :  { %v314_v17 = vmul.f32 %v3864_v13, %v4683_v27 }
 0x254   :  { %v323_v18 = vmul.f32 %v3077_v11, %v313_v14  ;;  %v383_v0 = vrot.slane %v372_v31, %v382_v32 }
 0x255   :  { %v3866_v19 = vpop.eup %3865  ;;  %v324_v23 = vmul.f32 %v3077_v11, %v314_v17 }
 0x256   :  { %v4765_v21 = vadd.f32 %v3078_v16, %v323_v18  ;;  %v315_v22 = vmul.f32 %v3866_v19, %v4693_v33  ;;  %v379_v33 = vrot.slane %v372_v31, %v378_v30 }
 0x257   :  { %v4770_v26 = vadd.f32 %v3078_v16, %v324_v23 }
 0x258   :  { %v373_v24 = vpack.c.bf16 %v4765_v21, %v4763_v20  ;;  %v325_v25 = vmul.f32 %v3077_v11, %v315_v22 }
 0x25a   :  { %552 = vmatmul.mubr.bf16.vlgmr.msra.gmra.mrb[0].mxu0 %v373_v24  ;;  %3436 = vmatprep.mubr.bf16.mxu1 %v373_v24  ;;  %v4772_v28 = vadd.f32 %v3078_v16, %v325_v25 }
 0x25b   :  { %561 = vmatprep.mubr.bf16.mxu0 %v4330_v51 }
 0x25c   :  { %v374_v27 = vpack.c.bf16 %v4772_v28, %v4770_v26 }
 0x25e   :  { %3437 = vmatmul.mubr.bf16.vlgmr.msra.gmra.mrb[0].mxu1 %v374_v27 }
 0x262   :  { %562 = vmatmul.mubr.bf16.gmra.mrb[4].mxu0 %v374_v27 }
 0x32d   :  { %v553_v35 = vpop.f32.mrb[0].mxu0 }
 0x32e   :  { %v554_v36 = vadd.f32 %v553_v35, %v379_v33  ;;  %v555_v37 = vpop.f32.mrb[1].mxu0 }
 0x32f   :  { %v557_v40 = vpop.f32.mrb[2].mxu0  ;;  %v556_v44 = vadd.f32 %v555_v37, %v383_v0 }
 0x330   :  { %v558_v42 = vadd.f32 %v557_v40, %v379_v33  ;;  %v559_v43 = vpop.f32.mrb[3].mxu0  ;;  %v626_v46 = vmul.f32 %v4797_v39, %v554_v36  ;;  %v748_v52 = vmul.f32 %v4800_v41, %v554_v36 }
 0x331   :  { %v560_v1 = vadd.f32 %v559_v43, %v383_v0  ;;  %v3438_v45 = vpop.f32.mrb[0].mxu1 }
 0x332   :  { %v627_v47 = vmul.f32 %v4797_v39, %v558_v42  ;;  %v749_v48 = vmul.f32 %v4800_v41, %v558_v42  ;;  %v615_v49 = vadd.f32 %v3438_v45, %v387_v38  ;;  %v606_v50 = vpop.f32.mrb[1].mxu1 }
 0x333   :  { %v632_v53 = vpack.c.bf16 %v560_v1, %v556_v44  ;;  %v607_v54 = vadd.f32 %v606_v50, %v387_v38  ;;  %v3439_v55 = vpop.f32.mrb[2].mxu1  ;;  %v337_v50 = vld [vmem:[%s5368_s13 + $0x8] sm:$0xff] }
 0x334   :  { %v618_v56 = vadd.f32 %v3439_v55, %v387_v38  ;;  %v609_v57 = vpop.f32.mrb[3].mxu1  ;;  %v630_v58 = vpack.c.bf16 %v627_v47, %v626_v46  ;;  %v740_v59 = vmul.f32 %v4797_v39, %v615_v49  ;;  %v859_v60 = vmul.f32 %v4800_v41, %v615_v49  ;;  %v336_v46 = vld [vmem:[%s5368_s13] sm:$0xff] }
 0x335   :  { %v610_v61 = vadd.f32 %v609_v57, %v387_v38  ;;  %v563_v62 = vpop.f32.mrb[4].mxu0  ;;  %3440 = vmatprep.subr.bf16.mxu1 %v632_v53  ;;  %v752_v63 = vpack.c.bf16 %v749_v48, %v748_v52  ;;  %v738_v8 = vmul.f32 %v4797_v39, %v607_v54  ;;  %v857_v9 = vmul.f32 %v4800_v41, %v607_v54  ;;  %v338_v52 = vld [vmem:[%s5368_s13 + $0x10] sm:$0xff]  ;;  %v339_v57 = vld [vmem:[%s5368_s13 + $0x18] sm:$0xff] }
 0x336   :  { %v741_v4 = vmul.f32 %v4797_v39, %v618_v56  ;;  %v860_v5 = vmul.f32 %v4800_v41, %v618_v56  ;;  %v564_v6 = vadd.f32 %v563_v62, %v379_v33  ;;  %v565_v7 = vpop.f32.mrb[5].mxu0  ;;  %3441 = vmatpush3.bf16.xpose.msra.mxu1 %v632_v53  ;;  %3444 = vmatprep.mubr.bf16.mxu1 %v630_v58 }
 0x337   :  { %v739_v10 = vmul.f32 %v4797_v39, %v610_v61  ;;  %v858_v11 = vmul.f32 %v4800_v41, %v610_v61  ;;  %v567_v12 = vpop.f32.mrb[6].mxu0  ;;  %v566_v13 = vadd.f32 %v565_v7, %v383_v0 }
 0x338   :  { %v568_v14 = vadd.f32 %v567_v12, %v379_v33  ;;  %v569_v15 = vpop.f32.mrb[7].mxu0  ;;  %v862_v16 = vpack.c.bf16 %v860_v5, %v859_v60  ;;  %v4816_v22 = vpack.c.bf16 %v741_v4, %v740_v59  ;;  %v628_v23 = vmul.f32 %v4797_v39, %v564_v6 }
 0x339   :  { %v570_v17 = vadd.f32 %v569_v15, %v383_v0  ;;  %v861_v18 = vpack.c.bf16 %v858_v11, %v857_v9  ;;  %v4814_v19 = vpack.c.bf16 %v739_v10, %v738_v8  ;;  %v750_v24 = vmul.f32 %v4800_v41, %v564_v6 }
 0x33a   :  { %v629_v25 = vmul.f32 %v4797_v39, %v568_v14  ;;  %v751_v27 = vmul.f32 %v4800_v41, %v568_v14 }
 0x33b   :  { %v633_v31 = vpack.c.bf16 %v570_v17, %v566_v13  ;;  %3456 = vmatprep.subr.bf16.mxu0 %v861_v18 }
 0x33c   :  { %v631_v35 = vpack.c.bf16 %v629_v25, %v628_v23  ;;  %v753_v33 = vpack.c.bf16 %v751_v27, %v750_v24  ;;  %3457 = vmatpush3.bf16.msra.mxu0 %v861_v18 }
 0x33d   :  { %3442 = vmatprep.subr.bf16.mxu1 %v633_v31  ;;  %3458 = vmatprep.subr.bf16.mxu0 %v862_v16 }
 0x33e   :  { %3443 = vmatpush3.bf16.xpose.msra.mxu1 %v633_v31 }
 0x33f   :  { %3448 = vmatprep.subr.bf16.mxu1 %v632_v53 }
 0x340   :  { %3459 = vmatpush3.bf16.msra.mxu0 %v862_v16 }
 0x341   :  { %3464 = vmatprep.subr.bf16.mxu0 %v4814_v19 }
 0x345   :  { %3445 = vmatmul.mubr.bf16.vlgmr.msra.gmra.mrb[4].mxu1 %v631_v35 }
 0x346   :  { %3449 = vmatpush3.bf16.xpose.msra.mxu1 %v632_v53  ;;  %3452 = vmatprep.mubr.bf16.mxu1 %v752_v63 }
 0x347   :  { %3450 = vmatprep.subr.bf16.mxu1 %v633_v31 }
 0x34e   :  { %3451 = vmatpush3.bf16.xpose.msra.mxu1 %v633_v31 }
 0x355   :  { %3453 = vmatmul.mubr.bf16.vlgmr.msra.gmra.mrb[8].mxu1 %v753_v33 }
 0x418   :  { %v3446_v0 = vpop.f32.mrb[4].mxu1 }
 0x419   :  { %v668_v36 = vpop.f32.mrb[5].mxu1  ;;  %v685_v61 = vmul.f32 0.25, %v3446_v0 }
 0x41a   :  { %v3447_v37 = vpop.f32.mrb[6].mxu1  ;;  %v683_v53 = vmul.f32 0.25, %v668_v36 }
 0x41b   :  { %v671_v38 = vpop.f32.mrb[7].mxu1  ;;  %v686_v4 = vmul.f32 0.25, %v3447_v37  ;;  %v689_v8 = vadd.f32 %v685_v61, %v338_v52 }
 0x41c   :  { %v684_v58 = vmul.f32 0.25, %v671_v38  ;;  %v687_v63 = vadd.f32 %v683_v53, %v336_v46 }
 0x41d   :  { %v690_v10 = vadd.f32 %v686_v4, %v339_v57  ;;  %v698_v11 = vsel %vm691_vm4, %v689_v8, -inf  ;;  %v3763_v4 = vld [vmem:[%s5369_s19] sm:$0xff]  }
 0x41e   :  { %v688_v6 = vadd.f32 %v684_v58, %v337_v50  ;;  %v692_v7 = vsel %vm691_vm4, %v687_v63, -inf  ;;  %3472 = vmatprep.subr.bf16.mxu1 %v3763_v4 }
 0x41f   :  { %v701_v12 = vsel %vm691_vm4, %v690_v10, -inf  ;;  %3473 = vmatpush3.bf16.msra.mxu1 %v3763_v4 }
 0x420   :  { %v695_v9 = vsel %vm691_vm4, %v688_v6, -inf }
 0x428   :  { %v3454_v40 = vpop.f32.mrb[8].mxu1 }
 0x429   :  { %v788_v42 = vpop.f32.mrb[9].mxu1  ;;  %v805_v43 = vmul.f32 0.25, %v3454_v40 }
 0x42a   :  { %v803_v44 = vmul.f32 0.25, %v788_v42  ;;  %v3455_v1 = vpop.f32.mrb[10].mxu1 }
 0x42b   :  { %v791_v45 = vpop.f32.mrb[11].mxu1  ;;  %v806_v47 = vmul.f32 0.25, %v3455_v1  ;;  %v809_v56 = vadd.f32 %v805_v43, %v338_v52 }
 0x42c   :  { %v804_v48 = vmul.f32 0.25, %v791_v45  ;;  %v807_v49 = vadd.f32 %v803_v44, %v336_v46 }
 0x42d   :  { %v810_v60 = vadd.f32 %v806_v47, %v339_v57  ;;  %v817_v62 = vsel %vm691_vm4, %v809_v56, -inf }
 0x42e   :  { %v811_v54 = vsel %vm691_vm4, %v807_v49, -inf  ;;  %v808_v55 = vadd.f32 %v804_v48, %v337_v50 }
 0x42f   :  { %812 = vmax.xlane.f32.xlu0 %v811_v54  ;;  %v820_v5 = vsel %vm691_vm4, %v810_v60, -inf }
 0x430   :  { %v814_v59 = vsel %vm691_vm4, %v808_v55, -inf }
 0x431   :  { %815 = vmax.xlane.f32.xlu1 %v814_v59 }
 0x433   :  { %818 = vmax.xlane.f32.xlu0 %v817_v62 }
 0x435   :  { %821 = vmax.xlane.f32.xlu1 %v820_v5  ;;  %v3764_v5 = vld [vmem:[%s5369_s19 + $0x8] sm:$0xff]  }
 0x436   :  { %3474 = vmatprep.subr.bf16.mxu1 %v3764_v5 }
 0x437   :  { %693 = vmax.xlane.f32.xlu0 %v692_v7  ;;  %3475 = vmatpush3.bf16.msra.mxu1 %v3764_v5  ;;  %v3766_v7 = vld [vmem:[%s5369_s19 + $0x18] sm:$0xff]  }
 0x439   :  { %696 = vmax.xlane.f32.xlu1 %v695_v9  ;;  %v3768_v9 = vld [vmem:[%s5369_s19 + $0x28] sm:$0xff]  }
 0x43b   :  { %699 = vmax.xlane.f32.xlu0 %v698_v11 }
 0x43d   :  { %702 = vmax.xlane.f32.xlu1 %v701_v12 }
 0x4bc   :  { %v813_v13 = vpop.xlane.xlu0 %812 }
 0x4bd   :  { %v823_v14 = vsub.f32 %v807_v49, %v813_v13 }
 0x4be   :  { %v816_v15 = vpop.xlane.xlu1 %815 }
 0x4bf   :  { %v827_v16 = vmul.f32 1.442695, %v823_v14  ;;  %v824_v17 = vsub.f32 %v808_v55, %v816_v15 }
 0x4c0   :  { %v819_v18 = vpop.xlane.xlu0 %818 }
 0x4c1   :  { %3867 = vpow2.f32 %v827_v16  ;;  %v829_v23 = vmul.f32 1.442695, %v824_v17  ;;  %v825_v24 = vsub.f32 %v809_v56, %v819_v18 }
 0x4c2   :  { %v822_v25 = vpop.xlane.xlu1 %821 }
 0x4c3   :  { %3869 = vpow2.f32 %v829_v23  ;;  %v831_v27 = vmul.f32 1.442695, %v825_v24  ;;  %v826_v31 = vsub.f32 %v810_v60, %v822_v25 }
 0x4c4   :  { %v694_v35 = vpop.xlane.xlu0 %693 }
 0x4c5   :  { %3871 = vpow2.f32 %v831_v27  ;;  %v833_v33 = vmul.f32 1.442695, %v826_v31  ;;  %v704_v0 = vsub.f32 %v687_v63, %v694_v35 }
 0x4c6   :  { %v697_v36 = vpop.xlane.xlu1 %696 }
 0x4c7   :  { %3873 = vpow2.f32 %v833_v33  ;;  %v708_v37 = vmul.f32 1.442695, %v704_v0  ;;  %v705_v38 = vsub.f32 %v688_v6, %v697_v36  ;;  %v3765_v6 = vld [vmem:[%s5369_s19 + $0x10] sm:$0xff]  }
 0x4c8   :  { %v700_v40 = vpop.xlane.xlu0 %699  ;;  %3476 = vmatprep.subr.bf16.mxu1 %v3765_v6 }
 0x4c9   :  { %3875 = vpow2.f32 %v708_v37  ;;  %v710_v42 = vmul.f32 1.442695, %v705_v38  ;;  %v706_v43 = vsub.f32 %v689_v8, %v700_v40  ;;  %3477 = vmatpush3.bf16.msra.mxu1 %v3765_v6  ;;  %v3767_v8 = vld [vmem:[%s5369_s19 + $0x20] sm:$0xff]  }
 0x4ca   :  { %v703_v44 = vpop.xlane.xlu1 %702  ;;  %3478 = vmatprep.subr.bf16.mxu1 %v3766_v7 }
 0x4cb   :  { %v4843_v1 = vpop.eup %3867  ;;  %3877 = vpow2.f32 %v710_v42  ;;  %v712_v45 = vmul.f32 1.442695, %v706_v43  ;;  %v707_v46 = vsub.f32 %v690_v10, %v703_v44  ;;  %v3769_v10 = vld [vmem:[%s5369_s19 + $0x30] sm:$0xff]  }
 0x4cc   :  { %v835_v47 = vsel %vm691_vm4, %v4843_v1, 0.0 }
 0x4cd   :  { %v4847_v48 = vpop.eup %3869  ;;  %3879 = vpow2.f32 %v712_v45  ;;  %v714_v49 = vmul.f32 1.442695, %v707_v46  ;;  %836 = vadd.xlane.f32.xlu0 %v835_v47  ;;  %3479 = vmatpush3.bf16.msra.mxu1 %v3766_v7 }
 0x4ce   :  { %v838_v50 = vsel %vm691_vm4, %v4847_v48, 0.0  ;;  %3480 = vmatprep.subr.bf16.mxu1 %v3767_v8 }
 0x4cf   :  { %v4851_v52 = vpop.eup %3871  ;;  %3881 = vpow2.f32 %v714_v49  ;;  %839 = vadd.xlane.f32.xlu1 %v838_v50 }
 0x4d0   :  { %v841_v53 = vsel %vm691_vm4, %v4851_v52, 0.0 }
 0x4d1   :  { %v3874_v54 = vpop.eup %3873  ;;  %842 = vadd.xlane.f32.xlu0 %v841_v53  ;;  %3481 = vmatpush3.bf16.msra.mxu1 %v3767_v8 }
 0x4d2   :  { %v844_v55 = vsel %vm691_vm4, %v3874_v54, 0.0  ;;  %3482 = vmatprep.subr.bf16.mxu1 %v3768_v9 }
 0x4d3   :  { %v4856_v56 = vpop.eup %3875  ;;  %845 = vadd.xlane.f32.xlu1 %v844_v55 }
 0x4d4   :  { %v716_v57 = vsel %vm691_vm4, %v4856_v56, 0.0 }
 0x4d5   :  { %v3878_v58 = vpop.eup %3877  ;;  %717 = vadd.xlane.f32.xlu0 %v716_v57  ;;  %3483 = vmatpush3.bf16.msra.mxu1 %v3768_v9 }
 0x4d6   :  { %v719_v59 = vsel %vm691_vm4, %v3878_v58, 0.0  ;;  %3484 = vmatprep.subr.bf16.mxu1 %v3769_v10 }
 0x4d7   :  { %v4861_v60 = vpop.eup %3879  ;;  %720 = vadd.xlane.f32.xlu1 %v719_v59 }
 0x4d8   :  { %v722_v61 = vsel %vm691_vm4, %v4861_v60, 0.0 }
 0x4d9   :  { %v4865_v62 = vpop.eup %3881  ;;  %723 = vadd.xlane.f32.xlu0 %v722_v61  ;;  %3485 = vmatpush3.bf16.msra.mxu1 %v3769_v10 }
 0x4da   :  { %v725_v63 = vsel %vm691_vm4, %v4865_v62, 0.0 }
 0x4db   :  { %726 = vadd.xlane.f32.xlu1 %v725_v63 }
 0x55a   :  { %v837_v11 = vpop.xlane.xlu0 %836 }
 0x55b   :  { %3883 = vrcp.f32 %v837_v11 }
 0x55c   :  { %v840_v12 = vpop.xlane.xlu1 %839 }
 0x55d   :  { %3885 = vrcp.f32 %v840_v12 }
 0x55e   :  { %v843_v13 = vpop.xlane.xlu0 %842 }
 0x55f   :  { %3887 = vrcp.f32 %v843_v13 }
 0x560   :  { %v846_v14 = vpop.xlane.xlu1 %845 }
 0x561   :  { %3889 = vrcp.f32 %v846_v14 }
 0x562   :  { %v718_v15 = vpop.xlane.xlu0 %717 }
 0x563   :  { %3891 = vrcp.f32 %v718_v15 }
 0x564   :  { %v721_v16 = vpop.xlane.xlu1 %720 }
 0x565   :  { %v3884_v17 = vpop.eup %3883  ;;  %3893 = vrcp.f32 %v721_v16 }
 0x566   :  { %v724_v23 = vpop.xlane.xlu0 %723  ;;  %v851_v25 = vmul.f32 %v3884_v17, %v4843_v1 }
 0x567   :  { %v3886_v18 = vpop.eup %3885 }
 0x568   :  { %v727_v24 = vpop.xlane.xlu1 %726  ;;  %v852_v27 = vmul.f32 %v3886_v18, %v4847_v48 }
 0x569   :  { %v3888_v31 = vpop.eup %3887  ;;  %3895 = vrcp.f32 %v727_v24 }
 0x56a   :  { %v855_v35 = vpack.c.bf16 %v852_v27, %v851_v25  ;;  %3897 = vrcp.f32 %v724_v23  ;;  %v853_v0 = vmul.f32 %v3888_v31, %v4851_v52 }
 0x56b   :  { %v3890_v33 = vpop.eup %3889 }
 0x56c   :  { %v854_v36 = vmul.f32 %v3890_v33, %v3874_v54  ;;  %3460 = vmatprep.mubr.msk.bf16.mxu0 %vm691_vm4, %v855_v35 }
 0x56d   :  { %v3892_v37 = vpop.eup %3891 }
 0x56e   :  { %v856_v38 = vpack.c.bf16 %v854_v36, %v853_v0  ;;  %v732_v42 = vmul.f32 %v3892_v37, %v4856_v56 }
 0x56f   :  { %v3894_v40 = vpop.eup %3893 }
 0x570   :  { %3461 = vmatmul.mubr.msk.bf16.vlgmr.msra.gmra.mrb[8].mxu0 %vm691_vm4, %v856_v38  ;;  %v733_v43 = vmul.f32 %v3894_v40, %v3878_v58  ;;  %v3772_v38 = vld [vmem:[%s5335_s11 + $0x8] sm:$0xff]   ;;  %v3773_v40 = vld [vmem:[%s5335_s11 + $0x10] sm:$0xff]  }
 0x571   :  { %3465 = vmatpush3.bf16.msra.mxu0 %v4814_v19  ;;  %v3770_v19 = vld [vmem:[%s5369_s19 + $0x38] sm:$0xff]  }
 0x572   :  { %3466 = vmatprep.subr.bf16.mxu0 %v4816_v22  ;;  %v736_v44 = vpack.c.bf16 %v733_v43, %v732_v42  ;;  %3486 = vmatprep.subr.bf16.mxu1 %v3770_v19  ;;  %v3774_v42 = vld [vmem:[%s5335_s11 + $0x18] sm:$0xff]   ;;  %v3775_v43 = vld [vmem:[%s5335_s11 + $0x20] sm:$0xff]  }
 0x573   :  { %v3896_v1 = vpop.eup %3895  ;;  %3487 = vmatpush3.bf16.msra.mxu1 %v3770_v19 }
 0x574   :  { %3468 = vmatprep.mubr.msk.bf16.mxu0 %vm691_vm4, %v736_v44  ;;  %v3898_v45 = vpop.eup %3897  ;;  %v735_v46 = vmul.f32 %v3896_v1, %v4865_v62  ;;  %v3776_v44 = vld [vmem:[%s5335_s11 + $0x28] sm:$0xff]   ;;  %v3777_v1 = vld [vmem:[%s5335_s11 + $0x30] sm:$0xff]  }
 0x575   :  { %3467 = vmatpush3.bf16.msra.mxu0 %v4816_v22  ;;  %v734_v47 = vmul.f32 %v3898_v45, %v4861_v60  ;;  %v3109_v22 = vld [vmem:[#allocation6] ss:$0 sm:$0xff]  ;;  %v3778_v45 = vld [vmem:[%s5335_s11 + $0x38] sm:$0xff]  }
 0x577   :  { %v737_v48 = vpack.c.bf16 %v735_v46, %v734_v47 }
 0x57c   :  { %3469 = vmatmul.mubr.msk.bf16.vlgmr.msra.gmra.mrb[8].mxu0 %vm691_vm4, %v737_v48 }
 0x64f   :  { %v3470_v49 = vpop.f32.mrb[8].mxu0 }
 0x650   :  { %v958_v50 = vpop.f32.mrb[9].mxu0 }
 0x651   :  { %v3471_v52 = vpop.f32.mrb[10].mxu0 }
 0x652   :  { %v991_v53 = vpack.c.bf16 %v3471_v52, %v3470_v49  ;;  %v961_v54 = vpop.f32.mrb[11].mxu0 }
 0x653   :  { %v990_v55 = vpack.c.bf16 %v961_v54, %v958_v50 }
 0x655   :  { %3488 = vmatprep.mubr.bf16.mxu1 %v990_v55 }
 0x656   :  { %3489 = vmatmul.mubr.bf16.vlgmr.msra.gmra.mrb[12].mxu1 %v991_v53 }
 0x729   :  { %v3490_v56 = vpop.f32.mrb[12].mxu1 }
 0x72a   :  { %v1080_v57 = vpop.f32.mrb[13].mxu1  ;;  %v1089_v58 = vadd.f32 %v3490_v56, %v3109_v22 }
 0x72b   :  { %v1081_v59 = vadd.f32 %v3109_v22, %v1080_v57  ;;  %v3491_v60 = vpop.f32.mrb[14].mxu1 }
 0x72c   :  { %v1083_v61 = vpop.f32.mrb[15].mxu1  ;;  %v1092_v63 = vadd.f32 %v3491_v60, %v3109_v22  ;;  %v1097_v5 = vadd.f32 %v1089_v58, %v4770_v26  ;;  %v3118_v58 = vld [vmem:[#allocation7] ss:$0 sm:$0xff] }
 0x72d   :  { %v1095_v62 = vadd.f32 %v1081_v59, %v4763_v20  ;;  %v1084_v4 = vadd.f32 %v3109_v22, %v1083_v61  ;;  %v3771_v20 = vld [vmem:[%s5335_s11] sm:$0xff]  }
 0x72e   :  { %v1098_v8 = vadd.f32 %v1092_v63, %v4772_v28  ;;  %v1103_v10 = vmul.f32 %v4649_v3, %v1097_v5  ;;  %3492 = vmatprep.subr.bf16.mxu0 %v3771_v20 }
 0x72f   :  { %v1096_v6 = vadd.f32 %v1084_v4, %v4765_v21  ;;  %v1101_v7 = vmul.f32 %v4649_v3, %v1095_v62  ;;  %3493 = vmatpush3.bf16.msra.mxu0 %v3771_v20  ;;  %v3119_v4 = vld [vmem:[#allocation9] ss:$0 sm:$0xff] }
 0x730   :  { %v1104_v11 = vmul.f32 %v4649_v3, %v1098_v8  ;;  %3494 = vmatprep.subr.bf16.mxu0 %v3772_v38 }
 0x731   :  { %1105 = vadd.xlane.f32.xlu0 %v1101_v7  ;;  %v1102_v9 = vmul.f32 %v4649_v3, %v1096_v6 }
 0x733   :  { %1107 = vadd.xlane.f32.xlu1 %v1102_v9  ;;  %3495 = vmatpush3.bf16.msra.mxu0 %v3772_v38 }
 0x734   :  { %3496 = vmatprep.subr.bf16.mxu0 %v3773_v40 }
 0x735   :  { %1109 = vadd.xlane.f32.xlu0 %v1103_v10 }
 0x737   :  { %1111 = vadd.xlane.f32.xlu1 %v1104_v11  ;;  %3497 = vmatpush3.bf16.msra.mxu0 %v3773_v40 }
 0x738   :  { %3498 = vmatprep.subr.bf16.mxu0 %v3774_v42 }
 0x73b   :  { %3499 = vmatpush3.bf16.msra.mxu0 %v3774_v42 }
 0x73c   :  { %3500 = vmatprep.subr.bf16.mxu0 %v3775_v43 }
 0x73f   :  { %3501 = vmatpush3.bf16.msra.mxu0 %v3775_v43 }
 0x740   :  { %3502 = vmatprep.subr.bf16.mxu0 %v3776_v44 }
 0x743   :  { %3503 = vmatpush3.bf16.msra.mxu0 %v3776_v44 }
 0x744   :  { %3504 = vmatprep.subr.bf16.mxu0 %v3777_v1 }
 0x747   :  { %3505 = vmatpush3.bf16.msra.mxu0 %v3777_v1 }
 0x748   :  { %3506 = vmatprep.subr.bf16.mxu0 %v3778_v45 }
 0x74b   :  { %3507 = vmatpush3.bf16.msra.mxu0 %v3778_v45 }
 0x7be   :  { %v1106_v21 = vpop.xlane.xlu0 %1105 }
 0x7bf   :  { %v1113_v26 = vmul.f32 0.03125, %v1106_v21 }
 0x7c0   :  { %v1108_v12 = vpop.xlane.xlu1 %1107 }
 0x7c1   :  { %v1117_v28 = vsub.f32 %v1101_v7, %v1113_v26  ;;  %v1114_v13 = vmul.f32 0.03125, %v1108_v12 }
 0x7c2   :  { %v1110_v14 = vpop.xlane.xlu0 %1109 }
 0x7c3   :  { %v1118_v15 = vsub.f32 %v1102_v9, %v1114_v13  ;;  %v1115_v16 = vmul.f32 0.03125, %v1110_v14  ;;  %v1121_v17 = vmul.f32 %v4649_v3, %v1117_v28  ;;  %v3779_v13 = vld [vmem:[#allocation12] sm:$0xff]   ;;  %v3780_v14 = vld [vmem:[#allocation12 + $0x8] sm:$0xff]  }
 0x7c4   :  { %v1112_v18 = vpop.xlane.xlu1 %1111  ;;  %3512 = vmatprep.subr.bf16.mxu1 %v3779_v13 }
 0x7c5   :  { %v1119_v23 = vsub.f32 %v1103_v10, %v1115_v16  ;;  %v1116_v24 = vmul.f32 0.03125, %v1112_v18  ;;  %v1125_v25 = vmul.f32 %v1121_v17, %v1121_v17  ;;  %v1122_v27 = vmul.f32 %v4649_v3, %v1118_v15  ;;  %3513 = vmatpush3.bf16.msra.mxu1 %v3779_v13  ;;  %v3781_v15 = vld [vmem:[#allocation12 + $0x10] sm:$0xff]   ;;  %v3782_v16 = vld [vmem:[#allocation12 + $0x18] sm:$0xff]   ;;  %v3784_v18 = vld [vmem:[#allocation12 + $0x28] sm:$0xff]  }
 0x7c6   :  { %3514 = vmatprep.subr.bf16.mxu1 %v3780_v14 }
 0x7c7   :  { %v1120_v31 = vsub.f32 %v1104_v11, %v1116_v24  ;;  %1129 = vadd.xlane.f32.xlu0 %v1125_v25  ;;  %v1126_v35 = vmul.f32 %v1122_v27, %v1122_v27  ;;  %v1123_v33 = vmul.f32 %v4649_v3, %v1119_v23  ;;  %v3785_v23 = vld [vmem:[#allocation12 + $0x30] sm:$0xff]   ;;  %v3786_v24 = vld [vmem:[#allocation12 + $0x38] sm:$0xff]  }
 0x7c8   :  { %v3120_v25 = vld [vmem:[#allocation10] ss:$0 sm:$0xff] }
 0x7c9   :  { %1131 = vadd.xlane.f32.xlu1 %v1126_v35  ;;  %v1127_v0 = vmul.f32 %v1123_v33, %v1123_v33  ;;  %v1124_v36 = vmul.f32 %v4649_v3, %v1120_v31  ;;  %3515 = vmatpush3.bf16.msra.mxu1 %v3780_v14 }
 0x7ca   :  { %3516 = vmatprep.subr.bf16.mxu1 %v3781_v15 }
 0x7cb   :  { %1133 = vadd.xlane.f32.xlu0 %v1127_v0  ;;  %v1128_v37 = vmul.f32 %v1124_v36, %v1124_v36 }
 0x7cd   :  { %1135 = vadd.xlane.f32.xlu1 %v1128_v37  ;;  %3517 = vmatpush3.bf16.msra.mxu1 %v3781_v15 }
 0x7ce   :  { %3518 = vmatprep.subr.bf16.mxu1 %v3782_v16 }
 0x7d1   :  { %3519 = vmatpush3.bf16.msra.mxu1 %v3782_v16 }
 0x854   :  { %v1130_v46 = vpop.xlane.xlu0 %1129 }
 0x855   :  { %v1137_v47 = vmul.f32 0.03125, %v1130_v46 }
 0x856   :  { %v1132_v48 = vpop.xlane.xlu1 %1131 }
 0x857   :  { %v1141_v19 = vadd.f32 1e-12, %v1137_v47  ;;  %v1138_v49 = vmul.f32 0.03125, %v1132_v48 }
 0x858   :  { %v1134_v50 = vpop.xlane.xlu0 %1133 }
 0x859   :  { %3899 = vrsqrt.f32 %v1141_v19  ;;  %v1142_v52 = vadd.f32 1e-12, %v1138_v49  ;;  %v1139_v53 = vmul.f32 0.03125, %v1134_v50 }
 0x85a   :  { %v1136_v54 = vpop.xlane.xlu1 %1135 }
 0x85b   :  { %3901 = vrsqrt.f32 %v1142_v52  ;;  %v1143_v55 = vadd.f32 1e-12, %v1139_v53  ;;  %v1140_v22 = vmul.f32 0.03125, %v1136_v54 }
 0x85d   :  { %3903 = vrsqrt.f32 %v1143_v55  ;;  %v1144_v56 = vadd.f32 1e-12, %v1140_v22 }
 0x85f   :  { %3905 = vrsqrt.f32 %v1144_v56 }
 0x863   :  { %v3900_v57 = vpop.eup %3899 }
 0x864   :  { %v1149_v59 = vmul.f32 %v3900_v57, %v1121_v17  ;;  %v3783_v17 = vld [vmem:[#allocation12 + $0x20] sm:$0xff]  }
 0x865   :  { %v3902_v60 = vpop.eup %3901  ;;  %3520 = vmatprep.subr.bf16.mxu1 %v3783_v17 }
 0x866   :  { %v1150_v61 = vmul.f32 %v3902_v60, %v1122_v27  ;;  %v1159_v62 = vmul.f32 %v3118_v58, %v1149_v59  ;;  %3521 = vmatpush3.bf16.msra.mxu1 %v3783_v17  ;;  %v3129_v17 = vld [vmem:[#allocation13] ss:$0 sm:$0xff] }
 0x867   :  { %v3904_v63 = vpop.eup %3903  ;;  %3522 = vmatprep.subr.bf16.mxu1 %v3784_v18 }
 0x868   :  { %v1151_v5 = vmul.f32 %v3904_v63, %v1123_v33  ;;  %v1160_v6 = vmul.f32 %v3118_v58, %v1150_v61  ;;  %v4942_v9 = vadd.f32 %v3119_v4, %v1159_v62 }
 0x869   :  { %v3906_v7 = vpop.eup %3905 }
 0x86a   :  { %v1152_v8 = vmul.f32 %v3906_v7, %v1124_v36  ;;  %v4944_v10 = vadd.f32 %v3119_v4, %v1160_v6  ;;  %v1161_v11 = vmul.f32 %v3118_v58, %v1151_v5  ;;  %3523 = vmatpush3.bf16.msra.mxu1 %v3784_v18 }
 0x86b   :  { %3524 = vmatprep.subr.bf16.mxu1 %v3785_v23 }
 0x86c   :  { %v1190_v20 = vpack.c.bf16 %v4944_v10, %v4942_v9  ;;  %v1162_v21 = vmul.f32 %v3118_v58, %v1152_v8  ;;  %v4948_v26 = vadd.f32 %v3119_v4, %v1161_v11 }
 0x86e   :  { %3508 = vmatprep.mubr.bf16.mxu0 %v1190_v20  ;;  %v4950_v12 = vadd.f32 %v3119_v4, %v1162_v21  ;;  %3525 = vmatpush3.bf16.msra.mxu1 %v3785_v23 }
 0x86f   :  { %3526 = vmatprep.subr.bf16.mxu1 %v3786_v24 }
 0x870   :  { %v1191_v28 = vpack.c.bf16 %v4950_v12, %v4948_v26 }
 0x872   :  { %3509 = vmatmul.mubr.bf16.vlgmr.msra.gmra.mrb[12].mxu0 %v1191_v28  ;;  %3527 = vmatpush3.bf16.msra.mxu1 %v3786_v24 }
 0x873   :  { %1744 = vmatprep.mubr.bf16.mxu0 %v4330_v51 }
 0x945   :  { %v3510_v27 = vpop.f32.mrb[12].mxu0 }
 0x946   :  { %v1289_v31 = vadd.f32 %v3510_v27, %v3120_v25  ;;  %v1280_v35 = vpop.f32.mrb[13].mxu0 }
 0x947   :  { %v1281_v33 = vadd.f32 %v3120_v25, %v1280_v35  ;;  %v3511_v0 = vpop.f32.mrb[14].mxu0 }
 0x948   :  { %v1297_v36 = vmul.f32 %v1289_v31, %v1289_v31  ;;  %v1292_v37 = vadd.f32 %v3511_v0, %v3120_v25  ;;  %v1283_v38 = vpop.f32.mrb[15].mxu0 }
 0x949   :  { %v1295_v40 = vmul.f32 %v1281_v33, %v1281_v33  ;;  %v1284_v42 = vadd.f32 %v3120_v25, %v1283_v38 }
 0x94a   :  { %v1301_v43 = vmul.f32 %v1297_v36, %v1289_v31  ;;  %v1298_v44 = vmul.f32 %v1292_v37, %v1292_v37 }
 0x94b   :  { %v1299_v1 = vmul.f32 %v1295_v40, %v1281_v33  ;;  %v1296_v45 = vmul.f32 %v1284_v42, %v1284_v42 }
 0x94c   :  { %v1305_v46 = vmul.f32 0.044715, %v1301_v43  ;;  %v1302_v47 = vmul.f32 %v1298_v44, %v1292_v37 }
 0x94d   :  { %v1303_v48 = vmul.f32 0.044715, %v1299_v1  ;;  %v1300_v19 = vmul.f32 %v1296_v45, %v1284_v42  ;;  %v3790_v1 = vld [vmem:[%s5366_s12 + $0xd8] ss:$12 sps:$4 sm:$0xff]  }
 0x94e   :  { %v1309_v49 = vadd.f32 %v1305_v46, %v1289_v31  ;;  %v1306_v50 = vmul.f32 0.044715, %v1302_v47 }
 0x94f   :  { %v1307_v52 = vadd.f32 %v1303_v48, %v1281_v33  ;;  %v1304_v53 = vmul.f32 0.044715, %v1300_v19 }
 0x950   :  { %v1313_v54 = vmul.f32 0.7978846, %v1309_v49  ;;  %v1310_v55 = vadd.f32 %v1306_v50, %v1292_v37 }
 0x951   :  { %v1311_v22 = vmul.f32 0.7978846, %v1307_v52  ;;  %v1308_v56 = vadd.f32 %v1304_v53, %v1284_v42 }
 0x952   :  { %3907 = vtanh.f32 %v1313_v54  ;;  %v1314_v57 = vmul.f32 0.7978846, %v1310_v55 }
 0x953   :  { %3909 = vtanh.f32 %v1311_v22  ;;  %v1312_v58 = vmul.f32 0.7978846, %v1308_v56 }
 0x954   :  { %3911 = vtanh.f32 %v1314_v57 }
 0x955   :  { %3913 = vtanh.f32 %v1312_v58 }
 0x95c   :  { %v3908_v59 = vpop.eup %3907 }
 0x95d   :  { %v3910_v60 = vpop.eup %3909  ;;  %v1321_v61 = vadd.f32 1.0, %v3908_v59 }
 0x95e   :  { %v3912_v62 = vpop.eup %3911  ;;  %v1319_v63 = vadd.f32 1.0, %v3910_v60 }
 0x95f   :  { %v3914_v4 = vpop.eup %3913  ;;  %v1325_v5 = vmul.f32 0.5, %v1321_v61  ;;  %v1322_v6 = vadd.f32 1.0, %v3912_v62 }
 0x960   :  { %v1320_v7 = vadd.f32 1.0, %v3914_v4  ;;  %v1323_v8 = vmul.f32 0.5, %v1319_v63  ;;  %v3796_v4 = vld [vmem:[%s5366_s12 + $0xf4] ss:$12 sps:$4 sm:$0xff]  }
 0x961   :  { %v1326_v11 = vmul.f32 0.5, %v1322_v6  ;;  %v1329_v21 = vmul.f32 %v1325_v5, %v1289_v31  ;;  %v3797_v5 = vld [vmem:[%s5366_s12 + $0xe0] ss:$12 sps:$4 sm:$0xff]   ;;  %v3794_v6 = vld [vmem:[%s5366_s12 + $0xf0] ss:$12 sps:$4 sm:$0xff]  }
 0x962   :  { %v1324_v20 = vmul.f32 0.5, %v1320_v7  ;;  %v1327_v13 = vmul.f32 %v1323_v8, %v1281_v33  ;;  %v3800_v7 = vld [vmem:[%s5366_s12 + $0x10c] ss:$12 sps:$4 sm:$0xff]  }
 0x963   :  { %v1330_v28 = vmul.f32 %v1326_v11, %v1292_v37  ;;  %v3801_v8 = vld [vmem:[%s5366_s12 + $0xf8] ss:$12 sps:$4 sm:$0xff]   ;;  %v3798_v11 = vld [vmem:[%s5366_s12 + $0x108] ss:$12 sps:$4 sm:$0xff]  }
 0x964   :  { %v1328_v14 = vmul.f32 %v1324_v20, %v1284_v42  ;;  %v3804_v20 = vld [vmem:[%s5366_s12 + $0x124] ss:$12 sps:$4 sm:$0xff]  }
 0x965   :  { %v1349_v15 = vpack.c.bf16 %v1330_v28, %v1329_v21  ;;  %v3805_v21 = vld [vmem:[%s5366_s12 + $0x110] ss:$12 sps:$4 sm:$0xff]   ;;  %v3802_v28 = vld [vmem:[%s5366_s12 + $0x120] ss:$12 sps:$4 sm:$0xff]  }
 0x966   :  { %v1348_v16 = vpack.c.bf16 %v1328_v14, %v1327_v13  ;;  %v3808_v13 = vld [vmem:[%s5366_s12 + $0x13c] ss:$12 sps:$4 sm:$0xff]  }
 0x967   :  { %v3809_v14 = vld [vmem:[%s5366_s12 + $0x128] ss:$12 sps:$4 sm:$0xff]  }
 0x968   :  { %3528 = vmatprep.mubr.bf16.mxu1 %v1348_v16  ;;  %v3812_v16 = vld [vmem:[%s5366_s12 + $0x154] ss:$12 sps:$4 sm:$0xff]  }
 0x969   :  { %3529 = vmatmul.mubr.bf16.vlgmr.msra.gmra.mrb[16].mxu1 %v1349_v15  ;;  %v3806_v15 = vld [vmem:[%s5366_s12 + $0x138] ss:$12 sps:$4 sm:$0xff]  }
 0xa3c   :  { %v3530_v18 = vpop.f32.mrb[16].mxu1 }
 0xa3d   :  { %v1438_v23 = vpop.f32.mrb[17].mxu1  ;;  %v1447_v24 = vadd.f32 %v3530_v18, %v3129_v17  ;;  %v3810_v18 = vld [vmem:[%s5366_s12 + $0x150] ss:$12 sps:$4 sm:$0xff]  }
 0xa3e   :  { %v1439_v25 = vadd.f32 %v3129_v17, %v1438_v23  ;;  %v3531_v27 = vpop.f32.mrb[18].mxu1  ;;  %v3816_v23 = vld [vmem:[%s5366_s12 + $0x16c] ss:$12 sps:$4 sm:$0xff]  }
 0xa3f   :  { %v1441_v35 = vpop.f32.mrb[19].mxu1  ;;  %v1450_v36 = vadd.f32 %v3531_v27, %v3129_v17  ;;  %v1455_v31 = vadd.f32 %v1447_v24, %v4948_v26  ;;  %v3792_v26 = vld [vmem:[%s5366_s12 + $0xdc] ss:$12 sps:$4 sm:$0xff]   ;;  %v3817_v24 = vld [vmem:[%s5366_s12 + $0x158] ss:$12 sps:$4 sm:$0xff]  }
 0xa40   :  { %v1453_v0 = vadd.f32 %v1439_v25, %v4942_v9  ;;  %v1442_v38 = vadd.f32 %v3129_v17, %v1441_v35  ;;  %v3787_v9 = vld [vmem:[%s5366_s12 + $0xc0] ss:$12 sps:$4 sm:$0xff]   ;;  %v3814_v25 = vld [vmem:[%s5366_s12 + $0x168] ss:$12 sps:$4 sm:$0xff]   ;;  %v3818_v27 = vld [vmem:[%s5366_s12 + $0x170] ss:$12 sps:$4 sm:$0xff]  }
 0xa41   :  { %v1456_v40 = vadd.f32 %v1450_v36, %v4950_v12  ;;  %v1461_v43 = vmul.f32 %v4649_v3, %v1455_v31  ;;  %v3793_v12 = vld [vmem:[%s5366_s12 + $0xc8] ss:$12 sps:$4 sm:$0xff]   ;;  %v3813_v17 = vld [vmem:[%s5366_s12 + $0x140] ss:$12 sps:$4 sm:$0xff]  }
 0xa42   :  { %v1454_v33 = vadd.f32 %v1442_v38, %v4944_v10  ;;  %v1459_v37 = vmul.f32 %v4649_v3, %v1453_v0  ;;  %v3789_v10 = vld [vmem:[%s5366_s12 + $0xc4] ss:$12 sps:$4 sm:$0xff]   ;;  %3532 = vmatprep.subr.bf16.mxu1 %v3793_v12 }
 0xa43   :  { %v1462_v44 = vmul.f32 %v4649_v3, %v1456_v40  ;;  %1712 = vmatprep.subr.bf16.mxu0 %v3789_v10  ;;  %3533 = vmatpush3.bf16.msra.mxu1 %v3793_v12 }
 0xa44   :  { %1463 = vadd.xlane.f32.xlu0 %v1459_v37  ;;  %v1460_v42 = vmul.f32 %v4649_v3, %v1454_v33  ;;  %1713 = vmatpush1.bf16.msra.mxu0 %v3787_v9 }
 0xa45   :  { %1714 = vmatprep.subr.bf16.mxu0 %v3792_v26  ;;  %3534 = vmatprep.subr.bf16.mxu1 %v3797_v5  ;;  %v3138_v26 = vld [vmem:[#allocation15] ss:$0 sm:$0xff] }
 0xa46   :  { %1465 = vadd.xlane.f32.xlu1 %v1460_v42 }
 0xa47   :  { %3535 = vmatpush3.bf16.msra.mxu1 %v3797_v5 }
 0xa48   :  { %1467 = vadd.xlane.f32.xlu0 %v1461_v43  ;;  %1715 = vmatpush1.bf16.msra.mxu0 %v3790_v1 }
 0xa49   :  { %1716 = vmatprep.subr.bf16.mxu0 %v3796_v4  ;;  %3536 = vmatprep.subr.bf16.mxu1 %v3801_v8 }
 0xa4a   :  { %1469 = vadd.xlane.f32.xlu1 %v1462_v44 }
 0xa4b   :  { %3537 = vmatpush3.bf16.msra.mxu1 %v3801_v8 }
 0xa4c   :  { %1717 = vmatpush1.bf16.msra.mxu0 %v3794_v6  ;;  %3538 = vmatprep.subr.bf16.mxu1 %v3805_v21 }
 0xa4d   :  { %1718 = vmatprep.subr.bf16.mxu0 %v3800_v7 }
 0xa4f   :  { %3539 = vmatpush3.bf16.msra.mxu1 %v3805_v21 }
 0xa50   :  { %1719 = vmatpush1.bf16.msra.mxu0 %v3798_v11  ;;  %3540 = vmatprep.subr.bf16.mxu1 %v3809_v14 }
 0xa51   :  { %1720 = vmatprep.subr.bf16.mxu0 %v3804_v20 }
 0xa53   :  { %3541 = vmatpush3.bf16.msra.mxu1 %v3809_v14 }
 0xa54   :  { %1721 = vmatpush1.bf16.msra.mxu0 %v3802_v28  ;;  %3542 = vmatprep.subr.bf16.mxu1 %v3813_v17 }
 0xa55   :  { %1722 = vmatprep.subr.bf16.mxu0 %v3808_v13 }
 0xa57   :  { %3543 = vmatpush3.bf16.msra.mxu1 %v3813_v17 }
 0xa58   :  { %1723 = vmatpush1.bf16.msra.mxu0 %v3806_v15  ;;  %3544 = vmatprep.subr.bf16.mxu1 %v3817_v24 }
 0xa59   :  { %1724 = vmatprep.subr.bf16.mxu0 %v3812_v16 }
 0xa5b   :  { %3545 = vmatpush3.bf16.msra.mxu1 %v3817_v24 }
 0xa5c   :  { %1725 = vmatpush1.bf16.msra.mxu0 %v3810_v18  ;;  %3546 = vmatprep.subr.bf16.mxu1 %v3818_v27 }
 0xa5d   :  { %1726 = vmatprep.subr.bf16.mxu0 %v3816_v23 }
 0xa5f   :  { %3547 = vmatpush3.bf16.msra.mxu1 %v3818_v27 }
 0xa60   :  { %1727 = vmatpush1.bf16.msra.mxu0 %v3814_v25 }
 0xad1   :  { %v1464_v45 = vpop.xlane.xlu0 %1463 }
 0xad2   :  { %v1471_v46 = vmul.f32 0.03125, %v1464_v45 }
 0xad3   :  { %v1466_v47 = vpop.xlane.xlu1 %1465 }
 0xad4   :  { %v1475_v48 = vsub.f32 %v1459_v37, %v1471_v46  ;;  %v1472_v19 = vmul.f32 0.03125, %v1466_v47 }
 0xad5   :  { %v1468_v49 = vpop.xlane.xlu0 %1467 }
 0xad6   :  { %v1476_v50 = vsub.f32 %v1460_v42, %v1472_v19  ;;  %v1473_v52 = vmul.f32 0.03125, %v1468_v49  ;;  %v4979_v53 = vmul.f32 %v4649_v3, %v1475_v48  ;;  %v3139_v48 = vld [vmem:[#allocation16] ss:$0 sm:$0xff] }
 0xad7   :  { %v1470_v54 = vpop.xlane.xlu1 %1469 }
 0xad8   :  { %v1477_v55 = vsub.f32 %v1461_v43, %v1473_v52  ;;  %v1474_v22 = vmul.f32 0.03125, %v1470_v54  ;;  %v1483_v56 = vmul.f32 %v4979_v53, %v4979_v53  ;;  %v4984_v57 = vmul.f32 %v4649_v3, %v1476_v50 }
 0xada   :  { %v1478_v58 = vsub.f32 %v1462_v44, %v1474_v22  ;;  %1487 = vadd.xlane.f32.xlu0 %v1483_v56  ;;  %v1484_v59 = vmul.f32 %v4984_v57, %v4984_v57  ;;  %v4989_v60 = vmul.f32 %v4649_v3, %v1477_v55 }
 0xadc   :  { %1489 = vadd.xlane.f32.xlu1 %v1484_v59  ;;  %v1485_v61 = vmul.f32 %v4989_v60, %v4989_v60  ;;  %v4994_v62 = vmul.f32 %v4649_v3, %v1478_v58 }
 0xade   :  { %1491 = vadd.xlane.f32.xlu0 %v1485_v61  ;;  %v1486_v63 = vmul.f32 %v4994_v62, %v4994_v62 }
 0xae0   :  { %1493 = vadd.xlane.f32.xlu1 %v1486_v63 }
 0xb67   :  { %v1488_v35 = vpop.xlane.xlu0 %1487 }
 0xb68   :  { %v1495_v0 = vmul.f32 0.03125, %v1488_v35 }
 0xb69   :  { %v1490_v36 = vpop.xlane.xlu1 %1489 }
 0xb6a   :  { %v1499_v38 = vadd.f32 1e-12, %v1495_v0  ;;  %v1496_v31 = vmul.f32 0.03125, %v1490_v36 }
 0xb6b   :  { %v1492_v33 = vpop.xlane.xlu0 %1491 }
 0xb6c   :  { %3915 = vrsqrt.f32 %v1499_v38  ;;  %v1500_v37 = vadd.f32 1e-12, %v1496_v31  ;;  %v1497_v40 = vmul.f32 0.03125, %v1492_v33 }
 0xb6d   :  { %v1494_v42 = vpop.xlane.xlu1 %1493 }
 0xb6e   :  { %3917 = vrsqrt.f32 %v1500_v37  ;;  %v1501_v43 = vadd.f32 1e-12, %v1497_v40  ;;  %v1498_v44 = vmul.f32 0.03125, %v1494_v42 }
 0xb70   :  { %3919 = vrsqrt.f32 %v1501_v43  ;;  %v1502_v9 = vadd.f32 1e-12, %v1498_v44 }
 0xb72   :  { %3921 = vrsqrt.f32 %v1502_v9 }
 0xb76   :  { %v3916_v10 = vpop.eup %3915 }
 0xb77   :  { %v1507_v12 = vmul.f32 %v3916_v10, %v4979_v53 }
 0xb78   :  { %v3918_v1 = vpop.eup %3917 }
 0xb79   :  { %v1508_v45 = vmul.f32 %v3918_v1, %v4984_v57  ;;  %v1517_v46 = vmul.f32 %v3138_v26, %v1507_v12 }
 0xb7a   :  { %v3920_v47 = vpop.eup %3919 }
 0xb7b   :  { %v1509_v19 = vmul.f32 %v3920_v47, %v4989_v60  ;;  %v1518_v49 = vmul.f32 %v3138_v26, %v1508_v45  ;;  %v5059_v54 = vadd.f32 %v3139_v48, %v1517_v46  ;;  %v3172_v60 = vld [vmem:[%s5367_s4 + $0x3] sm:$0x7] }
 0xb7c   :  { %v3922_v50 = vpop.eup %3921  ;;  %v1572_v61 = vrot.slane %v3172_v60, %v378_v30  ;;  %v1576_v63 = vrot.slane %v3172_v60, %v382_v32 }
 0xb7d   :  { %v1510_v52 = vmul.f32 %v3922_v50, %v4994_v62  ;;  %v5061_v55 = vadd.f32 %v3139_v48, %v1518_v49  ;;  %v1519_v22 = vmul.f32 %v3138_v26, %v1509_v19 }
 0xb7f   :  { %v1566_v53 = vpack.c.bf16 %v5061_v55, %v5059_v54  ;;  %v1520_v56 = vmul.f32 %v3138_v26, %v1510_v52  ;;  %v5065_v57 = vadd.f32 %v3139_v48, %v1519_v22 }
 0xb81   :  { %1745 = vmatmul.mubr.bf16.vlgmr.msra.gmra.mrb[16].mxu0 %v1566_v53  ;;  %3548 = vmatprep.mubr.bf16.mxu1 %v1566_v53  ;;  %v5067_v58 = vadd.f32 %v3139_v48, %v1520_v56 }
 0xb82   :  { %1754 = vmatprep.mubr.bf16.mxu0 %v4330_v51  ;;  %v1580_v51 = vrot.slane %v3172_v60, %v386_v34 }
 0xb83   :  { %v1567_v59 = vpack.c.bf16 %v5067_v58, %v5065_v57 }
 0xb85   :  { %3549 = vmatmul.mubr.bf16.vlgmr.msra.gmra.mrb[20].mxu1 %v1567_v59 }
 0xb89   :  { %1755 = vmatmul.mubr.bf16.gmra.mrb[20].mxu0 %v1567_v59 }
 0xc54   :  { %v1746_v62 = vpop.f32.mrb[16].mxu0 }
 0xc55   :  { %v1747_v4 = vadd.f32 %v1746_v62, %v1572_v61  ;;  %v1748_v5 = vpop.f32.mrb[17].mxu0 }
 0xc56   :  { %v1750_v6 = vpop.f32.mrb[18].mxu0  ;;  %v1749_v11 = vadd.f32 %v1748_v5, %v1576_v63 }
 0xc57   :  { %v1751_v7 = vadd.f32 %v1750_v6, %v1572_v61  ;;  %v1752_v8 = vpop.f32.mrb[19].mxu0  ;;  %v1814_v28 = vmul.f32 %v4797_v39, %v1747_v4  ;;  %v1931_v32 = vmul.f32 %v4800_v41, %v1747_v4 }
 0xc58   :  { %v1753_v20 = vadd.f32 %v1752_v8, %v1576_v63  ;;  %v3550_v21 = vpop.f32.mrb[20].mxu1 }
 0xc59   :  { %v1815_v13 = vmul.f32 %v4797_v39, %v1751_v7  ;;  %v1932_v30 = vmul.f32 %v4800_v41, %v1751_v7  ;;  %v1808_v14 = vadd.f32 %v3550_v21, %v1580_v51  ;;  %v1799_v15 = vpop.f32.mrb[21].mxu1  ;;  %v3983_v7 = vld [vmem:[%s5368_s13] sm:$0xff]  ;;  %v3984_v21 = vld [vmem:[%s5368_s13 + $0x8] sm:$0xff] }
 0xc5a   :  { %v1820_v16 = vpack.c.bf16 %v1753_v20, %v1749_v11  ;;  %v1800_v17 = vadd.f32 %v1799_v15, %v1580_v51  ;;  %v3551_v29 = vpop.f32.mrb[22].mxu1 }
 0xc5b   :  { %v1811_v34 = vadd.f32 %v3551_v29, %v1580_v51  ;;  %v1802_v18 = vpop.f32.mrb[23].mxu1  ;;  %v1818_v23 = vpack.c.bf16 %v1815_v13, %v1814_v28  ;;  %v1927_v24 = vmul.f32 %v4797_v39, %v1808_v14  ;;  %v2042_v25 = vmul.f32 %v4800_v41, %v1808_v14  ;;  %v3985_v13 = vld [vmem:[%s5368_s13 + $0x10] sm:$0xff] }
 0xc5c   :  { %v1803_v27 = vadd.f32 %v1802_v18, %v1580_v51  ;;  %v1756_v35 = vpop.f32.mrb[20].mxu0  ;;  %3552 = vmatprep.subr.bf16.mxu0 %v1820_v16  ;;  %v1935_v0 = vpack.c.bf16 %v1932_v30, %v1931_v32  ;;  %v1925_v37 = vmul.f32 %v4797_v39, %v1800_v17  ;;  %v2040_v40 = vmul.f32 %v4800_v41, %v1800_v17  ;;  %v3986_v32 = vld [vmem:[%s5368_s13 + $0x18] sm:$0xff] }
 0xc5d   :  { %v1928_v36 = vmul.f32 %v4797_v39, %v1811_v34  ;;  %v2043_v38 = vmul.f32 %v4800_v41, %v1811_v34  ;;  %v1757_v31 = vadd.f32 %v1756_v35, %v1572_v61  ;;  %v1758_v33 = vpop.f32.mrb[21].mxu0  ;;  %3553 = vmatpush3.bf16.xpose.msra.mxu0 %v1820_v16  ;;  %3556 = vmatprep.mubr.bf16.mxu0 %v1818_v23 }
 0xc5e   :  { %v1926_v42 = vmul.f32 %v4797_v39, %v1803_v27  ;;  %v2041_v43 = vmul.f32 %v4800_v41, %v1803_v27  ;;  %v1760_v44 = vpop.f32.mrb[22].mxu0  ;;  %v1759_v9 = vadd.f32 %v1758_v33, %v1576_v63 }
 0xc5f   :  { %v1761_v10 = vadd.f32 %v1760_v44, %v1572_v61  ;;  %v1762_v26 = vpop.f32.mrb[23].mxu0  ;;  %v2045_v12 = vpack.c.bf16 %v2043_v38, %v2042_v25  ;;  %v5095_v47 = vpack.c.bf16 %v1928_v36, %v1927_v24  ;;  %v1816_v48 = vmul.f32 %v4797_v39, %v1757_v31 }
 0xc60   :  { %v1763_v1 = vadd.f32 %v1762_v26, %v1576_v63  ;;  %v2044_v45 = vpack.c.bf16 %v2041_v43, %v2040_v40  ;;  %v5093_v46 = vpack.c.bf16 %v1926_v42, %v1925_v37  ;;  %v1933_v19 = vmul.f32 %v4800_v41, %v1757_v31 }
 0xc61   :  { %v1817_v49 = vmul.f32 %v4797_v39, %v1761_v10  ;;  %v1934_v50 = vmul.f32 %v4800_v41, %v1761_v10 }
 0xc62   :  { %v1821_v52 = vpack.c.bf16 %v1763_v1, %v1759_v9  ;;  %3568 = vmatprep.subr.bf16.mxu1 %v2044_v45 }
 0xc63   :  { %v1819_v22 = vpack.c.bf16 %v1817_v49, %v1816_v48  ;;  %v1936_v53 = vpack.c.bf16 %v1934_v50, %v1933_v19  ;;  %3569 = vmatpush3.bf16.msra.mxu1 %v2044_v45 }
 0xc64   :  { %3554 = vmatprep.subr.bf16.mxu0 %v1821_v52  ;;  %3570 = vmatprep.subr.bf16.mxu1 %v2045_v12 }
 0xc65   :  { %3555 = vmatpush3.bf16.xpose.msra.mxu0 %v1821_v52 }
 0xc66   :  { %3560 = vmatprep.subr.bf16.mxu0 %v1820_v16 }
 0xc67   :  { %3571 = vmatpush3.bf16.msra.mxu1 %v2045_v12 }
 0xc68   :  { %3576 = vmatprep.subr.bf16.mxu1 %v5093_v46 }
 0xc6c   :  { %3557 = vmatmul.mubr.bf16.vlgmr.msra.gmra.mrb[24].mxu0 %v1819_v22 }
 0xc6d   :  { %3561 = vmatpush3.bf16.xpose.msra.mxu0 %v1820_v16  ;;  %3564 = vmatprep.mubr.bf16.mxu0 %v1935_v0 }
 0xc6e   :  { %3562 = vmatprep.subr.bf16.mxu0 %v1821_v52 }
 0xc75   :  { %3563 = vmatpush3.bf16.xpose.msra.mxu0 %v1821_v52 }
 0xc7c   :  { %3565 = vmatmul.mubr.bf16.vlgmr.msra.gmra.mrb[28].mxu0 %v1936_v53 }
 0xd3f   :  { %v3558_v39 = vpop.f32.mrb[24].mxu0 }
 0xd40   :  { %v1856_v41 = vpop.f32.mrb[25].mxu0  ;;  %v1873_v17 = vmul.f32 0.25, %v3558_v39 }
 0xd41   :  { %v3559_v56 = vpop.f32.mrb[26].mxu0  ;;  %v1871_v11 = vmul.f32 0.25, %v1856_v41 }
 0xd42   :  { %v1859_v59 = vpop.f32.mrb[27].mxu0  ;;  %v1874_v18 = vmul.f32 0.25, %v3559_v56  ;;  %v1877_v27 = vadd.f32 %v3985_v13, %v1873_v17  ;;  %v3823_v17 = vld [vmem:[%s5369_s19 + $0x60] sm:$0xff]  }
 0xd43   :  { %v1872_v14 = vmul.f32 0.25, %v1859_v59  ;;  %v1875_v34 = vadd.f32 %v3983_v7, %v1871_v11 }
 0xd44   :  { %v1878_v0 = vadd.f32 %v3986_v32, %v1874_v18  ;;  %v1885_v36 = vsel %vm691_vm4, %v1877_v27, -inf }
 0xd45   :  { %v1876_v24 = vadd.f32 %v3984_v21, %v1872_v14  ;;  %v1879_v25 = vsel %vm691_vm4, %v1875_v34, -inf  ;;  %v3819_v14 = vld [vmem:[%s5369_s19 + $0x40] sm:$0xff]  }
 0xd46   :  { %v1888_v38 = vsel %vm691_vm4, %v1878_v0, -inf  ;;  %3584 = vmatprep.subr.bf16.mxu0 %v3819_v14 }
 0xd47   :  { %v1882_v35 = vsel %vm691_vm4, %v1876_v24, -inf  ;;  %3585 = vmatpush3.bf16.msra.mxu0 %v3819_v14 }
 0xd4f   :  { %v3566_v60 = vpop.f32.mrb[28].mxu0 }
 0xd50   :  { %v1971_v61 = vpop.f32.mrb[29].mxu0  ;;  %v1988_v62 = vmul.f32 0.25, %v3566_v60 }
 0xd51   :  { %v1986_v63 = vmul.f32 0.25, %v1971_v61  ;;  %v3567_v4 = vpop.f32.mrb[30].mxu0 }
 0xd52   :  { %v1974_v5 = vpop.f32.mrb[31].mxu0  ;;  %v1989_v51 = vmul.f32 0.25, %v3567_v4  ;;  %v1992_v30 = vadd.f32 %v3985_v13, %v1988_v62 }
 0xd53   :  { %v1987_v6 = vmul.f32 0.25, %v1974_v5  ;;  %v1990_v8 = vadd.f32 %v3983_v7, %v1986_v63 }
 0xd54   :  { %v1993_v16 = vadd.f32 %v3986_v32, %v1989_v51  ;;  %v2000_v29 = vsel %vm691_vm4, %v1992_v30, -inf  ;;  %v3821_v32 = vld [vmem:[%s5369_s19 + $0x50] sm:$0xff]  }
 0xd55   :  { %v1994_v20 = vsel %vm691_vm4, %v1990_v8, -inf  ;;  %v1991_v28 = vadd.f32 %v3984_v21, %v1987_v6 }
 0xd56   :  { %1995 = vmax.xlane.f32.xlu0 %v1994_v20  ;;  %v2003_v23 = vsel %vm691_vm4, %v1993_v16, -inf }
 0xd57   :  { %v1997_v15 = vsel %vm691_vm4, %v1991_v28, -inf }
 0xd58   :  { %1998 = vmax.xlane.f32.xlu1 %v1997_v15  ;;  %v3820_v15 = vld [vmem:[%s5369_s19 + $0x48] sm:$0xff]  }
 0xd59   :  { %3586 = vmatprep.subr.bf16.mxu0 %v3820_v15 }
 0xd5a   :  { %2001 = vmax.xlane.f32.xlu0 %v2000_v29  ;;  %3587 = vmatpush3.bf16.msra.mxu0 %v3820_v15  ;;  %v3824_v29 = vld [vmem:[%s5369_s19 + $0x68] sm:$0xff]  }
 0xd5b   :  { %3588 = vmatprep.subr.bf16.mxu0 %v3821_v32 }
 0xd5c   :  { %2004 = vmax.xlane.f32.xlu1 %v2003_v23 }
 0xd5e   :  { %1880 = vmax.xlane.f32.xlu0 %v1879_v25  ;;  %3589 = vmatpush3.bf16.msra.mxu0 %v3821_v32 }
 0xd60   :  { %1883 = vmax.xlane.f32.xlu1 %v1882_v35 }
 0xd62   :  { %1886 = vmax.xlane.f32.xlu0 %v1885_v36 }
 0xd64   :  { %1889 = vmax.xlane.f32.xlu1 %v1888_v38 }
 0xde3   :  { %v1996_v31 = vpop.xlane.xlu0 %1995 }
 0xde4   :  { %v2006_v33 = vsub.f32 %v1990_v8, %v1996_v31 }
 0xde5   :  { %v1999_v37 = vpop.xlane.xlu1 %1998 }
 0xde6   :  { %v2010_v40 = vmul.f32 1.442695, %v2006_v33  ;;  %v2007_v42 = vsub.f32 %v1991_v28, %v1999_v37 }
 0xde7   :  { %v2002_v43 = vpop.xlane.xlu0 %2001 }
 0xde8   :  { %3923 = vpow2.f32 %v2010_v40  ;;  %v2012_v44 = vmul.f32 1.442695, %v2007_v42  ;;  %v2008_v9 = vsub.f32 %v1992_v30, %v2002_v43 }
 0xde9   :  { %v2005_v10 = vpop.xlane.xlu1 %2004 }
 0xdea   :  { %3925 = vpow2.f32 %v2012_v44  ;;  %v2014_v26 = vmul.f32 1.442695, %v2008_v9  ;;  %v2009_v12 = vsub.f32 %v1993_v16, %v2005_v10  ;;  %v3822_v16 = vld [vmem:[%s5369_s19 + $0x58] sm:$0xff]  }
 0xdeb   :  { %v1881_v1 = vpop.xlane.xlu0 %1880  ;;  %3590 = vmatprep.subr.bf16.mxu0 %v3822_v16 }
 0xdec   :  { %3927 = vpow2.f32 %v2014_v26  ;;  %v2016_v45 = vmul.f32 1.442695, %v2009_v12  ;;  %v1891_v48 = vsub.f32 %v1875_v34, %v1881_v1  ;;  %3591 = vmatpush3.bf16.msra.mxu0 %v3822_v16  ;;  %v3825_v34 = vld [vmem:[%s5369_s19 + $0x70] sm:$0xff]  }
 0xded   :  { %v1884_v19 = vpop.xlane.xlu1 %1883  ;;  %3592 = vmatprep.subr.bf16.mxu0 %v3823_v17 }
 0xdee   :  { %3929 = vpow2.f32 %v2016_v45  ;;  %v1895_v49 = vmul.f32 1.442695, %v1891_v48  ;;  %v1892_v50 = vsub.f32 %v1876_v24, %v1884_v19 }
 0xdef   :  { %v1887_v52 = vpop.xlane.xlu0 %1886 }
 0xdf0   :  { %3931 = vpow2.f32 %v1895_v49  ;;  %v1897_v22 = vmul.f32 1.442695, %v1892_v50  ;;  %v1893_v53 = vsub.f32 %v1877_v27, %v1887_v52  ;;  %3593 = vmatpush3.bf16.msra.mxu0 %v3823_v17 }
 0xdf1   :  { %v1890_v39 = vpop.xlane.xlu1 %1889  ;;  %3594 = vmatprep.subr.bf16.mxu0 %v3824_v29 }
 0xdf2   :  { %v5122_v41 = vpop.eup %3923  ;;  %3933 = vpow2.f32 %v1897_v22  ;;  %v1899_v56 = vmul.f32 1.442695, %v1893_v53  ;;  %v1894_v59 = vsub.f32 %v1878_v0, %v1890_v39 }
 0xdf3   :  { %v2018_v60 = vsel %vm691_vm4, %v5122_v41, 0.0 }
 0xdf4   :  { %v5126_v61 = vpop.eup %3925  ;;  %3935 = vpow2.f32 %v1899_v56  ;;  %v1901_v62 = vmul.f32 1.442695, %v1894_v59  ;;  %2019 = vadd.xlane.f32.xlu0 %v2018_v60  ;;  %3595 = vmatpush3.bf16.msra.mxu0 %v3824_v29 }
 0xdf5   :  { %v2021_v63 = vsel %vm691_vm4, %v5126_v61, 0.0  ;;  %3596 = vmatprep.subr.bf16.mxu0 %v3825_v34 }
 0xdf6   :  { %v5130_v4 = vpop.eup %3927  ;;  %3937 = vpow2.f32 %v1901_v62  ;;  %2022 = vadd.xlane.f32.xlu1 %v2021_v63 }
 0xdf7   :  { %v2024_v5 = vsel %vm691_vm4, %v5130_v4, 0.0 }
 0xdf8   :  { %v3930_v51 = vpop.eup %3929  ;;  %2025 = vadd.xlane.f32.xlu0 %v2024_v5  ;;  %3597 = vmatpush3.bf16.msra.mxu0 %v3825_v34 }
 0xdf9   :  { %v2027_v6 = vsel %vm691_vm4, %v3930_v51, 0.0 }
 0xdfa   :  { %v5135_v7 = vpop.eup %3931  ;;  %2028 = vadd.xlane.f32.xlu1 %v2027_v6 }
 0xdfb   :  { %v1903_v8 = vsel %vm691_vm4, %v5135_v7, 0.0 }
 0xdfc   :  { %v3934_v11 = vpop.eup %3933  ;;  %1904 = vadd.xlane.f32.xlu0 %v1903_v8 }
 0xdfd   :  { %v1906_v20 = vsel %vm691_vm4, %v3934_v11, 0.0 }
 0xdfe   :  { %v5140_v21 = vpop.eup %3935  ;;  %1907 = vadd.xlane.f32.xlu1 %v1906_v20 }
 0xdff   :  { %v1909_v28 = vsel %vm691_vm4, %v5140_v21, 0.0 }
 0xe00   :  { %v5144_v13 = vpop.eup %3937  ;;  %1910 = vadd.xlane.f32.xlu0 %v1909_v28 }
 0xe01   :  { %v1912_v30 = vsel %vm691_vm4, %v5144_v13, 0.0 }
 0xe02   :  { %1913 = vadd.xlane.f32.xlu1 %v1912_v30 }
 0xe81   :  { %v2020_v18 = vpop.xlane.xlu0 %2019 }
 0xe82   :  { %3939 = vrcp.f32 %v2020_v18 }
 0xe83   :  { %v2023_v23 = vpop.xlane.xlu1 %2022 }
 0xe84   :  { %3941 = vrcp.f32 %v2023_v23 }
 0xe85   :  { %v2026_v24 = vpop.xlane.xlu0 %2025 }
 0xe86   :  { %3943 = vrcp.f32 %v2026_v24 }
 0xe87   :  { %v2029_v25 = vpop.xlane.xlu1 %2028 }
 0xe88   :  { %3945 = vrcp.f32 %v2029_v25 }
 0xe89   :  { %v1905_v27 = vpop.xlane.xlu0 %1904 }
 0xe8a   :  { %3947 = vrcp.f32 %v1905_v27 }
 0xe8b   :  { %v1908_v35 = vpop.xlane.xlu1 %1907 }
 0xe8c   :  { %v3940_v0 = vpop.eup %3939  ;;  %3949 = vrcp.f32 %v1908_v35 }
 0xe8d   :  { %v1911_v38 = vpop.xlane.xlu0 %1910  ;;  %v2034_v33 = vmul.f32 %v3940_v0, %v5122_v41 }
 0xe8e   :  { %v3942_v36 = vpop.eup %3941 }
 0xe8f   :  { %v1914_v31 = vpop.xlane.xlu1 %1913  ;;  %v2035_v37 = vmul.f32 %v3942_v36, %v5126_v61 }
 0xe90   :  { %v3944_v40 = vpop.eup %3943  ;;  %3951 = vrcp.f32 %v1914_v31 }
 0xe91   :  { %v2038_v42 = vpack.c.bf16 %v2035_v37, %v2034_v33  ;;  %3953 = vrcp.f32 %v1911_v38  ;;  %v2036_v44 = vmul.f32 %v3944_v40, %v5130_v4  ;;  %v3828_v37 = vld [vmem:[%s5335_s11 + $0x48] sm:$0xff]   ;;  %v3829_v40 = vld [vmem:[%s5335_s11 + $0x50] sm:$0xff]  }
 0xe92   :  { %v3946_v43 = vpop.eup %3945 }
 0xe93   :  { %v2037_v9 = vmul.f32 %v3946_v43, %v3930_v51  ;;  %3572 = vmatprep.mubr.msk.bf16.mxu1 %vm691_vm4, %v2038_v42  ;;  %v3830_v42 = vld [vmem:[%s5335_s11 + $0x58] sm:$0xff]   ;;  %v3831_v43 = vld [vmem:[%s5335_s11 + $0x60] sm:$0xff]  }
 0xe94   :  { %v3948_v10 = vpop.eup %3947 }
 0xe95   :  { %v2039_v26 = vpack.c.bf16 %v2037_v9, %v2036_v44  ;;  %v1919_v1 = vmul.f32 %v3948_v10, %v5135_v7  ;;  %v3832_v44 = vld [vmem:[%s5335_s11 + $0x68] sm:$0xff]   ;;  %v3833_v9 = vld [vmem:[%s5335_s11 + $0x70] sm:$0xff]   ;;  %v3834_v10 = vld [vmem:[%s5335_s11 + $0x78] sm:$0xff]  }
 0xe96   :  { %v3950_v12 = vpop.eup %3949 }
 0xe97   :  { %3573 = vmatmul.mubr.msk.bf16.vlgmr.msra.gmra.mrb[24].mxu1 %vm691_vm4, %v2039_v26  ;;  %v1920_v45 = vmul.f32 %v3950_v12, %v3934_v11 }
 0xe98   :  { %3577 = vmatpush3.bf16.msra.mxu1 %v5093_v46  ;;  %v3826_v46 = vld [vmem:[%s5369_s19 + $0x78] sm:$0xff]  }
 0xe99   :  { %3578 = vmatprep.subr.bf16.mxu1 %v5095_v47  ;;  %v1923_v48 = vpack.c.bf16 %v1920_v45, %v1919_v1  ;;  %3598 = vmatprep.subr.bf16.mxu0 %v3826_v46 }
 0xe9a   :  { %v3952_v19 = vpop.eup %3951  ;;  %3599 = vmatpush3.bf16.msra.mxu0 %v3826_v46 }
 0xe9b   :  { %3580 = vmatprep.mubr.msk.bf16.mxu1 %vm691_vm4, %v1923_v48  ;;  %v3954_v49 = vpop.eup %3953  ;;  %v1922_v50 = vmul.f32 %v3952_v19, %v5144_v13 }
 0xe9c   :  { %3579 = vmatpush3.bf16.msra.mxu1 %v5095_v47  ;;  %v1921_v52 = vmul.f32 %v3954_v49, %v5140_v21  ;;  %v3217_v47 = vld [vmem:[#allocation6 + $0x1] ss:$0 sm:$0xff] }
 0xe9e   :  { %v1924_v22 = vpack.c.bf16 %v1922_v50, %v1921_v52 }
 0xea3   :  { %3581 = vmatmul.mubr.msk.bf16.vlgmr.msra.gmra.mrb[24].mxu1 %vm691_vm4, %v1924_v22 }
 0xf76   :  { %v3582_v53 = vpop.f32.mrb[24].mxu1 }
 0xf77   :  { %v2141_v39 = vpop.f32.mrb[25].mxu1 }
 0xf78   :  { %v3583_v41 = vpop.f32.mrb[26].mxu1 }
 0xf79   :  { %v2176_v56 = vpack.c.bf16 %v3583_v41, %v3582_v53  ;;  %v2144_v59 = vpop.f32.mrb[27].mxu1  ;;  %v3226_v41 = vld [vmem:[#allocation7 + $0x1] ss:$0 sm:$0xff] }
 0xf7a   :  { %v2175_v60 = vpack.c.bf16 %v2144_v59, %v2141_v39 }
 0xf7c   :  { %3600 = vmatprep.mubr.bf16.mxu0 %v2175_v60 }
 0xf7d   :  { %3601 = vmatmul.mubr.bf16.vlgmr.msra.gmra.mrb[32].mxu0 %v2176_v56 }
0x1050   :  { %v3602_v61 = vpop.f32.mrb[32].mxu0 }
0x1051   :  { %v2265_v62 = vpop.f32.mrb[33].mxu0  ;;  %v2274_v63 = vadd.f32 %v3602_v61, %v3217_v47 }
0x1052   :  { %v2266_v4 = vadd.f32 %v3217_v47, %v2265_v62  ;;  %v3603_v5 = vpop.f32.mrb[34].mxu0  ;;  %v3227_v62 = vld [vmem:[#allocation9 + $0x1] ss:$0 sm:$0xff] }
0x1053   :  { %v2268_v51 = vpop.f32.mrb[35].mxu0  ;;  %v2277_v7 = vadd.f32 %v3603_v5, %v3217_v47  ;;  %v2282_v11 = vadd.f32 %v2274_v63, %v5065_v57 }
0x1054   :  { %v2280_v6 = vadd.f32 %v2266_v4, %v5059_v54  ;;  %v2269_v8 = vadd.f32 %v3217_v47, %v2268_v51  ;;  %v3827_v54 = vld [vmem:[%s5335_s11 + $0x40] sm:$0xff]  }
0x1055   :  { %v2283_v28 = vadd.f32 %v2277_v7, %v5067_v58  ;;  %v2290_v30 = vmul.f32 %v4649_v3, %v2282_v11  ;;  %3604 = vmatprep.subr.bf16.mxu1 %v3827_v54 }
0x1056   :  { %v2281_v20 = vadd.f32 %v2269_v8, %v5061_v55  ;;  %v2288_v21 = vmul.f32 %v4649_v3, %v2280_v6  ;;  %3605 = vmatpush3.bf16.msra.mxu1 %v3827_v54  ;;  %v3837_v54 = vld [vmem:[#allocation12 + $0x50] sm:$0xff]  }
0x1057   :  { %v2291_v14 = vmul.f32 %v4649_v3, %v2283_v28  ;;  %3606 = vmatprep.subr.bf16.mxu1 %v3828_v37 }
0x1058   :  { %2292 = vadd.xlane.f32.xlu0 %v2288_v21  ;;  %v2289_v13 = vmul.f32 %v4649_v3, %v2281_v20 }
0x105a   :  { %2294 = vadd.xlane.f32.xlu1 %v2289_v13  ;;  %3607 = vmatpush3.bf16.msra.mxu1 %v3828_v37 }
0x105b   :  { %3608 = vmatprep.subr.bf16.mxu1 %v3829_v40 }
0x105c   :  { %2296 = vadd.xlane.f32.xlu0 %v2290_v30 }
0x105e   :  { %2298 = vadd.xlane.f32.xlu1 %v2291_v14  ;;  %3609 = vmatpush3.bf16.msra.mxu1 %v3829_v40 }
0x105f   :  { %3610 = vmatprep.subr.bf16.mxu1 %v3830_v42 }
0x1062   :  { %3611 = vmatpush3.bf16.msra.mxu1 %v3830_v42 }
0x1063   :  { %3612 = vmatprep.subr.bf16.mxu1 %v3831_v43 }
0x1066   :  { %3613 = vmatpush3.bf16.msra.mxu1 %v3831_v43 }
0x1067   :  { %3614 = vmatprep.subr.bf16.mxu1 %v3832_v44 }
0x106a   :  { %3615 = vmatpush3.bf16.msra.mxu1 %v3832_v44 }
0x106b   :  { %3616 = vmatprep.subr.bf16.mxu1 %v3833_v9 }
0x106e   :  { %3617 = vmatpush3.bf16.msra.mxu1 %v3833_v9 }
0x106f   :  { %3618 = vmatprep.subr.bf16.mxu1 %v3834_v10 }
0x1072   :  { %3619 = vmatpush3.bf16.msra.mxu1 %v3834_v10 }
0x10e5   :  { %v2293_v55 = vpop.xlane.xlu0 %2292 }
0x10e6   :  { %v2300_v57 = vmul.f32 0.03125, %v2293_v55  ;;  %v3838_v55 = vld [vmem:[#allocation12 + $0x58] sm:$0xff]  }
0x10e7   :  { %v2295_v15 = vpop.xlane.xlu1 %2294 }
0x10e8   :  { %v2304_v58 = vsub.f32 %v2288_v21, %v2300_v57  ;;  %v2301_v32 = vmul.f32 0.03125, %v2295_v15  ;;  %v3839_v57 = vld [vmem:[#allocation12 + $0x60] sm:$0xff]   ;;  %v3840_v15 = vld [vmem:[#allocation12 + $0x68] sm:$0xff]  }
0x10e9   :  { %v2297_v16 = vpop.xlane.xlu0 %2296 }
0x10ea   :  { %v2305_v17 = vsub.f32 %v2289_v13, %v2301_v32  ;;  %v2302_v29 = vmul.f32 0.03125, %v2297_v16  ;;  %v2308_v34 = vmul.f32 %v4649_v3, %v2304_v58  ;;  %v3841_v58 = vld [vmem:[#allocation12 + $0x70] sm:$0xff]   ;;  %v3842_v32 = vld [vmem:[#allocation12 + $0x78] sm:$0xff]  }
0x10eb   :  { %v2299_v18 = vpop.xlane.xlu1 %2298  ;;  %v3244_v16 = vld [vmem:[#allocation10 + $0x1] ss:$0 sm:$0xff] }
0x10ec   :  { %v2306_v23 = vsub.f32 %v2290_v30, %v2302_v29  ;;  %v2303_v24 = vmul.f32 0.03125, %v2299_v18  ;;  %v2312_v25 = vmul.f32 %v2308_v34, %v2308_v34  ;;  %v2309_v27 = vmul.f32 %v4649_v3, %v2305_v17  ;;  %v3835_v30 = vld [vmem:[#allocation12 + $0x40] sm:$0xff]  }
0x10ed   :  { %3624 = vmatprep.subr.bf16.mxu0 %v3835_v30 }
0x10ee   :  { %v2307_v35 = vsub.f32 %v2291_v14, %v2303_v24  ;;  %2316 = vadd.xlane.f32.xlu0 %v2312_v25  ;;  %v2313_v0 = vmul.f32 %v2309_v27, %v2309_v27  ;;  %v2310_v36 = vmul.f32 %v4649_v3, %v2306_v23  ;;  %3625 = vmatpush3.bf16.msra.mxu0 %v3835_v30  ;;  %v3836_v14 = vld [vmem:[#allocation12 + $0x48] sm:$0xff]  }
0x10ef   :  { %3626 = vmatprep.subr.bf16.mxu0 %v3836_v14 }
0x10f0   :  { %2318 = vadd.xlane.f32.xlu1 %v2313_v0  ;;  %v2314_v38 = vmul.f32 %v2310_v36, %v2310_v36  ;;  %v2311_v31 = vmul.f32 %v4649_v3, %v2307_v35 }
0x10f2   :  { %2320 = vadd.xlane.f32.xlu0 %v2314_v38  ;;  %v2315_v33 = vmul.f32 %v2311_v31, %v2311_v31  ;;  %3627 = vmatpush3.bf16.msra.mxu0 %v3836_v14 }
0x10f3   :  { %3628 = vmatprep.subr.bf16.mxu0 %v3837_v54 }
0x10f4   :  { %2322 = vadd.xlane.f32.xlu1 %v2315_v33 }
0x10f6   :  { %3629 = vmatpush3.bf16.msra.mxu0 %v3837_v54 }
0x10f7   :  { %3630 = vmatprep.subr.bf16.mxu0 %v3838_v55 }
0x10fa   :  { %3631 = vmatpush3.bf16.msra.mxu0 %v3838_v55 }
0x10fb   :  { %3632 = vmatprep.subr.bf16.mxu0 %v3839_v57 }
0x10fe   :  { %3633 = vmatpush3.bf16.msra.mxu0 %v3839_v57 }
0x10ff   :  { %3634 = vmatprep.subr.bf16.mxu0 %v3840_v15 }
0x1102   :  { %3635 = vmatpush3.bf16.msra.mxu0 %v3840_v15 }
0x1103   :  { %3636 = vmatprep.subr.bf16.mxu0 %v3841_v58 }
0x1106   :  { %3637 = vmatpush3.bf16.msra.mxu0 %v3841_v58 }
0x1107   :  { %3638 = vmatprep.subr.bf16.mxu0 %v3842_v32 }
0x110a   :  { %3639 = vmatpush3.bf16.msra.mxu0 %v3842_v32 }
0x110b   :  { %3675 = vmatprep.subr.bf16.mxu0 %v4329_v2 }
0x117b   :  { %v2317_v26 = vpop.xlane.xlu0 %2316 }
0x117c   :  { %v2324_v12 = vmul.f32 0.03125, %v2317_v26 }
0x117d   :  { %v2319_v1 = vpop.xlane.xlu1 %2318 }
0x117e   :  { %v2328_v45 = vadd.f32 1e-12, %v2324_v12  ;;  %v2325_v48 = vmul.f32 0.03125, %v2319_v1 }
0x117f   :  { %v2321_v19 = vpop.xlane.xlu0 %2320 }
0x1180   :  { %3955 = vrsqrt.f32 %v2328_v45  ;;  %v2329_v49 = vadd.f32 1e-12, %v2325_v48  ;;  %v2326_v50 = vmul.f32 0.03125, %v2321_v19 }
0x1181   :  { %v2323_v52 = vpop.xlane.xlu1 %2322 }
0x1182   :  { %3957 = vrsqrt.f32 %v2329_v49  ;;  %v2330_v22 = vadd.f32 1e-12, %v2326_v50  ;;  %v2327_v46 = vmul.f32 0.03125, %v2323_v52 }
0x1184   :  { %3959 = vrsqrt.f32 %v2330_v22  ;;  %v2331_v53 = vadd.f32 1e-12, %v2327_v46 }
0x1186   :  { %3961 = vrsqrt.f32 %v2331_v53 }
0x118a   :  { %v3956_v39 = vpop.eup %3955 }
0x118b   :  { %v2336_v56 = vmul.f32 %v3956_v39, %v2308_v34 }
0x118c   :  { %v3958_v59 = vpop.eup %3957 }
0x118d   :  { %v2337_v60 = vmul.f32 %v3958_v59, %v2309_v27  ;;  %v2346_v47 = vmul.f32 %v3226_v41, %v2336_v56 }
0x118e   :  { %v3960_v61 = vpop.eup %3959 }
0x118f   :  { %v2338_v63 = vmul.f32 %v3960_v61, %v2310_v36  ;;  %v2347_v4 = vmul.f32 %v3226_v41, %v2337_v60  ;;  %v5221_v6 = vadd.f32 %v3227_v62, %v2346_v47 }
0x1190   :  { %v3962_v5 = vpop.eup %3961 }
0x1191   :  { %v2339_v51 = vmul.f32 %v3962_v5, %v2311_v31  ;;  %v5223_v7 = vadd.f32 %v3227_v62, %v2347_v4  ;;  %v2348_v8 = vmul.f32 %v3226_v41, %v2338_v63 }
0x1193   :  { %v2379_v11 = vpack.c.bf16 %v5223_v7, %v5221_v6  ;;  %v2349_v20 = vmul.f32 %v3226_v41, %v2339_v51  ;;  %v5227_v21 = vadd.f32 %v3227_v62, %v2348_v8 }
0x1195   :  { %3620 = vmatprep.mubr.bf16.mxu1 %v2379_v11  ;;  %v5229_v28 = vadd.f32 %v3227_v62, %v2349_v20  ;;  %v3253_v11 = vld [vmem:[#allocation13 + $0x1] ss:$0 sm:$0xff] }
0x1197   :  { %v2380_v13 = vpack.c.bf16 %v5229_v28, %v5227_v21 }
0x1199   :  { %3621 = vmatmul.mubr.bf16.vlgmr.msra.gmra.mrb[28].mxu1 %v2380_v13 }
0x119a   :  { %3652 = vmatprep.mubr.msk.f32.mxu1 %vm4332_vm5, %v4329_v2 }
0x126c   :  { %v3622_v17 = vpop.f32.mrb[28].mxu1 }
0x126d   :  { %v2478_v29 = vadd.f32 %v3622_v17, %v3244_v16  ;;  %v2469_v34 = vpop.f32.mrb[29].mxu1 }
0x126e   :  { %v2470_v18 = vadd.f32 %v3244_v16, %v2469_v34  ;;  %v3623_v23 = vpop.f32.mrb[30].mxu1 }
0x126f   :  { %v2486_v24 = vmul.f32 %v2478_v29, %v2478_v29  ;;  %v2481_v25 = vadd.f32 %v3623_v23, %v3244_v16  ;;  %v2472_v27 = vpop.f32.mrb[31].mxu1 }
0x1270   :  { %v2484_v35 = vmul.f32 %v2470_v18, %v2470_v18  ;;  %v2473_v0 = vadd.f32 %v3244_v16, %v2472_v27 }
0x1271   :  { %v2490_v36 = vmul.f32 %v2486_v24, %v2478_v29  ;;  %v2487_v38 = vmul.f32 %v2481_v25, %v2481_v25 }
0x1272   :  { %v2488_v31 = vmul.f32 %v2484_v35, %v2470_v18  ;;  %v2485_v33 = vmul.f32 %v2473_v0, %v2473_v0 }
0x1273   :  { %v2494_v37 = vmul.f32 0.044715, %v2490_v36  ;;  %v2491_v40 = vmul.f32 %v2487_v38, %v2481_v25 }
0x1274   :  { %v2492_v42 = vmul.f32 0.044715, %v2488_v31  ;;  %v2489_v43 = vmul.f32 %v2485_v33, %v2473_v0 }
0x1275   :  { %v2498_v44 = vadd.f32 %v2494_v37, %v2478_v29  ;;  %v2495_v9 = vmul.f32 0.044715, %v2491_v40 }
0x1276   :  { %v2496_v10 = vadd.f32 %v2492_v42, %v2470_v18  ;;  %v2493_v26 = vmul.f32 0.044715, %v2489_v43 }
0x1277   :  { %v2502_v12 = vmul.f32 0.7978846, %v2498_v44  ;;  %v2499_v1 = vadd.f32 %v2495_v9, %v2481_v25 }
0x1278   :  { %v2500_v45 = vmul.f32 0.7978846, %v2496_v10  ;;  %v2497_v48 = vadd.f32 %v2493_v26, %v2473_v0  ;;  %v4331_v26 = vmov 0.0|0.0  }
0x1279   :  { %3963 = vtanh.f32 %v2502_v12  ;;  %v2503_v19 = vmul.f32 0.7978846, %v2499_v1  ;;  %3695 = vmatprep.subr.bf16.mxu1 %v4331_v26 }
0x127a   :  { %3965 = vtanh.f32 %v2500_v45  ;;  %v2501_v49 = vmul.f32 0.7978846, %v2497_v48 }
0x127b   :  { %3967 = vtanh.f32 %v2503_v19 }
0x127c   :  { %3969 = vtanh.f32 %v2501_v49 }
0x1283   :  { %v3964_v50 = vpop.eup %3963 }
0x1284   :  { %v3966_v52 = vpop.eup %3965  ;;  %v2510_v22 = vadd.f32 1.0, %v3964_v50 }
0x1285   :  { %v3968_v46 = vpop.eup %3967  ;;  %v2508_v53 = vadd.f32 1.0, %v3966_v52 }
0x1286   :  { %v3970_v39 = vpop.eup %3969  ;;  %v2514_v41 = vmul.f32 0.5, %v2510_v22  ;;  %v2511_v56 = vadd.f32 1.0, %v3968_v46 }
0x1287   :  { %v2509_v59 = vadd.f32 1.0, %v3970_v39  ;;  %v2512_v60 = vmul.f32 0.5, %v2508_v53 }
0x1288   :  { %v2515_v47 = vmul.f32 0.5, %v2511_v56  ;;  %v2518_v62 = vmul.f32 %v2514_v41, %v2478_v29  ;;  %v3262_v56 = vld [vmem:[#allocation15 + $0x1] ss:$0 sm:$0xff] }
0x1289   :  { %v2513_v61 = vmul.f32 0.5, %v2509_v59  ;;  %v2516_v4 = vmul.f32 %v2512_v60, %v2470_v18 }
0x128a   :  { %v2519_v63 = vmul.f32 %v2515_v47, %v2481_v25 }
0x128b   :  { %v2517_v5 = vmul.f32 %v2513_v61, %v2473_v0 }
0x128c   :  { %v2540_v51 = vpack.c.bf16 %v2519_v63, %v2518_v62  ;;  %v3263_v63 = vld [vmem:[#allocation16 + $0x1] ss:$0 sm:$0xff] }
0x128d   :  { %v2539_v8 = vpack.c.bf16 %v2517_v5, %v2516_v4 }
0x128f   :  { %3640 = vmatprep.mubr.bf16.mxu0 %v2539_v8 }
0x1290   :  { %3641 = vmatmul.mubr.bf16.vlgmr.msra.gmra.mrb[36].mxu0 %v2540_v51 }
0x1291   :  { %3691 = vmatprep.mubr.msk.bf16.mxu0 %vm4332_vm5, %v4329_v2 }
0x1363   :  { %v3642_v20 = vpop.f32.mrb[36].mxu0 }
0x1364   :  { %v2629_v13 = vpop.f32.mrb[37].mxu0  ;;  %v2638_v30 = vadd.f32 %v3642_v20, %v3253_v11 }
0x1365   :  { %v2630_v14 = vadd.f32 %v3253_v11, %v2629_v13  ;;  %v3643_v54 = vpop.f32.mrb[38].mxu0 }
0x1366   :  { %v2632_v55 = vpop.f32.mrb[39].mxu0  ;;  %v2641_v15 = vadd.f32 %v3643_v54, %v3253_v11  ;;  %v2646_v32 = vadd.f32 %v2638_v30, %v5227_v21 }
0x1367   :  { %v2644_v57 = vadd.f32 %v2630_v14, %v5221_v6  ;;  %v2633_v58 = vadd.f32 %v3253_v11, %v2632_v55 }
0x1368   :  { %v2647_v29 = vadd.f32 %v2641_v15, %v5229_v28  ;;  %v2654_v18 = vmul.f32 %v4649_v3, %v2646_v32  ;;  %v2724_v15 = vld [vmem:[%s5370_s6] sm:$0x3]  ;;  %v3844_v32 = vld [vmem:[%s5341_s17 + $0x8] sm:$0xff]  }
0x1369   :  { %v2645_v16 = vadd.f32 %v2633_v58, %v5223_v7  ;;  %v2652_v17 = vmul.f32 %v4649_v3, %v2644_v57  ;;  %v3843_v58 = vld [vmem:[%s5341_s17] sm:$0xff]  }
0x136a   :  { %v2655_v23 = vmul.f32 %v4649_v3, %v2647_v29  ;;  %v3847_v29 = vld [vmem:[%s5341_s17 + $0x20] sm:$0xff]  }
0x136b   :  { %2656 = vadd.xlane.f32.xlu0 %v2652_v17  ;;  %v2653_v34 = vmul.f32 %v4649_v3, %v2645_v16  ;;  %v3845_v16 = vld [vmem:[%s5341_s17 + $0x10] sm:$0xff]  }
0x136d   :  { %2658 = vadd.xlane.f32.xlu1 %v2653_v34 }
0x136f   :  { %2660 = vadd.xlane.f32.xlu0 %v2654_v18 }
0x1371   :  { %2662 = vadd.xlane.f32.xlu1 %v2655_v23 }
0x13f8   :  { %v2657_v6 = vpop.xlane.xlu0 %2656 }
0x13f9   :  { %v2664_v24 = vmul.f32 0.03125, %v2657_v6 }
0x13fa   :  { %v2659_v25 = vpop.xlane.xlu1 %2658 }
0x13fb   :  { %v2668_v21 = vsub.f32 %v2652_v17, %v2664_v24  ;;  %v2665_v27 = vmul.f32 0.03125, %v2659_v25  ;;  %v3846_v17 = vld [vmem:[%s5341_s17 + $0x18] sm:$0xff]  }
0x13fc   :  { %v2661_v7 = vpop.xlane.xlu0 %2660 }
0x13fd   :  { %v2669_v35 = vsub.f32 %v2653_v34, %v2665_v27  ;;  %v2666_v0 = vmul.f32 0.03125, %v2661_v7  ;;  %v2672_v28 = vmul.f32 %v4649_v3, %v2668_v21  ;;  %v3848_v34 = vld [vmem:[%s5341_s17 + $0x28] sm:$0xff]   ;;  %v3265_v21 = vld [vmem:[#allocation18] ss:$0 sm:$0xff] }
0x13fe   :  { %v2663_v36 = vpop.xlane.xlu1 %2662 }
0x13ff   :  { %v2670_v38 = vsub.f32 %v2654_v18, %v2666_v0  ;;  %v2667_v31 = vmul.f32 0.03125, %v2663_v36  ;;  %v2676_v33 = vmul.f32 %v2672_v28, %v2672_v28  ;;  %v2673_v37 = vmul.f32 %v4649_v3, %v2669_v35  ;;  %v3849_v18 = vld [vmem:[%s5341_s17 + $0x30] sm:$0xff]  }
0x1401   :  { %v2671_v40 = vsub.f32 %v2655_v23, %v2667_v31  ;;  %2680 = vadd.xlane.f32.xlu0 %v2676_v33  ;;  %v2677_v42 = vmul.f32 %v2673_v37, %v2673_v37  ;;  %v2674_v43 = vmul.f32 %v4649_v3, %v2670_v38  ;;  %v3850_v23 = vld [vmem:[%s5341_s17 + $0x38] sm:$0xff]  }
0x1403   :  { %2682 = vadd.xlane.f32.xlu1 %v2677_v42  ;;  %v2678_v44 = vmul.f32 %v2674_v43, %v2674_v43  ;;  %v2675_v9 = vmul.f32 %v4649_v3, %v2671_v40 }
0x1405   :  { %2684 = vadd.xlane.f32.xlu0 %v2678_v44  ;;  %v2679_v10 = vmul.f32 %v2675_v9, %v2675_v9 }
0x1407   :  { %2686 = vadd.xlane.f32.xlu1 %v2679_v10 }
0x148e   :  { %v2681_v12 = vpop.xlane.xlu0 %2680 }
0x148f   :  { %v2688_v1 = vmul.f32 0.03125, %v2681_v12  ;;  %v3852_v12 = vld [vmem:[%s5345_s21 + $0x8] sm:$0xff]  }
0x1490   :  { %v2683_v45 = vpop.xlane.xlu1 %2682 }
0x1491   :  { %v2692_v48 = vadd.f32 1e-12, %v2688_v1  ;;  %v2689_v19 = vmul.f32 0.03125, %v2683_v45 }
0x1492   :  { %v2685_v49 = vpop.xlane.xlu0 %2684 }
0x1493   :  { %3971 = vrsqrt.f32 %v2692_v48  ;;  %v2693_v50 = vadd.f32 1e-12, %v2689_v19  ;;  %v2690_v52 = vmul.f32 0.03125, %v2685_v49 }
0x1494   :  { %v2687_v22 = vpop.xlane.xlu1 %2686 }
0x1495   :  { %3973 = vrsqrt.f32 %v2693_v50  ;;  %v2694_v46 = vadd.f32 1e-12, %v2690_v52  ;;  %v2691_v53 = vmul.f32 0.03125, %v2687_v22  ;;  %v3853_v52 = vld [vmem:[%s5345_s21 + $0x10] sm:$0xff]   ;;  %v3854_v22 = vld [vmem:[%s5345_s21 + $0x18] sm:$0xff]  }
0x1497   :  { %3975 = vrsqrt.f32 %v2694_v46  ;;  %v2695_v39 = vadd.f32 1e-12, %v2691_v53  ;;  %v3856_v46 = vld [vmem:[%s5345_s21 + $0x28] sm:$0xff]   ;;  %v3857_v53 = vld [vmem:[%s5345_s21 + $0x30] sm:$0xff]  }
0x1499   :  { %3977 = vrsqrt.f32 %v2695_v39  ;;  %v3858_v39 = vld [vmem:[%s5345_s21 + $0x38] sm:$0xff]  }
0x149d   :  { %v3972_v41 = vpop.eup %3971 }
0x149e   :  { %v2700_v59 = vmul.f32 %v3972_v41, %v2672_v28 }
0x149f   :  { %v3974_v60 = vpop.eup %3973 }
0x14a0   :  { %v2701_v47 = vmul.f32 %v3974_v60, %v2673_v37  ;;  %v2710_v61 = vmul.f32 %v3262_v56, %v2700_v59 }
0x14a1   :  { %v3976_v62 = vpop.eup %3975 }
0x14a2   :  { %v2702_v4 = vmul.f32 %v3976_v62, %v2674_v43  ;;  %v2711_v5 = vmul.f32 %v3262_v56, %v2701_v47  ;;  %v2720_v11 = vadd.f32 %v3263_v63, %v2710_v61  ;;  %v3274_v47 = vld [vmem:[#allocation19] ss:$0 sm:$0xff]  ;;  %v3275_v62 = vld [vmem:[#allocation21] ss:$0 sm:$0xff] }
0x14a3   :  { %v3978_v51 = vpop.eup %3977 }
0x14a4   :  { %v2703_v8 = vmul.f32 %v3978_v51, %v2675_v9  ;;  %v2721_v20 = vadd.f32 %v3263_v63, %v2711_v5  ;;  %v2712_v13 = vmul.f32 %v3262_v56, %v2702_v4  ;;  %v3276_v51 = vld [vmem:[#allocation22] ss:$0 sm:$0xff] }
0x14a6   :  { %v3696_v30 = vpack.c.bf16 %v2721_v20, %v2720_v11  ;;  %v2713_v14 = vmul.f32 %v3262_v56, %v2703_v8  ;;  %v2722_v54 = vadd.f32 %v3263_v63, %v2712_v13 }
0x14a8   :  { %3697 = vmatpush3.bf16.msra.mxu1 %v3696_v30  ;;  %v2723_v55 = vadd.f32 %v3263_v63, %v2713_v14 }
0x14a9   :  { %3698 = vmatprep.subr.bf16.mxu1 %v4331_v26  ;;  %v3851_v26 = vld [vmem:[%s5345_s21] sm:$0xff]  }
0x14aa   :  { %v3699_v57 = vpack.c.bf16 %v2723_v55, %v2722_v54  ;;  %3676 = vmatpush3.bf16.msra.mxu0 %v3851_v26 }
0x14ab   :  { %3677 = vmatprep.subr.bf16.mxu0 %v4329_v2 }
0x14ac   :  { %3700 = vmatpush3.bf16.msra.mxu1 %v3699_v57 }
0x14ad   :  { %3655 = vmatprep.subr.bf16.mxu1 %v4329_v2 }
0x14ae   :  { %3678 = vmatpush3.bf16.msra.mxu0 %v3852_v12 }
0x14af   :  { %3653 = vmatmul.mubr.msk.f32.vlgmr.msra.gmra.mrb[32].mxu1 %vm691_vm4, %v2724_v15  ;;  %3679 = vmatprep.subr.bf16.mxu0 %v4329_v2 }
0x14b0   :  { %3656 = vmatpush3.bf16.msra.mxu1 %v3843_v58  ;;  %3671 = vmatprep.mubr.msk.bf16.mxu1 %vm4332_vm5, %v4329_v2 }
0x14b1   :  { %3657 = vmatprep.subr.bf16.mxu1 %v4329_v2 }
0x14b2   :  { %3680 = vmatpush3.bf16.msra.mxu0 %v3853_v52 }
0x14b3   :  { %3681 = vmatprep.subr.bf16.mxu0 %v4329_v2 }
0x14b4   :  { %3658 = vmatpush3.bf16.msra.mxu1 %v3844_v32 }
0x14b5   :  { %3659 = vmatprep.subr.bf16.mxu1 %v4329_v2 }
0x14b6   :  { %3682 = vmatpush3.bf16.msra.mxu0 %v3854_v22 }
0x14b7   :  { %3683 = vmatprep.subr.bf16.mxu0 %v4329_v2 }
0x14b8   :  { %3660 = vmatpush3.bf16.msra.mxu1 %v3845_v16 }
0x14b9   :  { %3661 = vmatprep.subr.bf16.mxu1 %v4329_v2 }
0x14bc   :  { %3662 = vmatpush3.bf16.msra.mxu1 %v3846_v17 }
0x14bd   :  { %3663 = vmatprep.subr.bf16.mxu1 %v4329_v2 }
0x14c0   :  { %3664 = vmatpush3.bf16.msra.mxu1 %v3847_v29 }
0x14c1   :  { %3665 = vmatprep.subr.bf16.mxu1 %v4329_v2 }
0x14c4   :  { %3666 = vmatpush3.bf16.msra.mxu1 %v3848_v34 }
0x14c5   :  { %3667 = vmatprep.subr.bf16.mxu1 %v4329_v2 }
0x14c8   :  { %3668 = vmatpush3.bf16.msra.mxu1 %v3849_v18 }
0x14c9   :  { %3669 = vmatprep.subr.bf16.mxu1 %v4329_v2 }
0x14cc   :  { %3670 = vmatpush3.bf16.msra.mxu1 %v3850_v23 }
0x1582   :  { %v2794_v6 = vpop.f32.mrb[32].mxu1 }
0x1583   :  { %v2815_v24 = vpack.c.bf16 %v2794_v6, %v2794_v6  ;;  %v3654_v25 = vpop.f32.mrb[33].mxu1 }
0x1585   :  { %3672 = vmatmul.mubr.bf16.vlgmr.msra.gmra.mrb[36].mxu1 %v2815_v24 }
0x1658   :  { %v2904_v27 = vpop.f32.mrb[36].mxu1 }
0x1659   :  { %v2905_v7 = vadd.f32 %v3265_v21, %v2904_v27  ;;  %v3673_v35 = vpop.f32.mrb[37].mxu1 }
0x165a   :  { %v2907_v0 = vpop.f32.mrb[38].mxu1 }
0x165b   :  { %v2910_v28 = vmul.f32 %v2905_v7, %v2905_v7  ;;  %v3674_v36 = vpop.f32.mrb[39].mxu1 }
0x165d   :  { %v2911_v38 = vmul.f32 %v2910_v28, %v2905_v7 }
0x165f   :  { %v2912_v31 = vmul.f32 0.044715, %v2911_v38 }
0x1661   :  { %v2913_v33 = vadd.f32 %v2912_v31, %v2905_v7 }
0x1663   :  { %v2914_v37 = vmul.f32 0.7978846, %v2913_v33 }
0x1665   :  { %3979 = vtanh.f32 %v2914_v37 }
0x166f   :  { %v3980_v40 = vpop.eup %3979 }
0x1670   :  { %v2916_v42 = vadd.f32 1.0, %v3980_v40 }
0x1672   :  { %v2917_v43 = vmul.f32 0.5, %v2916_v42 }
0x1674   :  { %v2918_v44 = vmul.f32 %v2917_v43, %v2905_v7 }
0x1676   :  { %v2921_v9 = vmul.f32 %v4649_v3, %v2918_v44 }
0x1678   :  { %v2923_v10 = vsel %vm2922_vm6, %v2921_v9, 0.0 }
0x1679   :  { %2924 = vadd.xlane.f32.xlu0 %v2923_v10 }
0x1706   :  { %v2925_v1 = vpop.xlane.xlu0 %2924 }
0x1707   :  { %v2926_v45 = vmul.f32 0.03125, %v2925_v1 }
0x1709   :  { %v2927_v48 = vsub.f32 %v2921_v9, %v2926_v45 }
0x170b   :  { %v2928_v19 = vmul.f32 %v4649_v3, %v2927_v48  ;;  %v3855_v3 = vld [vmem:[%s5345_s21 + $0x20] sm:$0xff]  }
0x170c   :  { %3684 = vmatpush3.bf16.msra.mxu0 %v3855_v3 }
0x170d   :  { %v2929_v49 = vmul.f32 %v2928_v19, %v2928_v19  ;;  %3685 = vmatprep.subr.bf16.mxu0 %v4329_v2 }
0x170f   :  { %v2930_v50 = vsel %vm2922_vm6, %v2929_v49, 0.0 }
0x1710   :  { %2931 = vadd.xlane.f32.xlu1 %v2930_v50  ;;  %3686 = vmatpush3.bf16.msra.mxu0 %v3856_v46 }
0x1711   :  { %3687 = vmatprep.subr.bf16.mxu0 %v4329_v2 }
0x1714   :  { %3688 = vmatpush3.bf16.msra.mxu0 %v3857_v53 }
0x1715   :  { %3689 = vmatprep.subr.bf16.mxu0 %v4329_v2 }
0x1718   :  { %3690 = vmatpush3.bf16.msra.mxu0 %v3858_v39 }
0x179d   :  { %v2932_v41 = vpop.xlane.xlu1 %2931 }
0x179e   :  { %v2933_v56 = vmul.f32 0.03125, %v2932_v41 }
0x17a0   :  { %v2934_v59 = vadd.f32 1e-12, %v2933_v56 }
0x17a2   :  { %3981 = vrsqrt.f32 %v2934_v59 }
0x17ac   :  { %v3982_v60 = vpop.eup %3981 }
0x17ad   :  { %v2936_v61 = vmul.f32 %v3982_v60, %v2928_v19 }
0x17af   :  { %v2943_v63 = vmul.f32 %v3274_v47, %v2936_v61 }
0x17b1   :  { %v2950_v4 = vadd.f32 %v3275_v62, %v2943_v63 }
0x17b3   :  { %v2968_v5 = vpack.c.bf16 %v2950_v4, %v2950_v4 }
0x17b5   :  { %3692 = vmatmul.mubr.bf16.vlgmr.msra.gmra.mrb[40].mxu0 %v2968_v5 }
0x1888   :  { %v3057_v8 = vpop.f32.mrb[40].mxu0 }
0x1889   :  { %v3058_v11 = vadd.f32 %v3276_v51, %v3057_v8  ;;  %v3693_v20 = vpop.f32.mrb[41].mxu0 }
0x188a   :  { %v3060_v13 = vpop.f32.mrb[42].mxu0 }
0x188b   :  { %3063 = vst [vmem:[%s5347_s23] sm:$0x3] %v3058_v11  ;;  %v3694_v2 = vpop.f32.mrb[43].mxu0 }
0x188c   :  { %3068 = vsyncpa [#allocation3], 1 }
0x188d   :  { %3069 = vsyncpa [#allocation5], 1 }
0x188e   :  { %3070 = vsyncpa [#allocation8], 1 }
0x188f   :  { %3071 = vsyncpa [#allocation11], 1 }
0x1890   :  { %3072 = vsyncpa [#allocation14], 1 }
0x1891   :  { %3073 = vsyncpa [#allocation17], 1 }
0x1892   :  { %3074 = vsyncpa [#allocation20], 1 }
0x1893   :  { %3075 = vsyncpa [#allocation23], 1 }

</bundles_post_ra>
